<compile_context>
chip_gen: v5e
topology: v5e:2x2
jax: 0.10.0
libtpu: 0.0.40
codegen_flags: <defaults>
</compile_context>

<pallas_src>
import math

import jax
import jax.numpy as jnp
from jax.experimental import pallas as pl
from jax.experimental.pallas import tpu as pltpu


# ---------------------------------------------------------------------------
# Fused Down kernel (one batch element per grid step)
# ---------------------------------------------------------------------------

def _down_kernel(xh_ref, xl_ref,
                 w1hh_ref, w1hl_ref, w1l_ref, bn1h_ref, bn1l_ref,
                 w2hh_ref, w2hl_ref, w2l_ref, bn2h_ref, bn2l_ref,
                 oh_ref, ol_ref,
                 pad_h_ref, pad_l_ref):
    # xh_ref: (1, H0, W0//2, 2*in_h)  NHWC with the (w%2, c) pair packed on lanes
    # xl_ref: (1, H0l, W0l//2, 2*in_l)
    # w*    : (9*Cin, Cout) tap-major im2col weights (bf16); w?l is [l2h | l2l]
    # bn*   : (2, Cout) f32 [scale; shift] (eval-mode BN folded)
    H1 = xh_ref.shape[1] // 2          # high-freq spatial after the entry maxpool
    W1 = xh_ref.shape[2]
    H2 = xl_ref.shape[1] // 2          # low-freq spatial after the entry maxpool
    W2 = xl_ref.shape[2]
    out_h = bn1h_ref.shape[1]
    out_l = bn1l_ref.shape[1]

    # ---- zero ONLY the conv-padding border, once per grid step --------------
    # (the interior [1:H+1, 1:W+1, 0:Cin] is fully rewritten before every use,
    #  and taps never read interior channels beyond the current Cin)
    def zero_border(pad_ref, H, W):
        Cp = pad_ref.shape[2]
        z_row = jnp.zeros((1, W + 2, Cp), pad_ref.dtype)
        z_col = jnp.zeros((H + 2, 1, Cp), pad_ref.dtype)
        pad_ref[0:1, :, :] = z_row
        pad_ref[H + 1:H + 2, :, :] = z_row
        pad_ref[:, 0:1, :] = z_col
        pad_ref[:, W + 1:W + 2, :] = z_col

    zero_border(pad_h_ref, H1, W1)
    zero_border(pad_l_ref, H2, W2)

    # ---- helpers -------------------------------------------------------------
    def maxpool2x2_packed(ref):
        # entry 2x2 stride-2 maxpool; the (w%2) pair is pre-packed on the lane
        # axis so pooling needs no strided access.
        _, H, Wo, C2 = ref.shape
        C = C2 // 2
        Ho = H // 2
        x = ref[0].reshape(Ho, 2, Wo, C2)               # split leading dim only
        m = jnp.maximum(x[:, 0], x[:, 1])               # pool along H
        m = jnp.maximum(m[:, :, 0:C], m[:, :, C:C2])    # pool along W (lane halves)
        return m.reshape(Ho * Wo, C)                    # flat (H*W, C), f32

    def im2col(pad_ref, x_flat, H, W):
        # 3x3 / pad=1 patches: one interior block store, then the 9 shifted taps.
        Cin = x_flat.shape[1]
        pad_ref[1:H + 1, 1:W + 1, 0:Cin] = (
            x_flat.reshape(H, W, Cin).astype(pad_ref.dtype))
        taps = [pad_ref[dh:dh + H, dw:dw + W, 0:Cin].reshape(H * W, Cin)
                for dh in range(3) for dw in range(3)]
        # bf16 at the matmul boundary; everything else stays f32.
        return jnp.concatenate(taps, axis=1).astype(jnp.bfloat16)  # (H*W, 9*Cin)

    def conv(patches, w_ref):
        # (H*W, 9*Cin) bf16 @ (9*Cin, Cout) bf16 -> f32 accumulation on the MXU
        return jnp.dot(patches, w_ref[...], preferred_element_type=jnp.float32)

    def bn_relu(x, bn_ref):
        return jnp.maximum(x * bn_ref[0:1, :] + bn_ref[1:2, :], 0.0)

    def upsample2x(x, Hs, Ws):
        # nearest-neighbour 2x upsample on the flat layout: (Hs*Ws, C) -> (4*Hs*Ws, C)
        C = x.shape[1]
        # duplicate along W: flat row r -> rows 2r, 2r+1 (width doubles)
        xw = jnp.broadcast_to(x[:, None, :], (Hs * Ws, 2, C)).reshape(2 * Hs * Ws, C)
        # duplicate along H: image row i -> rows 2i, 2i+1
        t = xw.reshape(Hs, 2 * Ws, C)
        t = jnp.broadcast_to(t[:, None, :, :], (Hs, 2, 2 * Ws, C))
        return t.reshape(4 * Hs * Ws, C)

    def avgpool2x2(x, Hs, Ws):
        # 2x2 stride-2 average pool on the flat (Hs*Ws, C) layout
        C = x.shape[1]
        t = x.reshape(Hs * Ws // 2, 2, C)               # adjacent-W pairs
        tw = (t[:, 0, :] + t[:, 1, :]) * 0.5            # (Hs, Ws//2) flat
        t2 = tw.reshape(Hs // 2, 2, Ws // 2, C)         # adjacent-H pairs (outer dims)
        return ((t2[:, 0] + t2[:, 1]) * 0.5).reshape((Hs // 2) * (Ws // 2), C)

    def oct_layer(xh, xl, whh_ref, whl_ref, wl_ref, bnh_ref, bnl_ref):
        # low-frequency input: ONE patch build, ONE fused matmul for [l2h | l2l]
        p_low = im2col(pad_l_ref, xl, H2, W2)
        l2x = conv(p_low, wl_ref)                       # (hw2, out_h + out_l)
        l2h = l2x[:, 0:out_h]
        l2l = l2x[:, out_h:out_h + out_l]
        # high-frequency branch: relu(bn(h2h + upsample2(l2h)))
        h2h = conv(im2col(pad_h_ref, xh, H1, W1), whh_ref)
        yh = bn_relu(h2h + upsample2x(l2h, H2, W2), bnh_ref)
        # low-frequency branch: relu(bn(h2l(avgpool2(xh)) + l2l))
        h2l = conv(im2col(pad_l_ref, avgpool2x2(xh, H1, W1), H2, W2), whl_ref)
        yl = bn_relu(h2l + l2l, bnl_ref)
        return yh, yl

    # entry maxpool (self.mp) on both octaves, then DoubleConv (2x Conv_BN_ACT)
    xh = maxpool2x2_packed(xh_ref)      # (H1*W1, in_h)
    xl = maxpool2x2_packed(xl_ref)      # (H2*W2, in_l)
    xh, xl = oct_layer(xh, xl, w1hh_ref, w1hl_ref, w1l_ref, bn1h_ref, bn1l_ref)
    xh, xl = oct_layer(xh, xl, w2hh_ref, w2hl_ref, w2l_ref, bn2h_ref, bn2l_ref)
    # TODO(synk): emit lane-dense transposed (C, H*W) outputs to avoid masked
    # writeback stores when out_h/out_l < 128.
    oh_ref[0] = xh.astype(oh_ref.dtype)
    ol_ref[0] = xl.astype(ol_ref.dtype)


# ---------------------------------------------------------------------------
# Wrapper
# ---------------------------------------------------------------------------

def down_forward(x_h_nchw, x_l_nchw, params):
    """Down.forward on NCHW (PyTorch-style) octave inputs; returns NCHW."""
    N, in_h, H0, W0 = x_h_nchw.shape
    _, in_l, H0l, W0l = x_l_nchw.shape
    p1, p2 = params["conv1"], params["conv2"]
    out_h = p1["w_h2h"].shape[1]
    out_l = p1["w_h2l"].shape[1]

    H1, W1 = H0 // 2, W0 // 2          # high-freq spatial after maxpool
    H2, W2 = H1 // 2, W1 // 2          # low-freq spatial after maxpool
    hw1, hw2 = H1 * W1, H2 * W2
    assert (H0l, W0l) == (H1, W1), "octave low input must be half resolution"

    # NHWC + (w%2, c) lane packing: one cheap layout pass on the raw inputs only.
    xh = jnp.transpose(x_h_nchw, (0, 2, 3, 1)).reshape(N, H0, W0 // 2, 2 * in_h)
    xl = jnp.transpose(x_l_nchw, (0, 2, 3, 1)).reshape(N, H0l, W0l // 2, 2 * in_l)

    # bf16 weights for the MXU; fused [l2h | l2l] weight per layer.
    bf16 = jnp.bfloat16
    w1hh, w1hl = p1["w_h2h"].astype(bf16), p1["w_h2l"].astype(bf16)
    w2hh, w2hl = p2["w_h2h"].astype(bf16), p2["w_h2l"].astype(bf16)
    w1l = jnp.concatenate([p1["w_l2h"], p1["w_l2l"]], axis=1).astype(bf16)
    w2l = jnp.concatenate([p2["w_l2h"], p2["w_l2l"]], axis=1).astype(bf16)

    c_pad_h = max(in_h, out_h)
    c_pad_l = max(in_h, in_l, out_h, out_l)

    def bcast_spec(shape):
        nd = len(shape)
        return pl.BlockSpec(shape, lambda n, _nd=nd: (0,) * _nd)

    in_specs = [
        pl.BlockSpec((1,) + xh.shape[1:], lambda n: (n, 0, 0, 0)),
        pl.BlockSpec((1,) + xl.shape[1:], lambda n: (n, 0, 0, 0)),
        bcast_spec(w1hh.shape), bcast_spec(w1hl.shape), bcast_spec(w1l.shape),
        bcast_spec(p1["bn_h"].shape), bcast_spec(p1["bn_l"].shape),
        bcast_spec(w2hh.shape), bcast_spec(w2hl.shape), bcast_spec(w2l.shape),
        bcast_spec(p2["bn_h"].shape), bcast_spec(p2["bn_l"].shape),
    ]
    out_specs = [
        pl.BlockSpec((1, hw1, out_h), lambda n: (n, 0, 0)),
        pl.BlockSpec((1, hw2, out_l), lambda n: (n, 0, 0)),
    ]
    out_shape = (
        jax.ShapeDtypeStruct((N, hw1, out_h), x_h_nchw.dtype),
        jax.ShapeDtypeStruct((N, hw2, out_l), x_h_nchw.dtype),
    )

    # TODO(synk): row-strip tiling (grid=(N, H1//STRIP) with 1-row halo) for
    # real UNet sizes so the per-step working set fits v7x's 64 MiB VMEM.
    yh_flat, yl_flat = pl.pallas_call(
        _down_kernel,
        out_shape=out_shape,
        grid=(N,),
        in_specs=in_specs,
        out_specs=out_specs,
        scratch_shapes=[
            pltpu.VMEM((H1 + 2, W1 + 2, c_pad_h), jnp.float32),   # padded hi tile
            pltpu.VMEM((H2 + 2, W2 + 2, c_pad_l), jnp.float32),   # padded lo tile
        ],
        compiler_params=pltpu.CompilerParams(
            dimension_semantics=("parallel",),
            vmem_limit_bytes=64 * 1024 * 1024),
    )(xh, xl,
      w1hh, w1hl, w1l, p1["bn_h"], p1["bn_l"],
      w2hh, w2hl, w2l, p2["bn_h"], p2["bn_l"])

    # (N, H*W, C) -> NCHW: one tiny relayout on the final (small) outputs only.
    y_h = jnp.transpose(yh_flat, (0, 2, 1)).reshape(N, out_h, H1, W1)
    y_l = jnp.transpose(yl_flat, (0, 2, 1)).reshape(N, out_l, H2, W2)
    return y_h, y_l


# ---------------------------------------------------------------------------
# Deterministic synthetic parameters (BN folded to eval-mode scale/shift)
# ---------------------------------------------------------------------------

def _conv_weight(key, cin, cout):
    # PyTorch OIHW (cout, cin, 3, 3) -> (9*cin, cout), tap-major / cin-minor
    w = jax.random.normal(key, (cout, cin, 3, 3), jnp.float32) / math.sqrt(cin * 9)
    return jnp.transpose(w, (2, 3, 1, 0)).reshape(9 * cin, cout)


def _bn_pack(key, c, eps=1e-5):
    k1, k2, k3, k4 = jax.random.split(key, 4)
    gamma = 1.0 + 0.1 * jax.random.normal(k1, (c,), jnp.float32)
    beta = 0.1 * jax.random.normal(k2, (c,), jnp.float32)
    mean = 0.1 * jax.random.normal(k3, (c,), jnp.float32)
    var = 1.0 + 0.1 * jnp.abs(jax.random.normal(k4, (c,), jnp.float32))
    scale = gamma / jnp.sqrt(var + eps)
    shift = beta - mean * scale
    return jnp.stack([scale, shift], axis=0)         # (2, c)


def _init_conv_bn_act(key, cin_h, cin_l, cout_h, cout_l):
    ks = jax.random.split(key, 6)
    return {
        "w_h2h": _conv_weight(ks[0], cin_h, cout_h),
        "w_h2l": _conv_weight(ks[1], cin_h, cout_l),
        "w_l2h": _conv_weight(ks[2], cin_l, cout_h),
        "w_l2l": _conv_weight(ks[3], cin_l, cout_l),
        "bn_h": _bn_pack(ks[4], cout_h),
        "bn_l": _bn_pack(ks[5], cout_l),
    }


def make_down_params(key, in_ch, out_ch):
    in_l = in_ch // 2
    in_h = in_ch - in_l
    out_l = out_ch // 2
    out_h = out_ch - out_l
    k1, k2 = jax.random.split(key)
    return {
        "conv1": _init_conv_bn_act(k1, in_h, in_l, out_h, out_l),
        "conv2": _init_conv_bn_act(k2, out_h, out_l, out_h, out_l),
    }


# ---------------------------------------------------------------------------
# Pure-JAX/XLA reference of the same module (for a numerical self-check)
# ---------------------------------------------------------------------------

def _ref_conv3x3(x, w_flat):
    cout = w_flat.shape[1]
    cin = x.shape[1]
    w = w_flat.reshape(3, 3, cin, cout)                # HWIO
    return jax.lax.conv_general_dilated(
        x, w, window_strides=(1, 1), padding=((1, 1), (1, 1)),
        dimension_numbers=("NCHW", "HWIO", "NCHW"))


def _ref_pool(x, kind):
    if kind == "max":
        return jax.lax.reduce_window(x, -jnp.inf, jax.lax.max,
                                     (1, 1, 2, 2), (1, 1, 2, 2), "VALID")
    s = jax.lax.reduce_window(x, 0.0, jax.lax.add,
                              (1, 1, 2, 2), (1, 1, 2, 2), "VALID")
    return s * 0.25


def _ref_oct_layer(xh, xl, p):
    h2h = _ref_conv3x3(xh, p["w_h2h"])
    l2h = _ref_conv3x3(xl, p["w_l2h"])
    l2h = jnp.repeat(jnp.repeat(l2h, 2, axis=2), 2, axis=3)
    sh, bh = p["bn_h"][0], p["bn_h"][1]
    yh = jnp.maximum((h2h + l2h) * sh[None, :, None, None]
                     + bh[None, :, None, None], 0.0)
    h2l = _ref_conv3x3(_ref_pool(xh, "avg"), p["w_h2l"])
    l2l = _ref_conv3x3(xl, p["w_l2l"])
    sl, bl = p["bn_l"][0], p["bn_l"][1]
    yl = jnp.maximum((h2l + l2l) * sl[None, :, None, None]
                     + bl[None, :, None, None], 0.0)
    return yh, yl


def down_reference(x_h, x_l, params):
    x_h, x_l = _ref_pool(x_h, "max"), _ref_pool(x_l, "max")
    x_h, x_l = _ref_oct_layer(x_h, x_l, params["conv1"])
    x_h, x_l = _ref_oct_layer(x_h, x_l, params["conv2"])
    return x_h, x_l


# ---------------------------------------------------------------------------

if __name__ == "__main__":
    key = jax.random.PRNGKey(0)
    k_xh, k_xl, k_p = jax.random.split(key, 3)

    N = 2
    in_ch, out_ch = 4, 8                     # octave alpha = 0.5
    in_l, in_h = in_ch // 2, in_ch - in_ch // 2
    out_l, out_h = out_ch // 2, out_ch - out_ch // 2
    H = 16                                   # high-freq spatial; low-freq is H//2

    # PyTorch-style NCHW octave inputs
    x_h = jax.random.normal(k_xh, (N, in_h, H, H), jnp.float32)
    x_l = jax.random.normal(k_xl, (N, in_l, H // 2, H // 2), jnp.float32)
    params = make_down_params(k_p, in_ch, out_ch)

    fwd = jax.jit(down_forward)
    y_h, y_l = fwd(x_h, x_l, params)
    jax.block_until_ready((y_h, y_l))

    assert y_h.shape == (N, out_h, H // 2, H // 2)
    assert y_l.shape == (N, out_l, H // 4, H // 4)

    # numerical self-check against a pure-f32 XLA reference of the same module;
    # the kernel feeds the MXU bf16, so tolerance is relaxed vs. the f32 gold.
    r_h, r_l = jax.jit(down_reference)(x_h, x_l, params)
    err = max(float(jnp.max(jnp.abs(y_h - r_h))),
              float(jnp.max(jnp.abs(y_l - r_l))))
    assert err < 1e-1, f"numerical mismatch vs reference: {err}"

    print("KERNEL_OK")
</pallas_src>

<mosaic_0001>
module attributes {stable_mosaic.version = 11 : i64} {
  func.func @_down_kernel(%arg0: i32, %arg1: memref<1x16x8x4xf32, #tpu.memory_space<vmem>>, %arg2: memref<1x8x4x4xf32, #tpu.memory_space<vmem>>, %arg3: memref<18x4xbf16, #tpu.memory_space<vmem>>, %arg4: memref<18x4xbf16, #tpu.memory_space<vmem>>, %arg5: memref<18x8xbf16, #tpu.memory_space<vmem>>, %arg6: memref<2x4xf32, #tpu.memory_space<vmem>>, %arg7: memref<2x4xf32, #tpu.memory_space<vmem>>, %arg8: memref<36x4xbf16, #tpu.memory_space<vmem>>, %arg9: memref<36x4xbf16, #tpu.memory_space<vmem>>, %arg10: memref<36x8xbf16, #tpu.memory_space<vmem>>, %arg11: memref<2x4xf32, #tpu.memory_space<vmem>>, %arg12: memref<2x4xf32, #tpu.memory_space<vmem>>, %arg13: memref<1x64x4xf32, #tpu.memory_space<vmem>>, %arg14: memref<1x16x4xf32, #tpu.memory_space<vmem>>, %arg15: memref<10x10x4xf32, #tpu.memory_space<vmem>>, %arg16: memref<6x6x4xf32, #tpu.memory_space<vmem>>) attributes {dimension_semantics = [#tpu.dimension_semantics<parallel>], iteration_bounds = array<i64: 2>, scalar_prefetch = 0 : i64, scratch_operands = 2 : i64, tpu.core_type = #tpu.core_type<tc>, window_params = [{transform_indices = @transform_0, window_bounds = array<i64: 1, 16, 8, 4>}, {transform_indices = @transform_1, window_bounds = array<i64: 1, 8, 4, 4>}, {pipeline_mode = #tpu.pipeline_mode<synchronous>, transform_indices = @transform_2, window_bounds = array<i64: 18, 4>}, {pipeline_mode = #tpu.pipeline_mode<synchronous>, transform_indices = @transform_3, window_bounds = array<i64: 18, 4>}, {pipeline_mode = #tpu.pipeline_mode<synchronous>, transform_indices = @transform_4, window_bounds = array<i64: 18, 8>}, {pipeline_mode = #tpu.pipeline_mode<synchronous>, transform_indices = @transform_5, window_bounds = array<i64: 2, 4>}, {pipeline_mode = #tpu.pipeline_mode<synchronous>, transform_indices = @transform_6, window_bounds = array<i64: 2, 4>}, {pipeline_mode = #tpu.pipeline_mode<synchronous>, transform_indices = @transform_7, window_bounds = array<i64: 36, 4>}, {pipeline_mode = #tpu.pipeline_mode<synchronous>, transform_indices = @transform_8, window_bounds = array<i64: 36, 4>}, {pipeline_mode = #tpu.pipeline_mode<synchronous>, transform_indices = @transform_9, window_bounds = array<i64: 36, 8>}, {pipeline_mode = #tpu.pipeline_mode<synchronous>, transform_indices = @transform_10, window_bounds = array<i64: 2, 4>}, {pipeline_mode = #tpu.pipeline_mode<synchronous>, transform_indices = @transform_11, window_bounds = array<i64: 2, 4>}, {transform_indices = @transform_12, window_bounds = array<i64: 1, 64, 4>}, {transform_indices = @transform_13, window_bounds = array<i64: 1, 16, 4>}]} {
    %cst = arith.constant 0.000000e+00 : f32
    %0 = vector.broadcast %cst : f32 to vector<1x10x4xf32>
    %cst_0 = arith.constant 0.000000e+00 : f32
    %1 = vector.broadcast %cst_0 : f32 to vector<10x1x4xf32>
    %c0 = arith.constant 0 : index
    %c0_1 = arith.constant 0 : index
    %c0_2 = arith.constant 0 : index
    %2 = vector.load %arg15[%c0, %c0_1, %c0_2] : memref<10x10x4xf32, #tpu.memory_space<vmem>>, vector<1x10x4xf32>
    tpu.vector_store %arg15[%c0, %c0_1, %c0_2], %0 {strides = array<i32>} : memref<10x10x4xf32, #tpu.memory_space<vmem>>, vector<1x10x4xf32>,
    %c9 = arith.constant 9 : index
    %c0_3 = arith.constant 0 : index
    %c0_4 = arith.constant 0 : index
    %3 = vector.load %arg15[%c9, %c0_3, %c0_4] : memref<10x10x4xf32, #tpu.memory_space<vmem>>, vector<1x10x4xf32>
    tpu.vector_store %arg15[%c9, %c0_3, %c0_4], %0 {strides = array<i32>} : memref<10x10x4xf32, #tpu.memory_space<vmem>>, vector<1x10x4xf32>,
    %c0_5 = arith.constant 0 : index
    %c0_6 = arith.constant 0 : index
    %c0_7 = arith.constant 0 : index
    %4 = vector.load %arg15[%c0_5, %c0_6, %c0_7] : memref<10x10x4xf32, #tpu.memory_space<vmem>>, vector<10x1x4xf32>
    tpu.vector_store %arg15[%c0_5, %c0_6, %c0_7], %1 {strides = array<i32>} : memref<10x10x4xf32, #tpu.memory_space<vmem>>, vector<10x1x4xf32>,
    %c0_8 = arith.constant 0 : index
    %c9_9 = arith.constant 9 : index
    %c0_10 = arith.constant 0 : index
    %5 = vector.load %arg15[%c0_8, %c9_9, %c0_10] : memref<10x10x4xf32, #tpu.memory_space<vmem>>, vector<10x1x4xf32>
    tpu.vector_store %arg15[%c0_8, %c9_9, %c0_10], %1 {strides = array<i32>} : memref<10x10x4xf32, #tpu.memory_space<vmem>>, vector<10x1x4xf32>,
    %cst_11 = arith.constant 0.000000e+00 : f32
    %6 = vector.broadcast %cst_11 : f32 to vector<1x6x4xf32>
    %cst_12 = arith.constant 0.000000e+00 : f32
    %7 = vector.broadcast %cst_12 : f32 to vector<6x1x4xf32>
    %c0_13 = arith.constant 0 : index
    %c0_14 = arith.constant 0 : index
    %c0_15 = arith.constant 0 : index
    %8 = vector.load %arg16[%c0_13, %c0_14, %c0_15] : memref<6x6x4xf32, #tpu.memory_space<vmem>>, vector<1x6x4xf32>
    tpu.vector_store %arg16[%c0_13, %c0_14, %c0_15], %6 {strides = array<i32>} : memref<6x6x4xf32, #tpu.memory_space<vmem>>, vector<1x6x4xf32>,
    %c5 = arith.constant 5 : index
    %c0_16 = arith.constant 0 : index
    %c0_17 = arith.constant 0 : index
    %9 = vector.load %arg16[%c5, %c0_16, %c0_17] : memref<6x6x4xf32, #tpu.memory_space<vmem>>, vector<1x6x4xf32>
    tpu.vector_store %arg16[%c5, %c0_16, %c0_17], %6 {strides = array<i32>} : memref<6x6x4xf32, #tpu.memory_space<vmem>>, vector<1x6x4xf32>,
    %c0_18 = arith.constant 0 : index
    %c0_19 = arith.constant 0 : index
    %c0_20 = arith.constant 0 : index
    %10 = vector.load %arg16[%c0_18, %c0_19, %c0_20] : memref<6x6x4xf32, #tpu.memory_space<vmem>>, vector<6x1x4xf32>
    tpu.vector_store %arg16[%c0_18, %c0_19, %c0_20], %7 {strides = array<i32>} : memref<6x6x4xf32, #tpu.memory_space<vmem>>, vector<6x1x4xf32>,
    %c0_21 = arith.constant 0 : index
    %c5_22 = arith.constant 5 : index
    %c0_23 = arith.constant 0 : index
    %11 = vector.load %arg16[%c0_21, %c5_22, %c0_23] : memref<6x6x4xf32, #tpu.memory_space<vmem>>, vector<6x1x4xf32>
    tpu.vector_store %arg16[%c0_21, %c5_22, %c0_23], %7 {strides = array<i32>} : memref<6x6x4xf32, #tpu.memory_space<vmem>>, vector<6x1x4xf32>,
    %c0_24 = arith.constant 0 : index
    %c0_25 = arith.constant 0 : index
    %c0_26 = arith.constant 0 : index
    %c0_27 = arith.constant 0 : index
    %12 = vector.load %arg1[%c0_24, %c0_25, %c0_26, %c0_27] : memref<1x16x8x4xf32, #tpu.memory_space<vmem>>, vector<1x16x8x4xf32>
    %13 = vector.shape_cast %12 : vector<1x16x8x4xf32> to vector<16x8x4xf32>
    %14 = vector.shape_cast %13 : vector<16x8x4xf32> to vector<8x2x8x4xf32>
    %15 = vector.extract_strided_slice %14 {offsets = [0, 0, 0, 0], sizes = [8, 1, 8, 4], strides = [1, 1, 1, 1]} : vector<8x2x8x4xf32> to vector<8x1x8x4xf32>
    %16 = vector.shape_cast %15 : vector<8x1x8x4xf32> to vector<8x8x4xf32>
    %17 = vector.extract_strided_slice %14 {offsets = [0, 1, 0, 0], sizes = [8, 1, 8, 4], strides = [1, 1, 1, 1]} : vector<8x2x8x4xf32> to vector<8x1x8x4xf32>
    %18 = vector.shape_cast %17 : vector<8x1x8x4xf32> to vector<8x8x4xf32>
    %19 = arith.maximumf %16, %18 : vector<8x8x4xf32>
    %20 = vector.extract_strided_slice %19 {offsets = [0, 0, 0], sizes = [8, 8, 2], strides = [1, 1, 1]} : vector<8x8x4xf32> to vector<8x8x2xf32>
    %21 = vector.extract_strided_slice %19 {offsets = [0, 0, 2], sizes = [8, 8, 2], strides = [1, 1, 1]} : vector<8x8x4xf32> to vector<8x8x2xf32>
    %22 = arith.maximumf %20, %21 : vector<8x8x2xf32>
    %23 = vector.shape_cast %22 : vector<8x8x2xf32> to vector<64x2xf32>
    %c0_28 = arith.constant 0 : index
    %c0_29 = arith.constant 0 : index
    %c0_30 = arith.constant 0 : index
    %c0_31 = arith.constant 0 : index
    %24 = vector.load %arg2[%c0_28, %c0_29, %c0_30, %c0_31] : memref<1x8x4x4xf32, #tpu.memory_space<vmem>>, vector<1x8x4x4xf32>
    %25 = vector.shape_cast %24 : vector<1x8x4x4xf32> to vector<8x4x4xf32>
    %26 = vector.shape_cast %25 : vector<8x4x4xf32> to vector<4x2x4x4xf32>
    %27 = vector.extract_strided_slice %26 {offsets = [0, 0, 0, 0], sizes = [4, 1, 4, 4], strides = [1, 1, 1, 1]} : vector<4x2x4x4xf32> to vector<4x1x4x4xf32>
    %28 = vector.shape_cast %27 : vector<4x1x4x4xf32> to vector<4x4x4xf32>
    %29 = vector.extract_strided_slice %26 {offsets = [0, 1, 0, 0], sizes = [4, 1, 4, 4], strides = [1, 1, 1, 1]} : vector<4x2x4x4xf32> to vector<4x1x4x4xf32>
    %30 = vector.shape_cast %29 : vector<4x1x4x4xf32> to vector<4x4x4xf32>
    %31 = arith.maximumf %28, %30 : vector<4x4x4xf32>
    %32 = vector.extract_strided_slice %31 {offsets = [0, 0, 0], sizes = [4, 4, 2], strides = [1, 1, 1]} : vector<4x4x4xf32> to vector<4x4x2xf32>
    %33 = vector.extract_strided_slice %31 {offsets = [0, 0, 2], sizes = [4, 4, 2], strides = [1, 1, 1]} : vector<4x4x4xf32> to vector<4x4x2xf32>
    %34 = arith.maximumf %32, %33 : vector<4x4x2xf32>
    %35 = vector.shape_cast %34 : vector<4x4x2xf32> to vector<16x2xf32>
    %36 = vector.shape_cast %35 : vector<16x2xf32> to vector<4x4x2xf32>
    %c1 = arith.constant 1 : index
    %c1_32 = arith.constant 1 : index
    %c0_33 = arith.constant 0 : index
    %37 = vector.load %arg16[%c1, %c1_32, %c0_33] : memref<6x6x4xf32, #tpu.memory_space<vmem>>, vector<4x4x2xf32>
    tpu.vector_store %arg16[%c1, %c1_32, %c0_33], %36 {strides = array<i32>} : memref<6x6x4xf32, #tpu.memory_space<vmem>>, vector<4x4x2xf32>,
    %c0_34 = arith.constant 0 : index
    %c0_35 = arith.constant 0 : index
    %c0_36 = arith.constant 0 : index
    %38 = vector.load %arg16[%c0_34, %c0_35, %c0_36] : memref<6x6x4xf32, #tpu.memory_space<vmem>>, vector<4x4x2xf32>
    %39 = vector.shape_cast %38 : vector<4x4x2xf32> to vector<16x2xf32>
    %c0_37 = arith.constant 0 : index
    %c1_38 = arith.constant 1 : index
    %c0_39 = arith.constant 0 : index
    %40 = vector.load %arg16[%c0_37, %c1_38, %c0_39] : memref<6x6x4xf32, #tpu.memory_space<vmem>>, vector<4x4x2xf32>
    %41 = vector.shape_cast %40 : vector<4x4x2xf32> to vector<16x2xf32>
    %c0_40 = arith.constant 0 : index
    %c2 = arith.constant 2 : index
    %c0_41 = arith.constant 0 : index
    %42 = vector.load %arg16[%c0_40, %c2, %c0_41] : memref<6x6x4xf32, #tpu.memory_space<vmem>>, vector<4x4x2xf32>
    %43 = vector.shape_cast %42 : vector<4x4x2xf32> to vector<16x2xf32>
    %c1_42 = arith.constant 1 : index
    %c0_43 = arith.constant 0 : index
    %c0_44 = arith.constant 0 : index
    %44 = vector.load %arg16[%c1_42, %c0_43, %c0_44] : memref<6x6x4xf32, #tpu.memory_space<vmem>>, vector<4x4x2xf32>
    %45 = vector.shape_cast %44 : vector<4x4x2xf32> to vector<16x2xf32>
    %c1_45 = arith.constant 1 : index
    %c1_46 = arith.constant 1 : index
    %c0_47 = arith.constant 0 : index
    %46 = vector.load %arg16[%c1_45, %c1_46, %c0_47] : memref<6x6x4xf32, #tpu.memory_space<vmem>>, vector<4x4x2xf32>
    %47 = vector.shape_cast %46 : vector<4x4x2xf32> to vector<16x2xf32>
    %c1_48 = arith.constant 1 : index
    %c2_49 = arith.constant 2 : index
    %c0_50 = arith.constant 0 : index
    %48 = vector.load %arg16[%c1_48, %c2_49, %c0_50] : memref<6x6x4xf32, #tpu.memory_space<vmem>>, vector<4x4x2xf32>
    %49 = vector.shape_cast %48 : vector<4x4x2xf32> to vector<16x2xf32>
    %c2_51 = arith.constant 2 : index
    %c0_52 = arith.constant 0 : index
    %c0_53 = arith.constant 0 : index
    %50 = vector.load %arg16[%c2_51, %c0_52, %c0_53] : memref<6x6x4xf32, #tpu.memory_space<vmem>>, vector<4x4x2xf32>
    %51 = vector.shape_cast %50 : vector<4x4x2xf32> to vector<16x2xf32>
    %c2_54 = arith.constant 2 : index
    %c1_55 = arith.constant 1 : index
    %c0_56 = arith.constant 0 : index
    %52 = vector.load %arg16[%c2_54, %c1_55, %c0_56] : memref<6x6x4xf32, #tpu.memory_space<vmem>>, vector<4x4x2xf32>
    %53 = vector.shape_cast %52 : vector<4x4x2xf32> to vector<16x2xf32>
    %c2_57 = arith.constant 2 : index
    %c2_58 = arith.constant 2 : index
    %c0_59 = arith.constant 0 : index
    %54 = vector.load %arg16[%c2_57, %c2_58, %c0_59] : memref<6x6x4xf32, #tpu.memory_space<vmem>>, vector<4x4x2xf32>
    %55 = vector.shape_cast %54 : vector<4x4x2xf32> to vector<16x2xf32>
    %56 = tpu.concatenate %39, %41, %43, %45, %47, %49, %51, %53, %55 in 1 : vector<16x2xf32>, vector<16x2xf32>, vector<16x2xf32>, vector<16x2xf32>, vector<16x2xf32>, vector<16x2xf32>, vector<16x2xf32>, vector<16x2xf32>, vector<16x2xf32> -> vector<16x18xf32>
    %57 = arith.truncf %56 : vector<16x18xf32> to vector<16x18xbf16>
    %c0_60 = arith.constant 0 : index
    %c0_61 = arith.constant 0 : index
    %58 = vector.load %arg5[%c0_60, %c0_61] : memref<18x8xbf16, #tpu.memory_space<vmem>>, vector<18x8xbf16>
    %cst_62 = arith.constant dense<0.000000e+00> : vector<16x8xf32>
    %59 = tpu.matmul %57, %58, %cst_62 {dimension_numbers = #tpu.dot_dimension_numbers<[1], [0], [0], [1], [0, 0, 1, 1], [], []>} : vector<16x18xbf16>, vector<18x8xbf16>, vector<16x8xf32> -> vector<16x8xf32>
    %60 = vector.extract_strided_slice %59 {offsets = [0, 0], sizes = [16, 4], strides = [1, 1]} : vector<16x8xf32> to vector<16x4xf32>
    %61 = vector.extract_strided_slice %59 {offsets = [0, 4], sizes = [16, 4], strides = [1, 1]} : vector<16x8xf32> to vector<16x4xf32>
    %62 = vector.shape_cast %23 : vector<64x2xf32> to vector<8x8x2xf32>
    %c1_63 = arith.constant 1 : index
    %c1_64 = arith.constant 1 : index
    %c0_65 = arith.constant 0 : index
    %63 = vector.load %arg15[%c1_63, %c1_64, %c0_65] : memref<10x10x4xf32, #tpu.memory_space<vmem>>, vector<8x8x2xf32>
    tpu.vector_store %arg15[%c1_63, %c1_64, %c0_65], %62 {strides = array<i32>} : memref<10x10x4xf32, #tpu.memory_space<vmem>>, vector<8x8x2xf32>,
    %c0_66 = arith.constant 0 : index
    %c0_67 = arith.constant 0 : index
    %c0_68 = arith.constant 0 : index
    %64 = vector.load %arg15[%c0_66, %c0_67, %c0_68] : memref<10x10x4xf32, #tpu.memory_space<vmem>>, vector<8x8x2xf32>
    %65 = vector.shape_cast %64 : vector<8x8x2xf32> to vector<64x2xf32>
    %c0_69 = arith.constant 0 : index
    %c1_70 = arith.constant 1 : index
    %c0_71 = arith.constant 0 : index
    %66 = vector.load %arg15[%c0_69, %c1_70, %c0_71] : memref<10x10x4xf32, #tpu.memory_space<vmem>>, vector<8x8x2xf32>
    %67 = vector.shape_cast %66 : vector<8x8x2xf32> to vector<64x2xf32>
    %c0_72 = arith.constant 0 : index
    %c2_73 = arith.constant 2 : index
    %c0_74 = arith.constant 0 : index
    %68 = vector.load %arg15[%c0_72, %c2_73, %c0_74] : memref<10x10x4xf32, #tpu.memory_space<vmem>>, vector<8x8x2xf32>
    %69 = vector.shape_cast %68 : vector<8x8x2xf32> to vector<64x2xf32>
    %c1_75 = arith.constant 1 : index
    %c0_76 = arith.constant 0 : index
    %c0_77 = arith.constant 0 : index
    %70 = vector.load %arg15[%c1_75, %c0_76, %c0_77] : memref<10x10x4xf32, #tpu.memory_space<vmem>>, vector<8x8x2xf32>
    %71 = vector.shape_cast %70 : vector<8x8x2xf32> to vector<64x2xf32>
    %c1_78 = arith.constant 1 : index
    %c1_79 = arith.constant 1 : index
    %c0_80 = arith.constant 0 : index
    %72 = vector.load %arg15[%c1_78, %c1_79, %c0_80] : memref<10x10x4xf32, #tpu.memory_space<vmem>>, vector<8x8x2xf32>
    %73 = vector.shape_cast %72 : vector<8x8x2xf32> to vector<64x2xf32>
    %c1_81 = arith.constant 1 : index
    %c2_82 = arith.constant 2 : index
    %c0_83 = arith.constant 0 : index
    %74 = vector.load %arg15[%c1_81, %c2_82, %c0_83] : memref<10x10x4xf32, #tpu.memory_space<vmem>>, vector<8x8x2xf32>
    %75 = vector.shape_cast %74 : vector<8x8x2xf32> to vector<64x2xf32>
    %c2_84 = arith.constant 2 : index
    %c0_85 = arith.constant 0 : index
    %c0_86 = arith.constant 0 : index
    %76 = vector.load %arg15[%c2_84, %c0_85, %c0_86] : memref<10x10x4xf32, #tpu.memory_space<vmem>>, vector<8x8x2xf32>
    %77 = vector.shape_cast %76 : vector<8x8x2xf32> to vector<64x2xf32>
    %c2_87 = arith.constant 2 : index
    %c1_88 = arith.constant 1 : index
    %c0_89 = arith.constant 0 : index
    %78 = vector.load %arg15[%c2_87, %c1_88, %c0_89] : memref<10x10x4xf32, #tpu.memory_space<vmem>>, vector<8x8x2xf32>
    %79 = vector.shape_cast %78 : vector<8x8x2xf32> to vector<64x2xf32>
    %c2_90 = arith.constant 2 : index
    %c2_91 = arith.constant 2 : index
    %c0_92 = arith.constant 0 : index
    %80 = vector.load %arg15[%c2_90, %c2_91, %c0_92] : memref<10x10x4xf32, #tpu.memory_space<vmem>>, vector<8x8x2xf32>
    %81 = vector.shape_cast %80 : vector<8x8x2xf32> to vector<64x2xf32>
    %82 = tpu.concatenate %65, %67, %69, %71, %73, %75, %77, %79, %81 in 1 : vector<64x2xf32>, vector<64x2xf32>, vector<64x2xf32>, vector<64x2xf32>, vector<64x2xf32>, vector<64x2xf32>, vector<64x2xf32>, vector<64x2xf32>, vector<64x2xf32> -> vector<64x18xf32>
    %83 = arith.truncf %82 : vector<64x18xf32> to vector<64x18xbf16>
    %c0_93 = arith.constant 0 : index
    %c0_94 = arith.constant 0 : index
    %84 = vector.load %arg3[%c0_93, %c0_94] : memref<18x4xbf16, #tpu.memory_space<vmem>>, vector<18x4xbf16>
    %cst_95 = arith.constant dense<0.000000e+00> : vector<64x4xf32>
    %85 = tpu.matmul %83, %84, %cst_95 {dimension_numbers = #tpu.dot_dimension_numbers<[1], [0], [0], [1], [0, 0, 1, 1], [], []>} : vector<64x18xbf16>, vector<18x4xbf16>, vector<64x4xf32> -> vector<64x4xf32>
    %86 = vector.shape_cast %60 : vector<16x4xf32> to vector<16x1x4xf32>
    %87 = vector.shape_cast %86 : vector<16x1x4xf32> to vector<16x1x4xf32>
    %88 = vector.broadcast %87 : vector<16x1x4xf32> to vector<16x2x4xf32>
    %89 = vector.shape_cast %88 : vector<16x2x4xf32> to vector<32x4xf32>
    %90 = vector.shape_cast %89 : vector<32x4xf32> to vector<4x8x4xf32>
    %91 = vector.shape_cast %90 : vector<4x8x4xf32> to vector<4x1x8x4xf32>
    %92 = vector.shape_cast %91 : vector<4x1x8x4xf32> to vector<4x1x8x4xf32>
    %93 = vector.broadcast %92 : vector<4x1x8x4xf32> to vector<4x2x8x4xf32>
    %94 = vector.shape_cast %93 : vector<4x2x8x4xf32> to vector<64x4xf32>
    %95 = arith.addf %85, %94 : vector<64x4xf32>
    %c0_96 = arith.constant 0 : index
    %c0_97 = arith.constant 0 : index
    %96 = vector.load %arg6[%c0_96, %c0_97] : memref<2x4xf32, #tpu.memory_space<vmem>>, vector<1x4xf32>
    %97 = vector.broadcast %96 : vector<1x4xf32> to vector<64x4xf32>
    %98 = arith.mulf %95, %97 : vector<64x4xf32>
    %c1_98 = arith.constant 1 : index
    %c0_99 = arith.constant 0 : index
    %99 = vector.load %arg6[%c1_98, %c0_99] : memref<2x4xf32, #tpu.memory_space<vmem>>, vector<1x4xf32>
    %100 = vector.broadcast %99 : vector<1x4xf32> to vector<64x4xf32>
    %101 = arith.addf %98, %100 : vector<64x4xf32>
    %cst_100 = arith.constant 0.000000e+00 : f32
    %102 = vector.broadcast %cst_100 : f32 to vector<64x4xf32>
    %103 = arith.maximumf %101, %102 : vector<64x4xf32>
    %104 = vector.shape_cast %23 : vector<64x2xf32> to vector<32x2x2xf32>
    %105 = vector.extract_strided_slice %104 {offsets = [0, 0, 0], sizes = [32, 1, 2], strides = [1, 1, 1]} : vector<32x2x2xf32> to vector<32x1x2xf32>
    %106 = vector.shape_cast %105 : vector<32x1x2xf32> to vector<32x2xf32>
    %107 = vector.extract_strided_slice %104 {offsets = [0, 1, 0], sizes = [32, 1, 2], strides = [1, 1, 1]} : vector<32x2x2xf32> to vector<32x1x2xf32>
    %108 = vector.shape_cast %107 : vector<32x1x2xf32> to vector<32x2xf32>
    %109 = arith.addf %106, %108 : vector<32x2xf32>
    %cst_101 = arith.constant 5.000000e-01 : f32
    %110 = vector.broadcast %cst_101 : f32 to vector<32x2xf32>
    %111 = arith.mulf %109, %110 : vector<32x2xf32>
    %112 = vector.shape_cast %111 : vector<32x2xf32> to vector<4x2x4x2xf32>
    %113 = vector.extract_strided_slice %112 {offsets = [0, 0, 0, 0], sizes = [4, 1, 4, 2], strides = [1, 1, 1, 1]} : vector<4x2x4x2xf32> to vector<4x1x4x2xf32>
    %114 = vector.shape_cast %113 : vector<4x1x4x2xf32> to vector<4x4x2xf32>
    %115 = vector.extract_strided_slice %112 {offsets = [0, 1, 0, 0], sizes = [4, 1, 4, 2], strides = [1, 1, 1, 1]} : vector<4x2x4x2xf32> to vector<4x1x4x2xf32>
    %116 = vector.shape_cast %115 : vector<4x1x4x2xf32> to vector<4x4x2xf32>
    %117 = arith.addf %114, %116 : vector<4x4x2xf32>
    %cst_102 = arith.constant 5.000000e-01 : f32
    %118 = vector.broadcast %cst_102 : f32 to vector<4x4x2xf32>
    %119 = arith.mulf %117, %118 : vector<4x4x2xf32>
    %120 = vector.shape_cast %119 : vector<4x4x2xf32> to vector<16x2xf32>
    %121 = vector.shape_cast %120 : vector<16x2xf32> to vector<4x4x2xf32>
    %c1_103 = arith.constant 1 : index
    %c1_104 = arith.constant 1 : index
    %c0_105 = arith.constant 0 : index
    %122 = vector.load %arg16[%c1_103, %c1_104, %c0_105] : memref<6x6x4xf32, #tpu.memory_space<vmem>>, vector<4x4x2xf32>
    tpu.vector_store %arg16[%c1_103, %c1_104, %c0_105], %121 {strides = array<i32>} : memref<6x6x4xf32, #tpu.memory_space<vmem>>, vector<4x4x2xf32>,
    %c0_106 = arith.constant 0 : index
    %c0_107 = arith.constant 0 : index
    %c0_108 = arith.constant 0 : index
    %123 = vector.load %arg16[%c0_106, %c0_107, %c0_108] : memref<6x6x4xf32, #tpu.memory_space<vmem>>, vector<4x4x2xf32>
    %124 = vector.shape_cast %123 : vector<4x4x2xf32> to vector<16x2xf32>
    %c0_109 = arith.constant 0 : index
    %c1_110 = arith.constant 1 : index
    %c0_111 = arith.constant 0 : index
    %125 = vector.load %arg16[%c0_109, %c1_110, %c0_111] : memref<6x6x4xf32, #tpu.memory_space<vmem>>, vector<4x4x2xf32>
    %126 = vector.shape_cast %125 : vector<4x4x2xf32> to vector<16x2xf32>
    %c0_112 = arith.constant 0 : index
    %c2_113 = arith.constant 2 : index
    %c0_114 = arith.constant 0 : index
    %127 = vector.load %arg16[%c0_112, %c2_113, %c0_114] : memref<6x6x4xf32, #tpu.memory_space<vmem>>, vector<4x4x2xf32>
    %128 = vector.shape_cast %127 : vector<4x4x2xf32> to vector<16x2xf32>
    %c1_115 = arith.constant 1 : index
    %c0_116 = arith.constant 0 : index
    %c0_117 = arith.constant 0 : index
    %129 = vector.load %arg16[%c1_115, %c0_116, %c0_117] : memref<6x6x4xf32, #tpu.memory_space<vmem>>, vector<4x4x2xf32>
    %130 = vector.shape_cast %129 : vector<4x4x2xf32> to vector<16x2xf32>
    %c1_118 = arith.constant 1 : index
    %c1_119 = arith.constant 1 : index
    %c0_120 = arith.constant 0 : index
    %131 = vector.load %arg16[%c1_118, %c1_119, %c0_120] : memref<6x6x4xf32, #tpu.memory_space<vmem>>, vector<4x4x2xf32>
    %132 = vector.shape_cast %131 : vector<4x4x2xf32> to vector<16x2xf32>
    %c1_121 = arith.constant 1 : index
    %c2_122 = arith.constant 2 : index
    %c0_123 = arith.constant 0 : index
    %133 = vector.load %arg16[%c1_121, %c2_122, %c0_123] : memref<6x6x4xf32, #tpu.memory_space<vmem>>, vector<4x4x2xf32>
    %134 = vector.shape_cast %133 : vector<4x4x2xf32> to vector<16x2xf32>
    %c2_124 = arith.constant 2 : index
    %c0_125 = arith.constant 0 : index
    %c0_126 = arith.constant 0 : index
    %135 = vector.load %arg16[%c2_124, %c0_125, %c0_126] : memref<6x6x4xf32, #tpu.memory_space<vmem>>, vector<4x4x2xf32>
    %136 = vector.shape_cast %135 : vector<4x4x2xf32> to vector<16x2xf32>
    %c2_127 = arith.constant 2 : index
    %c1_128 = arith.constant 1 : index
    %c0_129 = arith.constant 0 : index
    %137 = vector.load %arg16[%c2_127, %c1_128, %c0_129] : memref<6x6x4xf32, #tpu.memory_space<vmem>>, vector<4x4x2xf32>
    %138 = vector.shape_cast %137 : vector<4x4x2xf32> to vector<16x2xf32>
    %c2_130 = arith.constant 2 : index
    %c2_131 = arith.constant 2 : index
    %c0_132 = arith.constant 0 : index
    %139 = vector.load %arg16[%c2_130, %c2_131, %c0_132] : memref<6x6x4xf32, #tpu.memory_space<vmem>>, vector<4x4x2xf32>
    %140 = vector.shape_cast %139 : vector<4x4x2xf32> to vector<16x2xf32>
    %141 = tpu.concatenate %124, %126, %128, %130, %132, %134, %136, %138, %140 in 1 : vector<16x2xf32>, vector<16x2xf32>, vector<16x2xf32>, vector<16x2xf32>, vector<16x2xf32>, vector<16x2xf32>, vector<16x2xf32>, vector<16x2xf32>, vector<16x2xf32> -> vector<16x18xf32>
    %142 = arith.truncf %141 : vector<16x18xf32> to vector<16x18xbf16>
    %c0_133 = arith.constant 0 : index
    %c0_134 = arith.constant 0 : index
    %143 = vector.load %arg4[%c0_133, %c0_134] : memref<18x4xbf16, #tpu.memory_space<vmem>>, vector<18x4xbf16>
    %cst_135 = arith.constant dense<0.000000e+00> : vector<16x4xf32>
    %144 = tpu.matmul %142, %143, %cst_135 {dimension_numbers = #tpu.dot_dimension_numbers<[1], [0], [0], [1], [0, 0, 1, 1], [], []>} : vector<16x18xbf16>, vector<18x4xbf16>, vector<16x4xf32> -> vector<16x4xf32>
    %145 = arith.addf %144, %61 : vector<16x4xf32>
    %c0_136 = arith.constant 0 : index
    %c0_137 = arith.constant 0 : index
    %146 = vector.load %arg7[%c0_136, %c0_137] : memref<2x4xf32, #tpu.memory_space<vmem>>, vector<1x4xf32>
    %147 = vector.broadcast %146 : vector<1x4xf32> to vector<16x4xf32>
    %148 = arith.mulf %145, %147 : vector<16x4xf32>
    %c1_138 = arith.constant 1 : index
    %c0_139 = arith.constant 0 : index
    %149 = vector.load %arg7[%c1_138, %c0_139] : memref<2x4xf32, #tpu.memory_space<vmem>>, vector<1x4xf32>
    %150 = vector.broadcast %149 : vector<1x4xf32> to vector<16x4xf32>
    %151 = arith.addf %148, %150 : vector<16x4xf32>
    %cst_140 = arith.constant 0.000000e+00 : f32
    %152 = vector.broadcast %cst_140 : f32 to vector<16x4xf32>
    %153 = arith.maximumf %151, %152 : vector<16x4xf32>
    %154 = vector.shape_cast %153 : vector<16x4xf32> to vector<4x4x4xf32>
    %c1_141 = arith.constant 1 : index
    %c1_142 = arith.constant 1 : index
    %c0_143 = arith.constant 0 : index
    %155 = vector.load %arg16[%c1_141, %c1_142, %c0_143] : memref<6x6x4xf32, #tpu.memory_space<vmem>>, vector<4x4x4xf32>
    tpu.vector_store %arg16[%c1_141, %c1_142, %c0_143], %154 {strides = array<i32>} : memref<6x6x4xf32, #tpu.memory_space<vmem>>, vector<4x4x4xf32>,
    %c0_144 = arith.constant 0 : index
    %c0_145 = arith.constant 0 : index
    %c0_146 = arith.constant 0 : index
    %156 = vector.load %arg16[%c0_144, %c0_145, %c0_146] : memref<6x6x4xf32, #tpu.memory_space<vmem>>, vector<4x4x4xf32>
    %157 = vector.shape_cast %156 : vector<4x4x4xf32> to vector<16x4xf32>
    %c0_147 = arith.constant 0 : index
    %c1_148 = arith.constant 1 : index
    %c0_149 = arith.constant 0 : index
    %158 = vector.load %arg16[%c0_147, %c1_148, %c0_149] : memref<6x6x4xf32, #tpu.memory_space<vmem>>, vector<4x4x4xf32>
    %159 = vector.shape_cast %158 : vector<4x4x4xf32> to vector<16x4xf32>
    %c0_150 = arith.constant 0 : index
    %c2_151 = arith.constant 2 : index
    %c0_152 = arith.constant 0 : index
    %160 = vector.load %arg16[%c0_150, %c2_151, %c0_152] : memref<6x6x4xf32, #tpu.memory_space<vmem>>, vector<4x4x4xf32>
    %161 = vector.shape_cast %160 : vector<4x4x4xf32> to vector<16x4xf32>
    %c1_153 = arith.constant 1 : index
    %c0_154 = arith.constant 0 : index
    %c0_155 = arith.constant 0 : index
    %162 = vector.load %arg16[%c1_153, %c0_154, %c0_155] : memref<6x6x4xf32, #tpu.memory_space<vmem>>, vector<4x4x4xf32>
    %163 = vector.shape_cast %162 : vector<4x4x4xf32> to vector<16x4xf32>
    %c1_156 = arith.constant 1 : index
    %c1_157 = arith.constant 1 : index
    %c0_158 = arith.constant 0 : index
    %164 = vector.load %arg16[%c1_156, %c1_157, %c0_158] : memref<6x6x4xf32, #tpu.memory_space<vmem>>, vector<4x4x4xf32>
    %165 = vector.shape_cast %164 : vector<4x4x4xf32> to vector<16x4xf32>
    %c1_159 = arith.constant 1 : index
    %c2_160 = arith.constant 2 : index
    %c0_161 = arith.constant 0 : index
    %166 = vector.load %arg16[%c1_159, %c2_160, %c0_161] : memref<6x6x4xf32, #tpu.memory_space<vmem>>, vector<4x4x4xf32>
    %167 = vector.shape_cast %166 : vector<4x4x4xf32> to vector<16x4xf32>
    %c2_162 = arith.constant 2 : index
    %c0_163 = arith.constant 0 : index
    %c0_164 = arith.constant 0 : index
    %168 = vector.load %arg16[%c2_162, %c0_163, %c0_164] : memref<6x6x4xf32, #tpu.memory_space<vmem>>, vector<4x4x4xf32>
    %169 = vector.shape_cast %168 : vector<4x4x4xf32> to vector<16x4xf32>
    %c2_165 = arith.constant 2 : index
    %c1_166 = arith.constant 1 : index
    %c0_167 = arith.constant 0 : index
    %170 = vector.load %arg16[%c2_165, %c1_166, %c0_167] : memref<6x6x4xf32, #tpu.memory_space<vmem>>, vector<4x4x4xf32>
    %171 = vector.shape_cast %170 : vector<4x4x4xf32> to vector<16x4xf32>
    %c2_168 = arith.constant 2 : index
    %c2_169 = arith.constant 2 : index
    %c0_170 = arith.constant 0 : index
    %172 = vector.load %arg16[%c2_168, %c2_169, %c0_170] : memref<6x6x4xf32, #tpu.memory_space<vmem>>, vector<4x4x4xf32>
    %173 = vector.shape_cast %172 : vector<4x4x4xf32> to vector<16x4xf32>
    %174 = tpu.concatenate %157, %159, %161, %163, %165, %167, %169, %171, %173 in 1 : vector<16x4xf32>, vector<16x4xf32>, vector<16x4xf32>, vector<16x4xf32>, vector<16x4xf32>, vector<16x4xf32>, vector<16x4xf32>, vector<16x4xf32>, vector<16x4xf32> -> vector<16x36xf32>
    %175 = arith.truncf %174 : vector<16x36xf32> to vector<16x36xbf16>
    %c0_171 = arith.constant 0 : index
    %c0_172 = arith.constant 0 : index
    %176 = vector.load %arg10[%c0_171, %c0_172] : memref<36x8xbf16, #tpu.memory_space<vmem>>, vector<36x8xbf16>
    %cst_173 = arith.constant dense<0.000000e+00> : vector<16x8xf32>
    %177 = tpu.matmul %175, %176, %cst_173 {dimension_numbers = #tpu.dot_dimension_numbers<[1], [0], [0], [1], [0, 0, 1, 1], [], []>} : vector<16x36xbf16>, vector<36x8xbf16>, vector<16x8xf32> -> vector<16x8xf32>
    %178 = vector.extract_strided_slice %177 {offsets = [0, 0], sizes = [16, 4], strides = [1, 1]} : vector<16x8xf32> to vector<16x4xf32>
    %179 = vector.extract_strided_slice %177 {offsets = [0, 4], sizes = [16, 4], strides = [1, 1]} : vector<16x8xf32> to vector<16x4xf32>
    %180 = vector.shape_cast %103 : vector<64x4xf32> to vector<8x8x4xf32>
    %c1_174 = arith.constant 1 : index
    %c1_175 = arith.constant 1 : index
    %c0_176 = arith.constant 0 : index
    %181 = vector.load %arg15[%c1_174, %c1_175, %c0_176] : memref<10x10x4xf32, #tpu.memory_space<vmem>>, vector<8x8x4xf32>
    tpu.vector_store %arg15[%c1_174, %c1_175, %c0_176], %180 {strides = array<i32>} : memref<10x10x4xf32, #tpu.memory_space<vmem>>, vector<8x8x4xf32>,
    %c0_177 = arith.constant 0 : index
    %c0_178 = arith.constant 0 : index
    %c0_179 = arith.constant 0 : index
    %182 = vector.load %arg15[%c0_177, %c0_178, %c0_179] : memref<10x10x4xf32, #tpu.memory_space<vmem>>, vector<8x8x4xf32>
    %183 = vector.shape_cast %182 : vector<8x8x4xf32> to vector<64x4xf32>
    %c0_180 = arith.constant 0 : index
    %c1_181 = arith.constant 1 : index
    %c0_182 = arith.constant 0 : index
    %184 = vector.load %arg15[%c0_180, %c1_181, %c0_182] : memref<10x10x4xf32, #tpu.memory_space<vmem>>, vector<8x8x4xf32>
    %185 = vector.shape_cast %184 : vector<8x8x4xf32> to vector<64x4xf32>
    %c0_183 = arith.constant 0 : index
    %c2_184 = arith.constant 2 : index
    %c0_185 = arith.constant 0 : index
    %186 = vector.load %arg15[%c0_183, %c2_184, %c0_185] : memref<10x10x4xf32, #tpu.memory_space<vmem>>, vector<8x8x4xf32>
    %187 = vector.shape_cast %186 : vector<8x8x4xf32> to vector<64x4xf32>
    %c1_186 = arith.constant 1 : index
    %c0_187 = arith.constant 0 : index
    %c0_188 = arith.constant 0 : index
    %188 = vector.load %arg15[%c1_186, %c0_187, %c0_188] : memref<10x10x4xf32, #tpu.memory_space<vmem>>, vector<8x8x4xf32>
    %189 = vector.shape_cast %188 : vector<8x8x4xf32> to vector<64x4xf32>
    %c1_189 = arith.constant 1 : index
    %c1_190 = arith.constant 1 : index
    %c0_191 = arith.constant 0 : index
    %190 = vector.load %arg15[%c1_189, %c1_190, %c0_191] : memref<10x10x4xf32, #tpu.memory_space<vmem>>, vector<8x8x4xf32>
    %191 = vector.shape_cast %190 : vector<8x8x4xf32> to vector<64x4xf32>
    %c1_192 = arith.constant 1 : index
    %c2_193 = arith.constant 2 : index
    %c0_194 = arith.constant 0 : index
    %192 = vector.load %arg15[%c1_192, %c2_193, %c0_194] : memref<10x10x4xf32, #tpu.memory_space<vmem>>, vector<8x8x4xf32>
    %193 = vector.shape_cast %192 : vector<8x8x4xf32> to vector<64x4xf32>
    %c2_195 = arith.constant 2 : index
    %c0_196 = arith.constant 0 : index
    %c0_197 = arith.constant 0 : index
    %194 = vector.load %arg15[%c2_195, %c0_196, %c0_197] : memref<10x10x4xf32, #tpu.memory_space<vmem>>, vector<8x8x4xf32>
    %195 = vector.shape_cast %194 : vector<8x8x4xf32> to vector<64x4xf32>
    %c2_198 = arith.constant 2 : index
    %c1_199 = arith.constant 1 : index
    %c0_200 = arith.constant 0 : index
    %196 = vector.load %arg15[%c2_198, %c1_199, %c0_200] : memref<10x10x4xf32, #tpu.memory_space<vmem>>, vector<8x8x4xf32>
    %197 = vector.shape_cast %196 : vector<8x8x4xf32> to vector<64x4xf32>
    %c2_201 = arith.constant 2 : index
    %c2_202 = arith.constant 2 : index
    %c0_203 = arith.constant 0 : index
    %198 = vector.load %arg15[%c2_201, %c2_202, %c0_203] : memref<10x10x4xf32, #tpu.memory_space<vmem>>, vector<8x8x4xf32>
    %199 = vector.shape_cast %198 : vector<8x8x4xf32> to vector<64x4xf32>
    %200 = tpu.concatenate %183, %185, %187, %189, %191, %193, %195, %197, %199 in 1 : vector<64x4xf32>, vector<64x4xf32>, vector<64x4xf32>, vector<64x4xf32>, vector<64x4xf32>, vector<64x4xf32>, vector<64x4xf32>, vector<64x4xf32>, vector<64x4xf32> -> vector<64x36xf32>
    %201 = arith.truncf %200 : vector<64x36xf32> to vector<64x36xbf16>
    %c0_204 = arith.constant 0 : index
    %c0_205 = arith.constant 0 : index
    %202 = vector.load %arg8[%c0_204, %c0_205] : memref<36x4xbf16, #tpu.memory_space<vmem>>, vector<36x4xbf16>
    %cst_206 = arith.constant dense<0.000000e+00> : vector<64x4xf32>
    %203 = tpu.matmul %201, %202, %cst_206 {dimension_numbers = #tpu.dot_dimension_numbers<[1], [0], [0], [1], [0, 0, 1, 1], [], []>} : vector<64x36xbf16>, vector<36x4xbf16>, vector<64x4xf32> -> vector<64x4xf32>
    %204 = vector.shape_cast %178 : vector<16x4xf32> to vector<16x1x4xf32>
    %205 = vector.shape_cast %204 : vector<16x1x4xf32> to vector<16x1x4xf32>
    %206 = vector.broadcast %205 : vector<16x1x4xf32> to vector<16x2x4xf32>
    %207 = vector.shape_cast %206 : vector<16x2x4xf32> to vector<32x4xf32>
    %208 = vector.shape_cast %207 : vector<32x4xf32> to vector<4x8x4xf32>
    %209 = vector.shape_cast %208 : vector<4x8x4xf32> to vector<4x1x8x4xf32>
    %210 = vector.shape_cast %209 : vector<4x1x8x4xf32> to vector<4x1x8x4xf32>
    %211 = vector.broadcast %210 : vector<4x1x8x4xf32> to vector<4x2x8x4xf32>
    %212 = vector.shape_cast %211 : vector<4x2x8x4xf32> to vector<64x4xf32>
    %213 = arith.addf %203, %212 : vector<64x4xf32>
    %c0_207 = arith.constant 0 : index
    %c0_208 = arith.constant 0 : index
    %214 = vector.load %arg11[%c0_207, %c0_208] : memref<2x4xf32, #tpu.memory_space<vmem>>, vector<1x4xf32>
    %215 = vector.broadcast %214 : vector<1x4xf32> to vector<64x4xf32>
    %216 = arith.mulf %213, %215 : vector<64x4xf32>
    %c1_209 = arith.constant 1 : index
    %c0_210 = arith.constant 0 : index
    %217 = vector.load %arg11[%c1_209, %c0_210] : memref<2x4xf32, #tpu.memory_space<vmem>>, vector<1x4xf32>
    %218 = vector.broadcast %217 : vector<1x4xf32> to vector<64x4xf32>
    %219 = arith.addf %216, %218 : vector<64x4xf32>
    %cst_211 = arith.constant 0.000000e+00 : f32
    %220 = vector.broadcast %cst_211 : f32 to vector<64x4xf32>
    %221 = arith.maximumf %219, %220 : vector<64x4xf32>
    %222 = vector.shape_cast %103 : vector<64x4xf32> to vector<32x2x4xf32>
    %223 = vector.extract_strided_slice %222 {offsets = [0, 0, 0], sizes = [32, 1, 4], strides = [1, 1, 1]} : vector<32x2x4xf32> to vector<32x1x4xf32>
    %224 = vector.shape_cast %223 : vector<32x1x4xf32> to vector<32x4xf32>
    %225 = vector.extract_strided_slice %222 {offsets = [0, 1, 0], sizes = [32, 1, 4], strides = [1, 1, 1]} : vector<32x2x4xf32> to vector<32x1x4xf32>
    %226 = vector.shape_cast %225 : vector<32x1x4xf32> to vector<32x4xf32>
    %227 = arith.addf %224, %226 : vector<32x4xf32>
    %cst_212 = arith.constant 5.000000e-01 : f32
    %228 = vector.broadcast %cst_212 : f32 to vector<32x4xf32>
    %229 = arith.mulf %227, %228 : vector<32x4xf32>
    %230 = vector.shape_cast %229 : vector<32x4xf32> to vector<4x2x4x4xf32>
    %231 = vector.extract_strided_slice %230 {offsets = [0, 0, 0, 0], sizes = [4, 1, 4, 4], strides = [1, 1, 1, 1]} : vector<4x2x4x4xf32> to vector<4x1x4x4xf32>
    %232 = vector.shape_cast %231 : vector<4x1x4x4xf32> to vector<4x4x4xf32>
    %233 = vector.extract_strided_slice %230 {offsets = [0, 1, 0, 0], sizes = [4, 1, 4, 4], strides = [1, 1, 1, 1]} : vector<4x2x4x4xf32> to vector<4x1x4x4xf32>
    %234 = vector.shape_cast %233 : vector<4x1x4x4xf32> to vector<4x4x4xf32>
    %235 = arith.addf %232, %234 : vector<4x4x4xf32>
    %cst_213 = arith.constant 5.000000e-01 : f32
    %236 = vector.broadcast %cst_213 : f32 to vector<4x4x4xf32>
    %237 = arith.mulf %235, %236 : vector<4x4x4xf32>
    %238 = vector.shape_cast %237 : vector<4x4x4xf32> to vector<16x4xf32>
    %239 = vector.shape_cast %238 : vector<16x4xf32> to vector<4x4x4xf32>
    %c1_214 = arith.constant 1 : index
    %c1_215 = arith.constant 1 : index
    %c0_216 = arith.constant 0 : index
    %240 = vector.load %arg16[%c1_214, %c1_215, %c0_216] : memref<6x6x4xf32, #tpu.memory_space<vmem>>, vector<4x4x4xf32>
    tpu.vector_store %arg16[%c1_214, %c1_215, %c0_216], %239 {strides = array<i32>} : memref<6x6x4xf32, #tpu.memory_space<vmem>>, vector<4x4x4xf32>,
    %c0_217 = arith.constant 0 : index
    %c0_218 = arith.constant 0 : index
    %c0_219 = arith.constant 0 : index
    %241 = vector.load %arg16[%c0_217, %c0_218, %c0_219] : memref<6x6x4xf32, #tpu.memory_space<vmem>>, vector<4x4x4xf32>
    %242 = vector.shape_cast %241 : vector<4x4x4xf32> to vector<16x4xf32>
    %c0_220 = arith.constant 0 : index
    %c1_221 = arith.constant 1 : index
    %c0_222 = arith.constant 0 : index
    %243 = vector.load %arg16[%c0_220, %c1_221, %c0_222] : memref<6x6x4xf32, #tpu.memory_space<vmem>>, vector<4x4x4xf32>
    %244 = vector.shape_cast %243 : vector<4x4x4xf32> to vector<16x4xf32>
    %c0_223 = arith.constant 0 : index
    %c2_224 = arith.constant 2 : index
    %c0_225 = arith.constant 0 : index
    %245 = vector.load %arg16[%c0_223, %c2_224, %c0_225] : memref<6x6x4xf32, #tpu.memory_space<vmem>>, vector<4x4x4xf32>
    %246 = vector.shape_cast %245 : vector<4x4x4xf32> to vector<16x4xf32>
    %c1_226 = arith.constant 1 : index
    %c0_227 = arith.constant 0 : index
    %c0_228 = arith.constant 0 : index
    %247 = vector.load %arg16[%c1_226, %c0_227, %c0_228] : memref<6x6x4xf32, #tpu.memory_space<vmem>>, vector<4x4x4xf32>
    %248 = vector.shape_cast %247 : vector<4x4x4xf32> to vector<16x4xf32>
    %c1_229 = arith.constant 1 : index
    %c1_230 = arith.constant 1 : index
    %c0_231 = arith.constant 0 : index
    %249 = vector.load %arg16[%c1_229, %c1_230, %c0_231] : memref<6x6x4xf32, #tpu.memory_space<vmem>>, vector<4x4x4xf32>
    %250 = vector.shape_cast %249 : vector<4x4x4xf32> to vector<16x4xf32>
    %c1_232 = arith.constant 1 : index
    %c2_233 = arith.constant 2 : index
    %c0_234 = arith.constant 0 : index
    %251 = vector.load %arg16[%c1_232, %c2_233, %c0_234] : memref<6x6x4xf32, #tpu.memory_space<vmem>>, vector<4x4x4xf32>
    %252 = vector.shape_cast %251 : vector<4x4x4xf32> to vector<16x4xf32>
    %c2_235 = arith.constant 2 : index
    %c0_236 = arith.constant 0 : index
    %c0_237 = arith.constant 0 : index
    %253 = vector.load %arg16[%c2_235, %c0_236, %c0_237] : memref<6x6x4xf32, #tpu.memory_space<vmem>>, vector<4x4x4xf32>
    %254 = vector.shape_cast %253 : vector<4x4x4xf32> to vector<16x4xf32>
    %c2_238 = arith.constant 2 : index
    %c1_239 = arith.constant 1 : index
    %c0_240 = arith.constant 0 : index
    %255 = vector.load %arg16[%c2_238, %c1_239, %c0_240] : memref<6x6x4xf32, #tpu.memory_space<vmem>>, vector<4x4x4xf32>
    %256 = vector.shape_cast %255 : vector<4x4x4xf32> to vector<16x4xf32>
    %c2_241 = arith.constant 2 : index
    %c2_242 = arith.constant 2 : index
    %c0_243 = arith.constant 0 : index
    %257 = vector.load %arg16[%c2_241, %c2_242, %c0_243] : memref<6x6x4xf32, #tpu.memory_space<vmem>>, vector<4x4x4xf32>
    %258 = vector.shape_cast %257 : vector<4x4x4xf32> to vector<16x4xf32>
    %259 = tpu.concatenate %242, %244, %246, %248, %250, %252, %254, %256, %258 in 1 : vector<16x4xf32>, vector<16x4xf32>, vector<16x4xf32>, vector<16x4xf32>, vector<16x4xf32>, vector<16x4xf32>, vector<16x4xf32>, vector<16x4xf32>, vector<16x4xf32> -> vector<16x36xf32>
    %260 = arith.truncf %259 : vector<16x36xf32> to vector<16x36xbf16>
    %c0_244 = arith.constant 0 : index
    %c0_245 = arith.constant 0 : index
    %261 = vector.load %arg9[%c0_244, %c0_245] : memref<36x4xbf16, #tpu.memory_space<vmem>>, vector<36x4xbf16>
    %cst_246 = arith.constant dense<0.000000e+00> : vector<16x4xf32>
    %262 = tpu.matmul %260, %261, %cst_246 {dimension_numbers = #tpu.dot_dimension_numbers<[1], [0], [0], [1], [0, 0, 1, 1], [], []>} : vector<16x36xbf16>, vector<36x4xbf16>, vector<16x4xf32> -> vector<16x4xf32>
    %263 = arith.addf %262, %179 : vector<16x4xf32>
    %c0_247 = arith.constant 0 : index
    %c0_248 = arith.constant 0 : index
    %264 = vector.load %arg12[%c0_247, %c0_248] : memref<2x4xf32, #tpu.memory_space<vmem>>, vector<1x4xf32>
    %265 = vector.broadcast %264 : vector<1x4xf32> to vector<16x4xf32>
    %266 = arith.mulf %263, %265 : vector<16x4xf32>
    %c1_249 = arith.constant 1 : index
    %c0_250 = arith.constant 0 : index
    %267 = vector.load %arg12[%c1_249, %c0_250] : memref<2x4xf32, #tpu.memory_space<vmem>>, vector<1x4xf32>
    %268 = vector.broadcast %267 : vector<1x4xf32> to vector<16x4xf32>
    %269 = arith.addf %266, %268 : vector<16x4xf32>
    %cst_251 = arith.constant 0.000000e+00 : f32
    %270 = vector.broadcast %cst_251 : f32 to vector<16x4xf32>
    %271 = arith.maximumf %269, %270 : vector<16x4xf32>
    %c0_252 = arith.constant 0 : index
    %c0_253 = arith.constant 0 : index
    %c0_254 = arith.constant 0 : index
    %272 = vector.load %arg13[%c0_252, %c0_253, %c0_254] : memref<1x64x4xf32, #tpu.memory_space<vmem>>, vector<1x64x4xf32>
    %273 = vector.shape_cast %272 : vector<1x64x4xf32> to vector<64x4xf32>
    %274 = vector.shape_cast %221 : vector<64x4xf32> to vector<1x64x4xf32>
    tpu.vector_store %arg13[%c0_252, %c0_253, %c0_254], %274 {strides = array<i32>} : memref<1x64x4xf32, #tpu.memory_space<vmem>>, vector<1x64x4xf32>,
    %c0_255 = arith.constant 0 : index
    %c0_256 = arith.constant 0 : index
    %c0_257 = arith.constant 0 : index
    %275 = vector.load %arg14[%c0_255, %c0_256, %c0_257] : memref<1x16x4xf32, #tpu.memory_space<vmem>>, vector<1x16x4xf32>
    %276 = vector.shape_cast %275 : vector<1x16x4xf32> to vector<16x4xf32>
    %277 = vector.shape_cast %271 : vector<16x4xf32> to vector<1x16x4xf32>
    tpu.vector_store %arg14[%c0_255, %c0_256, %c0_257], %277 {strides = array<i32>} : memref<1x16x4xf32, #tpu.memory_space<vmem>>, vector<1x16x4xf32>,
    return
  }
  func.func @transform_0(%arg0: i32) -> (i32, i32, i32, i32) {
    %c0_i32 = arith.constant 0 : i32
    %c0_i32_0 = arith.constant 0 : i32
    %c0_i32_1 = arith.constant 0 : i32
    %c0_i32_2 = arith.constant 0 : i32
    return %arg0, %c0_i32, %c0_i32_0, %c0_i32_1 : i32, i32, i32, i32
  }
  func.func @transform_1(%arg0: i32) -> (i32, i32, i32, i32) {
    %c0_i32 = arith.constant 0 : i32
    %c0_i32_0 = arith.constant 0 : i32
    %c0_i32_1 = arith.constant 0 : i32
    %c0_i32_2 = arith.constant 0 : i32
    return %arg0, %c0_i32, %c0_i32_0, %c0_i32_1 : i32, i32, i32, i32
  }
  func.func @transform_2(%arg0: i32) -> (i32, i32) {
    %c0_i32 = arith.constant 0 : i32
    %c0_i32_0 = arith.constant 0 : i32
    %c0_i32_1 = arith.constant 0 : i32
    return %c0_i32, %c0_i32_0 : i32, i32
  }
  func.func @transform_3(%arg0: i32) -> (i32, i32) {
    %c0_i32 = arith.constant 0 : i32
    %c0_i32_0 = arith.constant 0 : i32
    %c0_i32_1 = arith.constant 0 : i32
    return %c0_i32, %c0_i32_0 : i32, i32
  }
  func.func @transform_4(%arg0: i32) -> (i32, i32) {
    %c0_i32 = arith.constant 0 : i32
    %c0_i32_0 = arith.constant 0 : i32
    %c0_i32_1 = arith.constant 0 : i32
    return %c0_i32, %c0_i32_0 : i32, i32
  }
  func.func @transform_5(%arg0: i32) -> (i32, i32) {
    %c0_i32 = arith.constant 0 : i32
    %c0_i32_0 = arith.constant 0 : i32
    %c0_i32_1 = arith.constant 0 : i32
    return %c0_i32, %c0_i32_0 : i32, i32
  }
  func.func @transform_6(%arg0: i32) -> (i32, i32) {
    %c0_i32 = arith.constant 0 : i32
    %c0_i32_0 = arith.constant 0 : i32
    %c0_i32_1 = arith.constant 0 : i32
    return %c0_i32, %c0_i32_0 : i32, i32
  }
  func.func @transform_7(%arg0: i32) -> (i32, i32) {
    %c0_i32 = arith.constant 0 : i32
    %c0_i32_0 = arith.constant 0 : i32
    %c0_i32_1 = arith.constant 0 : i32
    return %c0_i32, %c0_i32_0 : i32, i32
  }
  func.func @transform_8(%arg0: i32) -> (i32, i32) {
    %c0_i32 = arith.constant 0 : i32
    %c0_i32_0 = arith.constant 0 : i32
    %c0_i32_1 = arith.constant 0 : i32
    return %c0_i32, %c0_i32_0 : i32, i32
  }
  func.func @transform_9(%arg0: i32) -> (i32, i32) {
    %c0_i32 = arith.constant 0 : i32
    %c0_i32_0 = arith.constant 0 : i32
    %c0_i32_1 = arith.constant 0 : i32
    return %c0_i32, %c0_i32_0 : i32, i32
  }
  func.func @transform_10(%arg0: i32) -> (i32, i32) {
    %c0_i32 = arith.constant 0 : i32
    %c0_i32_0 = arith.constant 0 : i32
    %c0_i32_1 = arith.constant 0 : i32
    return %c0_i32, %c0_i32_0 : i32, i32
  }
  func.func @transform_11(%arg0: i32) -> (i32, i32) {
    %c0_i32 = arith.constant 0 : i32
    %c0_i32_0 = arith.constant 0 : i32
    %c0_i32_1 = arith.constant 0 : i32
    return %c0_i32, %c0_i32_0 : i32, i32
  }
  func.func @transform_12(%arg0: i32) -> (i32, i32, i32) {
    %c0_i32 = arith.constant 0 : i32
    %c0_i32_0 = arith.constant 0 : i32
    %c0_i32_1 = arith.constant 0 : i32
    return %arg0, %c0_i32, %c0_i32_0 : i32, i32, i32
  }
  func.func @transform_13(%arg0: i32) -> (i32, i32, i32) {
    %c0_i32 = arith.constant 0 : i32
    %c0_i32_0 = arith.constant 0 : i32
    %c0_i32_1 = arith.constant 0 : i32
    return %arg0, %c0_i32, %c0_i32_0 : i32, i32, i32
  }
}

</mosaic_0001>

<bundles_post_ra>
// kernel: down_forward.1
= control target key start
LH: loop header
LB: loop body
LE: loop exit
PB: predicated region body
PF: predicated region fallthrough
CT: control target
= control target key end

     0   :  { %s4326_s25 = smov 0   ;;  %s5318_s0 = inlined_call_operand.vmem [shape: f32[2,16,8,4], index: 0, kind: input, shape index: {}]   ;;  %s5319_s1 = inlined_call_operand.vmem [shape: f32[2,8,4,4], index: 1, kind: input, shape index: {}]   ;;  %s5320_s2 = inlined_call_operand.vmem [shape: bf16[18,4], index: 2, kind: input, shape index: {}]   ;;  %s5321_s3 = inlined_call_operand.vmem [shape: bf16[18,4], index: 3, kind: input, shape index: {}]   ;;  %s5322_s4 = inlined_call_operand.vmem [shape: bf16[18,8], index: 4, kind: input, shape index: {}]   ;;  %s5323_s5 = inlined_call_operand.vmem [shape: f32[2,4], index: 5, kind: input, shape index: {}]   ;;  %s5324_s6 = inlined_call_operand.vmem [shape: f32[2,4], index: 6, kind: input, shape index: {}]   ;;  %s5325_s7 = inlined_call_operand.vmem [shape: bf16[36,4], index: 7, kind: input, shape index: {}]   ;;  %s5326_s8 = inlined_call_operand.vmem [shape: bf16[36,4], index: 8, kind: input, shape index: {}]   ;;  %s5327_s9 = inlined_call_operand.vmem [shape: bf16[36,8], index: 9, kind: input, shape index: {}]   ;;  %s5328_s10 = inlined_call_operand.vmem [shape: f32[2,4], index: 10, kind: input, shape index: {}]   ;;  %s5329_s11 = inlined_call_operand.vmem [shape: f32[2,4], index: 11, kind: input, shape index: {}]   ;;  %s5330_s12 = inlined_call_operand.vmem [shape: f32[2,64,4], index: 12, kind: output, shape index: {0}]   ;;  %s5331_s13 = inlined_call_operand.vmem [shape: f32[2,16,4], index: 13, kind: output, shape index: {1}]  }
   0x1 LB: > { %s3577_s26 = sadd.s32 4294967295, %s4239_s25   ;;  %p3581_p0 = scmp.ge.s32.totalorder %s4239_s25, 1  ;;  %s4239_s25 = sphi %s4326_s25, %s24_s25  }
   0x2   : > { %p400_p1 = scmp.lt.s32.totalorder %s4239_s25, 3 }
   0x4   : > { %p401_p2 = pnand %p3581_p0, %p400_p1 }
   0x5   : > { %p454_p3 = scmp.lt.s32.totalorder (!%p401_p2), %s3577_s26, 1  ;;  %s4242_s14 = smov (!%p401_p2), 126  }
   0x6   : > { %404 = sbr.rel (%p401_p2) target bundleno = 1628 (0x65c), region = 68  ;;  %s4243_s15 = smov (!%p401_p2), 2  }
   0x7   : > { %s4244_s16 = smov (!%p401_p2), 4   ;;  %s4245_s17 = smov (!%p401_p2), 6  }
   0x8   : > { %s4246_s18 = smov (!%p401_p2), 8   ;;  %s4247_s19 = smov (!%p401_p2), 10  }
   0x9   : > { %s4248_s20 = smov (!%p401_p2), 12   ;;  %s5334_s21 = smov (!%p401_p2), 14  }
   0xa   : > { %s5332_s22 = smov (!%p401_p2), 16   ;;  %s4252_s29 = smov (!%p401_p2), 20  }
   0xb   : > { %vm482_vm0 = vcmask 24576   ;;  %vm503_vm1 = vcmask 29696   ;;  %v4241_v0 = vmov 0.0   ;;  %s5356_s26 = smov (!%p454_p3, %s3577_s26), 1  ;;  %vm616_vm2 = vcmask 11264   ;;  %s4254_s23 = smov 28  }
   0xc   : > { %504 = vst.msk [vmem:[#allocation3] sm:$0x3f] %vm503_vm1, %v4241_v0  ;;  %s3705_s27 = sshll.u32 %s5356_s26, 5  ;;  %vm475_vm3 = vcmask 31744   ;;  %vm865_vm4 = vcmask 1040384   ;;  %vm825_vm5 = vcmask 15360  }
   0xd   : > { %506 = vst.msk [vmem:[#allocation3 + $0x28] sm:$0x3f] %vm503_vm1, %v4241_v0  ;;  %s463_s30 = scalar_lea.vmem %s5319_s1, %s3705_s27  ;;  %s3704_s27 = sshll.u32 %s5356_s26, 7  ;;  %vm830_vm6 = vcmask 48128   ;;  %vm833_vm7 = vcmask 64512   ;;  %vm836_vm8 = vcmask 80896  }
   0xe   : > { %507 = vst.msk [vmem:[#allocation3] sm:$0x1] %vm482_vm0, %v4241_v0  ;;  %v583_v1 = vld [vmem:[%s463_s30] sm:$0xf]  ;;  %v584_v2 = vld [vmem:[%s463_s30 + $0x4] sm:$0xf] }
   0xf   : > { %508 = vst.msk [vmem:[#allocation3 + $0x8] sm:$0x1] %vm482_vm0, %v4241_v0  ;;  %v587_v3 = vld [vmem:[%s463_s30 + $0x10] sm:$0xf]  ;;  %v591_v4 = vmax.f32 %v583_v1, %v584_v2  ;;  %v588_v5 = vld [vmem:[%s463_s30 + $0x14] sm:$0xf] }
  0x10   : > { %513 = vst.msk [vmem:[#allocation3 + $0x5] sm:$0x1] %vm482_vm0, %v4241_v0  ;;  %v593_v6 = vmax.f32 %v587_v3, %v588_v5  ;;  %v585_v7 = vld [vmem:[%s463_s30 + $0x8] sm:$0xf]  ;;  %v586_v8 = vld [vmem:[%s463_s30 + $0xc] sm:$0xf] }
  0x11   : > { %514 = vst.msk [vmem:[#allocation3 + $0xd] sm:$0x1] %vm482_vm0, %v4241_v0  ;;  %599 = vrot.lane.b32.xlu0 %v591_v4, %s4242_s14  ;;  %v589_v10 = vld [vmem:[%s463_s30 + $0x18] sm:$0xf]  ;;  %v590_v11 = vld [vmem:[%s463_s30 + $0x1c] sm:$0xf]  ;;  %v592_v12 = vmax.f32 %v585_v7, %v586_v8 }
  0x12   : > { %518 = vst.msk [vmem:[#allocation3 + $0x2d] sm:$0x1] %vm482_vm0, %v4241_v0  ;;  %603 = vrot.lane.b32.xlu1 %v593_v6, %s4242_s14  ;;  %v594_v13 = vmax.f32 %v589_v10, %v590_v11  ;;  %vm839_vm9 = vcmask 97280   ;;  %vm842_vm10 = vcmask 113664   ;;  %vm845_vm11 = vcmask 130048   ;;  %s4253_s30 = smov 24  }
  0x13   : > { %484 = vst.msk [vmem:[#allocation2 + $0x10] sm:$0x1] %vm482_vm0, %v4241_v0  ;;  %v625_v24 = vld [vmem:[#allocation3 + $0x1] sm:$0xf]  ;;  %vm861_vm12 = vcmask 146432   ;;  %vm1740_vm13 = vcmask 1041409  }
  0x14   : > { %485 = vst.msk [vmem:[#allocation2 + $0x20] sm:$0x1] %vm482_vm0, %v4241_v0  ;;  %vm1742_vm14 = vcmask 1042434   ;;  %vm1744_vm15 = vcmask 1043459   ;;  %vm477_vm1 = vcmask 25600   ;;  %s4255_s24 = smov 32  }
  0x15   : > { %v621_v9 = vld [vmem:[#allocation3] sm:$0xf]  ;;  %486 = vst.msk [vmem:[#allocation2 + $0x30] sm:$0x1] %vm482_vm0, %v4241_v0 }
  0x16   : > { %662 = vst [vmem:[#allocation1] ss:$2 sm:$0xff] %v621_v9  ;;  %v653_v9 = vld [vmem:[#allocation3 + $0x29] sm:$0xf] }
  0x17   : > { %487 = vst.msk [vmem:[#allocation2 + $0x40] sm:$0x1] %vm482_vm0, %v4241_v0  ;;  %v629_v28 = vld [vmem:[#allocation3 + $0x2] sm:$0xf] }
  0x18   : > { %488 = vst.msk [vmem:[#allocation2 + $0x50] sm:$0x1] %vm482_vm0, %v4241_v0 }
  0x19   : > { %601 = vrot.lane.b32.xlu0 %v592_v12, %s4242_s14  ;;  %489 = vst.msk [vmem:[#allocation2 + $0x60] sm:$0x1] %vm482_vm0, %v4241_v0 }
  0x1a   : > { %605 = vrot.lane.b32.xlu1 %v594_v13, %s4242_s14  ;;  %490 = vst.msk [vmem:[#allocation2 + $0x70] sm:$0x1] %vm482_vm0, %v4241_v0 }
  0x1b   : > { %491 = vst.msk [vmem:[#allocation2 + $0x80] sm:$0x1] %vm482_vm0, %v4241_v0 }
  0x1c   : > { %494 = vst.msk [vmem:[#allocation2 + $0x19] sm:$0x1] %vm482_vm0, %v4241_v0 }
  0x1d   : > { %495 = vst.msk [vmem:[#allocation2 + $0x29] sm:$0x1] %vm482_vm0, %v4241_v0 }
  0x1e   : > { %496 = vst.msk [vmem:[#allocation2 + $0x39] sm:$0x1] %vm482_vm0, %v4241_v0 }
  0x1f   : > { %497 = vst.msk [vmem:[#allocation2 + $0x49] sm:$0x1] %vm482_vm0, %v4241_v0 }
  0x20   : > { %498 = vst.msk [vmem:[#allocation2 + $0x59] sm:$0x1] %vm482_vm0, %v4241_v0 }
  0x21   : > { %499 = vst.msk [vmem:[#allocation2 + $0x69] sm:$0x1] %vm482_vm0, %v4241_v0 }
  0x22   : > { %500 = vst.msk [vmem:[#allocation2 + $0x79] sm:$0x1] %vm482_vm0, %v4241_v0 }
  0x23   : > { %501 = vst.msk [vmem:[#allocation2 + $0x89] sm:$0x1] %vm482_vm0, %v4241_v0 }
  0x24   : > { %509 = vst.msk [vmem:[#allocation3 + $0x10] sm:$0x1] %vm482_vm0, %v4241_v0 }
  0x25   : > { %510 = vst.msk [vmem:[#allocation3 + $0x18] sm:$0x1] %vm482_vm0, %v4241_v0 }
  0x26   : > { %511 = vst.msk [vmem:[#allocation3 + $0x20] sm:$0x1] %vm482_vm0, %v4241_v0 }
  0x27   : > { %512 = vst.msk [vmem:[#allocation3 + $0x28] sm:$0x1] %vm482_vm0, %v4241_v0 }
  0x28   : > { %515 = vst.msk [vmem:[#allocation3 + $0x15] sm:$0x1] %vm482_vm0, %v4241_v0 }
  0x29   : > { %516 = vst.msk [vmem:[#allocation3 + $0x1d] sm:$0x1] %vm482_vm0, %v4241_v0 }
  0x2a   : > { %517 = vst.msk [vmem:[#allocation3 + $0x25] sm:$0x1] %vm482_vm0, %v4241_v0 }
  0x2b   : > { %476 = vst.msk [vmem:[#allocation2] sm:$0xff] %vm475_vm3, %v4241_v0 }
  0x2c   : > { %480 = vst.msk [vmem:[#allocation2 + $0x90] sm:$0xff] %vm475_vm3, %v4241_v0 }
  0x2d   : > { %483 = vst.msk [vmem:[#allocation2] sm:$0x1] %vm482_vm0, %v4241_v0 }
  0x2e   : > { %v649_v2 = vld [vmem:[#allocation3 + $0x28] sm:$0xf]  ;;  %492 = vst.msk [vmem:[#allocation2 + $0x90] sm:$0x1] %vm482_vm0, %v4241_v0 }
  0x2f   : > { %478 = vst.msk [vmem:[#allocation2 + $0x8] sm:$0x3] %vm477_vm1, %v4241_v0 }
  0x30   : > { %493 = vst.msk [vmem:[#allocation2 + $0x9] sm:$0x1] %vm482_vm0, %v4241_v0 }
  0x31   : > { %481 = vst.msk [vmem:[#allocation2 + $0x98] sm:$0x3] %vm477_vm1, %v4241_v0  ;;  %vm2256_vm1 = vcmask 195584  }
  0x32   : > { %502 = vst.msk [vmem:[#allocation2 + $0x99] sm:$0x1] %vm482_vm0, %v4241_v0  ;;  %vm5337_vm0 = vcmask 27648  }
  0x83   : > { %v600_v14 = vpop.permute.xlu0 %599 }
  0x84   : > { %v611_v15 = vmax.f32 %v591_v4, %v600_v14  ;;  %v604_v16 = vpop.permute.xlu1 %603 }
  0x85   : > { %v613_v17 = vmax.f32 %v593_v6, %v604_v16 }
  0x86   : > { %617 = vst.msk [vmem:[#allocation3 + $0x9] sm:$0xf] %vm616_vm2, %v611_v15 }
  0x87   : > { %619 = vst.msk [vmem:[#allocation3 + $0x19] sm:$0xf] %vm616_vm2, %v613_v17 }
  0x8b   : > { %v602_v18 = vpop.permute.xlu0 %601 }
  0x8c   : > { %v606_v20 = vpop.permute.xlu1 %605  ;;  %v612_v22 = vmax.f32 %v592_v12, %v602_v18 }
  0x8d   : > { %v622_v19 = vld [vmem:[#allocation3 + $0x8] sm:$0xf]  ;;  %v614_v23 = vmax.f32 %v594_v13, %v606_v20  ;;  %v851_v20 = vld [vmem:[%s5322_s4 + $0x8] sm:$0x1] }
  0x8e   : > { %664 = vst [vmem:[#allocation1 + $0x1] ss:$2 sm:$0xff] %v622_v19  ;;  %v624_v21 = vld [vmem:[#allocation3 + $0x18] sm:$0xf]  ;;  %v626_v26 = vld [vmem:[#allocation3 + $0x9] sm:$0xf] }
  0x8f   : > { %668 = vst [vmem:[#allocation1 + $0x11] ss:$2 sm:$0xff] %v624_v21  ;;  %v630_v30 = vld [vmem:[#allocation3 + $0xa] sm:$0xf]  ;;  %v628_v33 = vld [vmem:[#allocation3 + $0x19] sm:$0xf]  ;;  %v857_v21 = vunpack.c.l.b16 %v851_v20 }
  0x90   : > { %618 = vst.msk [vmem:[#allocation3 + $0x11] sm:$0xf] %vm616_vm2, %v612_v22  ;;  %v633_v34 = vld [vmem:[#allocation3 + $0x8] sm:$0xf]  ;;  %v632_v39 = vld [vmem:[#allocation3 + $0x1a] sm:$0xf] }
  0x91   : > { %620 = vst.msk [vmem:[#allocation3 + $0x21] sm:$0xf] %vm616_vm2, %v614_v23  ;;  %v637_v41 = vld [vmem:[#allocation3 + $0x9] sm:$0xf]  ;;  %v635_v45 = vld [vmem:[#allocation3 + $0x18] sm:$0xf]  ;;  %v859_v22 = vpack.c.b16 %v857_v21, %v857_v21 }
  0x92   : > { %v641_v48 = vld [vmem:[#allocation3 + $0xa] sm:$0xf]  ;;  %v639_v51 = vld [vmem:[#allocation3 + $0x19] sm:$0xf] }
  0x93   : > { %v647_v57 = vld [vmem:[#allocation3 + $0x18] sm:$0xf]  ;;  %v657_v13 = vld [vmem:[#allocation3 + $0x2a] sm:$0xf]  ;;  %v867_v23 = vsel %vm865_vm4, %v859_v22, 0 }
  0x94   : > { %v643_v58 = vld [vmem:[#allocation3 + $0x1a] sm:$0xf]  ;;  %875 = vmatpush.bf16.msra.mxu2 %v867_v23 }
  0x95   : > { %v4406_v25 = vld.sshfl [vmem:[#allocation1] sm:$0xff pattern:$0x75316420] }
  0x96   : > { %677 = vst [vmem:[#allocation1] ss:$2 sm:$0xff] %v625_v24  ;;  %v651_v1 = vld [vmem:[#allocation3 + $0x19] sm:$0xf] }
  0x97   : > { %679 = vst [vmem:[#allocation1 + $0x1] ss:$2 sm:$0xff] %v626_v26  ;;  %v623_v27 = vld [vmem:[#allocation3 + $0x10] sm:$0xf]  ;;  %v655_v8 = vld [vmem:[#allocation3 + $0x1a] sm:$0xf] }
  0x98   : > { %666 = vst [vmem:[#allocation1 + $0x10] ss:$2 sm:$0xff] %v623_v27  ;;  %v627_v31 = vld [vmem:[#allocation3 + $0x11] sm:$0xf]  ;;  %v636_v44 = vld [vmem:[#allocation3 + $0x20] sm:$0xf] }
  0x99   : > { %v634_v36 = vld [vmem:[#allocation3 + $0x10] sm:$0xf]  ;;  %v640_v53 = vld [vmem:[#allocation3 + $0x21] sm:$0xf]  ;;  %v3708_v24 = vld [vmem:[%s5322_s4] sm:$0xff] }
  0x9a   : > { %v631_v37 = vld [vmem:[#allocation3 + $0x12] sm:$0xf]  ;;  %v644_v60 = vld [vmem:[#allocation3 + $0x22] sm:$0xf]  ;;  %876 = vmatpush.bf16.msra.mxu2 %v3708_v24 }
  0x9b   : > { %v638_v43 = vld [vmem:[#allocation3 + $0x11] sm:$0xf]  ;;  %v648_v3 = vld [vmem:[#allocation3 + $0x20] sm:$0xf] }
  0x9c   : > { %v642_v50 = vld [vmem:[#allocation3 + $0x12] sm:$0xf]  ;;  %v652_v10 = vld [vmem:[#allocation3 + $0x21] sm:$0xf] }
  0x9d   : > { %v646_v55 = vld [vmem:[#allocation3 + $0x10] sm:$0xf]  ;;  %v656_v14 = vld [vmem:[#allocation3 + $0x22] sm:$0xf] }
  0x9e   : > { %v684_v29 = vld.sshfl [vmem:[#allocation1] sm:$0xff pattern:$0x75316420]  ;;  %v650_v62 = vld [vmem:[#allocation3 + $0x11] sm:$0xf] }
  0x9f   : > { %696 = vst [vmem:[#allocation1] ss:$2 sm:$0xff] %v629_v28  ;;  %v4408_v32 = vld.sshfl [vmem:[#allocation1 + $0x10] sm:$0xff pattern:$0x75316420] }
  0xa0   : > { %698 = vst [vmem:[#allocation1 + $0x1] ss:$2 sm:$0xff] %v630_v30  ;;  %v654_v6 = vld [vmem:[#allocation3 + $0x12] sm:$0xf] }
  0xa1   : > { %681 = vst [vmem:[#allocation1 + $0x10] ss:$2 sm:$0xff] %v627_v31 }
  0xa2   : > { %683 = vst [vmem:[#allocation1 + $0x11] ss:$2 sm:$0xff] %v628_v33 }
  0xa7   : > { %v703_v35 = vld.sshfl [vmem:[#allocation1] sm:$0xff pattern:$0x75316420] }
  0xa8   : > { %715 = vst [vmem:[#allocation1] ss:$2 sm:$0xff] %v633_v34 }
  0xa9   : > { %717 = vst [vmem:[#allocation1 + $0x1] ss:$2 sm:$0xff] %v634_v36  ;;  %v685_v38 = vld.sshfl [vmem:[#allocation1 + $0x10] sm:$0xff pattern:$0x75316420] }
  0xaa   : > { %700 = vst [vmem:[#allocation1 + $0x10] ss:$2 sm:$0xff] %v631_v37  ;;  %v3743_v40 = vpack.i.bf16 %v685_v38, %v684_v29 }
  0xab   : > { %702 = vst [vmem:[#allocation1 + $0x11] ss:$2 sm:$0xff] %v632_v39 }
  0xac   : > { %3744 = vrot.lane.b32.xlu2 %v3743_v40, %s4243_s15 }
  0xb0   : > { %v722_v42 = vld.sshfl [vmem:[#allocation1] sm:$0xff pattern:$0x75316420] }
  0xb1   : > { %734 = vst [vmem:[#allocation1] ss:$2 sm:$0xff] %v637_v41 }
  0xb2   : > { %736 = vst [vmem:[#allocation1 + $0x1] ss:$2 sm:$0xff] %v638_v43  ;;  %v704_v46 = vld.sshfl [vmem:[#allocation1 + $0x10] sm:$0xff pattern:$0x75316420] }
  0xb3   : > { %719 = vst [vmem:[#allocation1 + $0x10] ss:$2 sm:$0xff] %v635_v45  ;;  %v3748_v47 = vpack.i.bf16 %v704_v46, %v703_v35 }
  0xb4   : > { %721 = vst [vmem:[#allocation1 + $0x11] ss:$2 sm:$0xff] %v636_v44 }
  0xb5   : > { %3749 = vrot.lane.b32.xlu2 %v3748_v47, %s4244_s16 }
  0xb9   : > { %v741_v49 = vld.sshfl [vmem:[#allocation1] sm:$0xff pattern:$0x75316420] }
  0xba   : > { %753 = vst [vmem:[#allocation1] ss:$2 sm:$0xff] %v641_v48 }
  0xbb   : > { %755 = vst [vmem:[#allocation1 + $0x1] ss:$2 sm:$0xff] %v642_v50  ;;  %v723_v52 = vld.sshfl [vmem:[#allocation1 + $0x10] sm:$0xff pattern:$0x75316420] }
  0xbc   : > { %738 = vst [vmem:[#allocation1 + $0x10] ss:$2 sm:$0xff] %v639_v51  ;;  %v3753_v54 = vpack.i.bf16 %v723_v52, %v722_v42 }
  0xbd   : > { %740 = vst [vmem:[#allocation1 + $0x11] ss:$2 sm:$0xff] %v640_v53 }
  0xbe   : > { %3754 = vrot.lane.b32.xlu0 %v3753_v54, %s4245_s17 }
  0xc2   : > { %v760_v56 = vld.sshfl [vmem:[#allocation1] sm:$0xff pattern:$0x75316420] }
  0xc3   : > { %772 = vst [vmem:[#allocation1] ss:$2 sm:$0xff] %v646_v55 }
  0xc4   : > { %774 = vst [vmem:[#allocation1 + $0x1] ss:$2 sm:$0xff] %v647_v57  ;;  %v742_v59 = vld.sshfl [vmem:[#allocation1 + $0x10] sm:$0xff pattern:$0x75316420] }
  0xc5   : > { %757 = vst [vmem:[#allocation1 + $0x10] ss:$2 sm:$0xff] %v643_v58  ;;  %v3758_v61 = vpack.i.bf16 %v742_v59, %v741_v49 }
  0xc6   : > { %759 = vst [vmem:[#allocation1 + $0x11] ss:$2 sm:$0xff] %v644_v60 }
  0xc7   : > { %3759 = vrot.lane.b32.xlu1 %v3758_v61, %s4246_s18 }
  0xcb   : > { %v779_v63 = vld.sshfl [vmem:[#allocation1] sm:$0xff pattern:$0x75316420] }
  0xcc   : > { %791 = vst [vmem:[#allocation1] ss:$2 sm:$0xff] %v650_v62 }
  0xcd   : > { %793 = vst [vmem:[#allocation1 + $0x1] ss:$2 sm:$0xff] %v651_v1  ;;  %v761_v4 = vld.sshfl [vmem:[#allocation1 + $0x10] sm:$0xff pattern:$0x75316420] }
  0xce   : > { %776 = vst [vmem:[#allocation1 + $0x10] ss:$2 sm:$0xff] %v648_v3  ;;  %v3763_v5 = vpack.i.bf16 %v761_v4, %v760_v56 }
  0xcf   : > { %778 = vst [vmem:[#allocation1 + $0x11] ss:$2 sm:$0xff] %v649_v2 }
  0xd0   : > { %3764 = vrot.lane.b32.xlu2 %v3763_v5, %s4247_s19 }
  0xd4   : > { %v798_v7 = vld.sshfl [vmem:[#allocation1] sm:$0xff pattern:$0x75316420] }
  0xd5   : > { %810 = vst [vmem:[#allocation1] ss:$2 sm:$0xff] %v654_v6 }
  0xd6   : > { %812 = vst [vmem:[#allocation1 + $0x1] ss:$2 sm:$0xff] %v655_v8  ;;  %v780_v11 = vld.sshfl [vmem:[#allocation1 + $0x10] sm:$0xff pattern:$0x75316420] }
  0xd7   : > { %795 = vst [vmem:[#allocation1 + $0x10] ss:$2 sm:$0xff] %v652_v10  ;;  %v3768_v12 = vpack.i.bf16 %v780_v11, %v779_v63 }
  0xd8   : > { %797 = vst [vmem:[#allocation1 + $0x11] ss:$2 sm:$0xff] %v653_v9 }
  0xd9   : > { %3769 = vrot.lane.b32.xlu0 %v3768_v12, %s4248_s20 }
  0xdd   : > { %v817_v17 = vld.sshfl [vmem:[#allocation1] sm:$0xff pattern:$0x75316420] }
  0xdf   : > { %v799_v15 = vld.sshfl [vmem:[#allocation1 + $0x10] sm:$0xff pattern:$0x75316420] }
  0xe0   : > { %814 = vst [vmem:[#allocation1 + $0x10] ss:$2 sm:$0xff] %v656_v14  ;;  %v3773_v16 = vpack.i.bf16 %v799_v15, %v798_v7 }
  0xe1   : > { %816 = vst [vmem:[#allocation1 + $0x11] ss:$2 sm:$0xff] %v657_v13 }
  0xe2   : > { %3774 = vrot.lane.b32.xlu1 %v3773_v16, %s5334_s21  ;;  %s4437_s21 = scalar_lea.vmem %s5318_s0, %s3704_s27  ;;  %s3707_s27 = sshll.u32 %s5356_s26, 4 }
  0xe3   : > { %v519_v27 = vld [vmem:[%s4437_s21] sm:$0xff]  ;;  %v520_v28 = vld [vmem:[%s4437_s21 + $0x8] sm:$0xff]  ;;  %v521_v29 = vld [vmem:[%s4437_s21 + $0x10] sm:$0xff] }
  0xe4   : > { %v4442_v30 = vmax.f32 %v519_v27, %v520_v28  ;;  %v522_v31 = vld [vmem:[%s4437_s21 + $0x18] sm:$0xff]  ;;  %v523_v34 = vld [vmem:[%s4437_s21 + $0x20] sm:$0xff]  ;;  %v524_v35 = vld [vmem:[%s4437_s21 + $0x28] sm:$0xff] }
  0xe5   : > { %v4445_v33 = vmax.f32 %v521_v29, %v522_v31  ;;  %v525_v36 = vld [vmem:[%s4437_s21 + $0x30] sm:$0xff]  ;;  %v526_v37 = vld [vmem:[%s4437_s21 + $0x38] sm:$0xff]  ;;  %v4455_v38 = vmax.f32 %v523_v34, %v524_v35  ;;  %v527_v39 = vld [vmem:[%s4437_s21 + $0x40] sm:$0xff] }
  0xe6   : > { %551 = vrot.lane.b32.xlu0 %v4442_v30, %s4242_s14  ;;  %v528_v40 = vld [vmem:[%s4437_s21 + $0x48] sm:$0xff]  ;;  %v4461_v41 = vmax.f32 %v525_v36, %v526_v37  ;;  %v529_v42 = vld [vmem:[%s4437_s21 + $0x50] sm:$0xff]  ;;  %v530_v43 = vld [vmem:[%s4437_s21 + $0x58] sm:$0xff] }
  0xe7   : > { %v4465_v45 = vmax.f32 %v527_v39, %v528_v40  ;;  %v4467_v46 = vmax.f32 %v529_v42, %v530_v43  ;;  %v531_v48 = vld [vmem:[%s4437_s21 + $0x60] sm:$0xff]  ;;  %v532_v49 = vld [vmem:[%s4437_s21 + $0x68] sm:$0xff]  ;;  %v533_v50 = vld [vmem:[%s4437_s21 + $0x70] sm:$0xff] }
  0xe8   : > { %v818_v18 = vld.sshfl [vmem:[#allocation1 + $0x10] sm:$0xff pattern:$0x75316420]  ;;  %v534_v51 = vld [vmem:[%s4437_s21 + $0x78] sm:$0xff]  ;;  %v4479_v52 = vmax.f32 %v531_v48, %v532_v49  ;;  %s5339_s21 = smov 14  }
  0xe9   : > { %v3778_v19 = vpack.i.bf16 %v818_v18, %v817_v17  ;;  %v4481_v57 = vmax.f32 %v533_v50, %v534_v51 }
  0xea   : > { %553 = vrot.lane.b32.xlu1 %v4445_v33, %s4242_s14 }
  0xeb   : > { %3779 = vrot.lane.b32.xlu2 %v3778_v19, %s5332_s22  ;;  %s5340_s22 = smov 16  }
  0xee   : > { %557 = vrot.lane.b32.xlu0 %v4461_v41, %s4242_s14 }
  0xf2   : > { %559 = vrot.lane.b32.xlu1 %v4465_v45, %s4242_s14 }
  0xf3   : > { %555 = vrot.lane.b32.xlu2 %v4455_v38, %s4242_s14 }
  0xf6   : > { %563 = vrot.lane.b32.xlu0 %v4479_v52, %s4242_s14 }
  0xfa   : > { %565 = vrot.lane.b32.xlu1 %v4481_v57, %s4242_s14 }
  0xfb   : > { %561 = vrot.lane.b32.xlu2 %v4467_v46, %s4242_s14  ;;  %s4251_s14 = smov 124  }
 0x106   : > { %v3745_v26 = vpop.permute.xlu2 %3744 }
 0x107   : > { %v3747_v53 = vunpack.i.h.bf16 %v3745_v26  ;;  %v3746_v54 = vunpack.i.l.bf16 %v3745_v26 }
 0x109   : > { %v827_v1 = vsel %vm825_vm5, %v4408_v32, %v3747_v53  ;;  %v826_v2 = vsel %vm825_vm5, %v4406_v25, %v3746_v54 }
 0x10f   : > { %v3750_v44 = vpop.permute.xlu2 %3749 }
 0x110   : > { %v3752_v58 = vunpack.i.h.bf16 %v3750_v44  ;;  %v3751_v59 = vunpack.i.l.bf16 %v3750_v44 }
 0x112   : > { %v829_v4 = vsel %vm475_vm3, %v827_v1, %v3752_v58  ;;  %v828_v5 = vsel %vm475_vm3, %v826_v2, %v3751_v59 }
 0x12a   : > { %v3765_v55 = vpop.permute.xlu2 %3764 }
 0x12b   : > { %v3767_v10 = vunpack.i.h.bf16 %v3765_v55  ;;  %v3766_v11 = vunpack.i.l.bf16 %v3765_v55 }
 0x130   : > { %v3755_v47 = vpop.permute.xlu0 %3754 }
 0x131   : > { %v3757_v60 = vunpack.i.h.bf16 %v3755_v47  ;;  %v3756_v61 = vunpack.i.l.bf16 %v3755_v47 }
 0x133   : > { %v832_v6 = vsel %vm830_vm6, %v829_v4, %v3757_v60  ;;  %v831_v7 = vsel %vm830_vm6, %v828_v5, %v3756_v61 }
 0x139   : > { %v3760_v56 = vpop.permute.xlu1 %3759 }
 0x13a   : > { %v3762_v62 = vunpack.i.h.bf16 %v3760_v56  ;;  %v3761_v63 = vunpack.i.l.bf16 %v3760_v56 }
 0x13c   : > { %v835_v8 = vsel %vm833_vm7, %v832_v6, %v3762_v62  ;;  %v834_v32 = vsel %vm833_vm7, %v831_v7, %v3761_v63 }
 0x13d   : > { %v837_v14 = vsel %vm836_vm8, %v834_v32, %v3766_v11  ;;  %v838_v15 = vsel %vm836_vm8, %v835_v8, %v3767_v10 }
 0x145   : > { %v3780_v12 = vpop.permute.xlu2 %3779 }
 0x146   : > { %v3782_v18 = vunpack.i.h.bf16 %v3780_v12  ;;  %v3781_v19 = vunpack.i.l.bf16 %v3780_v12 }
 0x14b   : > { %v3770_v3 = vpop.permute.xlu0 %3769 }
 0x14c   : > { %v3772_v9 = vunpack.i.h.bf16 %v3770_v3  ;;  %v3771_v25 = vunpack.i.l.bf16 %v3770_v3 }
 0x14d   : > { %v556_v28 = vpop.permute.xlu2 %555 }
 0x14e   : > { %v841_v20 = vsel %vm839_vm9, %v838_v15, %v3772_v9  ;;  %v840_v21 = vsel %vm839_vm9, %v837_v14, %v3771_v25  ;;  %v577_v29 = vmax.f32 %v4455_v38, %v556_v28 }
 0x150   : > { %886 = vst.msk [vmem:[#allocation2 + $0x31] sm:$0xff] %vm825_vm5, %v577_v29  ;;  %v1474_v31 = vrot.slane %v577_v29, 2  ;;  %v1475_v34 = vrot.slane %v577_v29, 4  ;;  %v1476_v35 = vrot.slane %v577_v29, 6  ;;  %v3611_v36 = vrot.slane %v577_v29, 9 }
 0x152   : > { %v3612_v37 = vrot.slane %v1474_v31, 9  ;;  %v3613_v39 = vrot.slane %v1475_v34, 9  ;;  %v3614_v40 = vrot.slane %v1476_v35, 9  ;;  %v1620_v42 = vadd.f32 %v3611_v36, %v577_v29 }
 0x154   : > { %v3775_v13 = vpop.permute.xlu1 %3774  ;;  %v1621_v43 = vadd.f32 %v3612_v37, %v1474_v31  ;;  %v1622_v44 = vadd.f32 %v3613_v39, %v1475_v34  ;;  %v1623_v47 = vadd.f32 %v3614_v40, %v1476_v35  ;;  %v4509_v50 = vmul.f32 0.5, %v1620_v42 }
 0x155   : > { %v3777_v16 = vunpack.i.h.bf16 %v3775_v13  ;;  %v3776_v17 = vunpack.i.l.bf16 %v3775_v13 }
 0x156   : > { %v4511_v38 = vmul.f32 0.5, %v1621_v43  ;;  %v4513_v53 = vmul.f32 0.5, %v1622_v44  ;;  %v4515_v54 = vmul.f32 0.5, %v1623_v47 }
 0x157   : > { %v844_v22 = vsel %vm842_vm10, %v841_v20, %v3777_v16  ;;  %v843_v23 = vsel %vm842_vm10, %v840_v21, %v3776_v17 }
 0x158   : > { %v846_v24 = vsel %vm845_vm11, %v843_v23, %v3781_v19  ;;  %v847_v26 = vsel %vm845_vm11, %v844_v22, %v3782_v18  ;;  %v552_v48 = vpop.permute.xlu0 %551 }
 0x159   : > { %v848_v27 = vpack.c.bf16 %v847_v26, %v846_v24  ;;  %v575_v49 = vmax.f32 %v4442_v30, %v552_v48 }
 0x15b   : > { %3594 = vmatmul.msk.bf16.vlgmr.msra.gmra.mxu2 %vm861_vm12, %v848_v27  ;;  %884 = vst.msk [vmem:[#allocation2 + $0x11] sm:$0xff] %vm825_vm5, %v575_v49  ;;  %v1468_v56 = vrot.slane %v575_v49, 2  ;;  %v1469_v58 = vrot.slane %v575_v49, 4  ;;  %v1470_v59 = vrot.slane %v575_v49, 6  ;;  %v3603_v60 = vrot.slane %v575_v49, 9 }
 0x15c   : > { %v554_v51 = vpop.permute.xlu1 %553 }
 0x15d   : > { %v576_v55 = vmax.f32 %v4445_v33, %v554_v51  ;;  %v3604_v1 = vrot.slane %v1468_v56, 9  ;;  %v3605_v2 = vrot.slane %v1469_v58, 9  ;;  %v3606_v3 = vrot.slane %v1470_v59, 9 }
 0x15e   : > { %v1612_v4 = vadd.f32 %v3603_v60, %v575_v49 }
 0x15f   : > { %885 = vst.msk [vmem:[#allocation2 + $0x21] sm:$0xff] %vm825_vm5, %v576_v55  ;;  %v1471_v30 = vrot.slane %v576_v55, 2  ;;  %v1472_v61 = vrot.slane %v576_v55, 4  ;;  %v1473_v62 = vrot.slane %v576_v55, 6  ;;  %v3607_v63 = vrot.slane %v576_v55, 9 }
 0x160   : > { %v1613_v8 = vadd.f32 %v3604_v1, %v1468_v56  ;;  %v1614_v32 = vadd.f32 %v3605_v2, %v1469_v58  ;;  %v1615_v9 = vadd.f32 %v3606_v3, %v1470_v59  ;;  %v1644_v25 = vmul.f32 0.5, %v1612_v4  ;;  %v558_v14 = vpop.permute.xlu0 %557 }
 0x161   : > { %v3608_v5 = vrot.slane %v1471_v30, 9  ;;  %v3609_v6 = vrot.slane %v1472_v61, 9  ;;  %v3610_v7 = vrot.slane %v1473_v62, 9  ;;  %v1616_v33 = vadd.f32 %v3607_v63, %v576_v55 }
 0x162   : > { %v1645_v15 = vmul.f32 0.5, %v1613_v8  ;;  %v1646_v16 = vmul.f32 0.5, %v1614_v32  ;;  %v1647_v17 = vmul.f32 0.5, %v1615_v9  ;;  %v578_v18 = vmax.f32 %v4461_v41, %v558_v14 }
 0x163   : > { %v1617_v10 = vadd.f32 %v3608_v5, %v1471_v30  ;;  %v1618_v11 = vadd.f32 %v3609_v6, %v1472_v61  ;;  %v1619_v12 = vadd.f32 %v3610_v7, %v1473_v62  ;;  %v1648_v13 = vmul.f32 0.5, %v1616_v33 }
 0x164   : > { %887 = vst.msk [vmem:[#allocation2 + $0x41] sm:$0xff] %vm825_vm5, %v578_v18  ;;  %v1477_v23 = vrot.slane %v578_v18, 2  ;;  %v1478_v24 = vrot.slane %v578_v18, 4  ;;  %v1479_v26 = vrot.slane %v578_v18, 6  ;;  %v3615_v27 = vrot.slane %v578_v18, 9 }
 0x165   : > { %v1649_v19 = vmul.f32 0.5, %v1617_v10  ;;  %v1650_v20 = vmul.f32 0.5, %v1618_v11  ;;  %v1651_v21 = vmul.f32 0.5, %v1619_v12  ;;  %v1676_v22 = vadd.f32 %v1648_v13, %v1644_v25  ;;  %v562_v25 = vpop.permute.xlu2 %561 }
 0x166   : > { %v3616_v35 = vrot.slane %v1477_v23, 9  ;;  %v3617_v36 = vrot.slane %v1478_v24, 9  ;;  %v3618_v37 = vrot.slane %v1479_v26, 9  ;;  %v1624_v39 = vadd.f32 %v3615_v27, %v578_v18 }
 0x167   : > { %v1677_v28 = vadd.f32 %v1649_v19, %v1645_v15  ;;  %v1678_v29 = vadd.f32 %v1650_v20, %v1646_v16  ;;  %v1679_v31 = vadd.f32 %v1651_v21, %v1647_v17  ;;  %v1692_v34 = vmul.f32 0.5, %v1676_v22 }
 0x168   : > { %v1625_v44 = vadd.f32 %v3616_v35, %v1477_v23  ;;  %v1626_v47 = vadd.f32 %v3617_v36, %v1478_v24  ;;  %v1627_v48 = vadd.f32 %v3618_v37, %v1479_v26  ;;  %v1656_v49 = vmul.f32 0.5, %v1624_v39 }
 0x169   : > { %v1693_v40 = vmul.f32 0.5, %v1677_v28  ;;  %v1694_v41 = vmul.f32 0.5, %v1678_v29  ;;  %v1695_v42 = vmul.f32 0.5, %v1679_v31  ;;  %v1724_v43 = vperm.slane %v1692_v34, 0 }
 0x16a   : > { %v1657_v58 = vmul.f32 0.5, %v1625_v44  ;;  %v1658_v59 = vmul.f32 0.5, %v1626_v47  ;;  %v1659_v60 = vmul.f32 0.5, %v1627_v48  ;;  %v1680_v30 = vadd.f32 %v1656_v49, %v4509_v50  ;;  %v564_v48 = vpop.permute.xlu0 %563 }
 0x16b   : > { %v1725_v51 = vperm.slane %v1693_v40, 0  ;;  %v1726_v55 = vperm.slane %v1694_v41, 0  ;;  %v1727_v56 = vperm.slane %v1695_v42, 0 }
 0x16c   : > { %v1681_v63 = vadd.f32 %v1657_v58, %v4511_v38  ;;  %v1682_v1 = vadd.f32 %v1658_v59, %v4513_v53  ;;  %v1683_v2 = vadd.f32 %v1659_v60, %v4515_v54  ;;  %v1696_v4 = vmul.f32 0.5, %v1680_v30  ;;  %v560_v38 = vpop.permute.xlu1 %559 }
 0x16d   : > { %v1741_v61 = vsel %vm1740_vm13, %v1725_v51, %v1724_v43  ;;  %v580_v54 = vmax.f32 %v4467_v46, %v562_v25  ;;  %v579_v11 = vmax.f32 %v4465_v45, %v560_v38  ;;  %v4540_v58 = vmax.f32 %v4479_v52, %v564_v48 }
 0x16e   : > { %v1743_v62 = vsel %vm1742_vm14, %v1726_v55, %v1741_v61  ;;  %v1697_v5 = vmul.f32 0.5, %v1681_v63  ;;  %v1698_v6 = vmul.f32 0.5, %v1682_v1  ;;  %v1699_v7 = vmul.f32 0.5, %v1683_v2 }
 0x16f   : > { %v1745_v3 = vsel %vm1744_vm15, %v1727_v56, %v1743_v62  ;;  %v1728_v33 = vperm.slane %v1696_v4, 0  ;;  %v1483_v12 = vrot.slane %v580_v54, 2  ;;  %v1484_v13 = vrot.slane %v580_v54, 4  ;;  %889 = vst.msk [vmem:[#allocation2 + $0x61] sm:$0xff] %vm825_vm5, %v580_v54 }
 0x170   : > { %1759 = vst.msk [vmem:[#allocation3 + $0x9] sm:$0xf] %vm616_vm2, %v1745_v3  ;;  %v1729_v50 = vperm.slane %v1697_v5, 0  ;;  %v1730_v8 = vperm.slane %v1698_v6, 0  ;;  %v1731_v32 = vperm.slane %v1699_v7, 0  ;;  %v1485_v14 = vrot.slane %v580_v54, 6 }
 0x171   : > { %v3623_v15 = vrot.slane %v580_v54, 9  ;;  %v1480_v16 = vrot.slane %v579_v11, 2  ;;  %v1481_v17 = vrot.slane %v579_v11, 4  ;;  %v1482_v18 = vrot.slane %v579_v11, 6  ;;  %888 = vst.msk [vmem:[#allocation2 + $0x51] sm:$0xff] %vm825_vm5, %v579_v11 }
 0x172   : > { %v1746_v9 = vsel %vm1740_vm13, %v1729_v50, %v1728_v33  ;;  %v3619_v19 = vrot.slane %v579_v11, 9  ;;  %v3624_v20 = vrot.slane %v1483_v12, 9  ;;  %v3625_v21 = vrot.slane %v1484_v13, 9  ;;  %890 = vst.msk [vmem:[#allocation2 + $0x71] sm:$0xff] %vm825_vm5, %v4540_v58 }
 0x173   : > { %v1747_v53 = vsel %vm1742_vm14, %v1730_v8, %v1746_v9  ;;  %v3626_v22 = vrot.slane %v1485_v14, 9  ;;  %v1632_v46 = vadd.f32 %v3623_v15, %v580_v54  ;;  %v3620_v23 = vrot.slane %v1480_v16, 9 }
 0x174   : > { %v1748_v10 = vsel %vm1744_vm15, %v1731_v32, %v1747_v53  ;;  %v3621_v45 = vrot.slane %v1481_v17, 9  ;;  %v3622_v24 = vrot.slane %v1482_v18, 9  ;;  %v1628_v26 = vadd.f32 %v3619_v19, %v579_v11  ;;  %v566_v54 = vpop.permute.xlu1 %565 }
 0x175   : > { %1760 = vst.msk [vmem:[#allocation3 + $0x11] sm:$0xf] %vm616_vm2, %v1748_v10  ;;  %v1633_v27 = vadd.f32 %v3624_v20, %v1483_v12  ;;  %v1634_v28 = vadd.f32 %v3625_v21, %v1484_v13  ;;  %v1664_v29 = vmul.f32 0.5, %v1632_v46  ;;  %v1635_v31 = vadd.f32 %v3626_v22, %v1485_v14 }
 0x176   : > { %v1660_v34 = vmul.f32 0.5, %v1628_v26  ;;  %v1629_v35 = vadd.f32 %v3620_v23, %v1480_v16  ;;  %v1630_v36 = vadd.f32 %v3621_v45, %v1481_v17  ;;  %v1631_v37 = vadd.f32 %v3622_v24, %v1482_v18 }
 0x177   : > { %v1665_v39 = vmul.f32 0.5, %v1633_v27  ;;  %v1666_v40 = vmul.f32 0.5, %v1634_v28  ;;  %v1667_v42 = vmul.f32 0.5, %v1635_v31  ;;  %v1486_v13 = vrot.slane %v4540_v58, 2 }
 0x178   : > { %v1684_v41 = vadd.f32 %v1664_v29, %v1660_v34  ;;  %v1661_v43 = vmul.f32 0.5, %v1629_v35  ;;  %v1662_v44 = vmul.f32 0.5, %v1630_v36  ;;  %v1663_v47 = vmul.f32 0.5, %v1631_v37 }
 0x179   : > { %v1487_v16 = vrot.slane %v4540_v58, 4  ;;  %v582_v17 = vmax.f32 %v4481_v57, %v566_v54  ;;  %v3627_v18 = vrot.slane %v4540_v58, 9  ;;  %v3628_v19 = vrot.slane %v1486_v13, 9 }
 0x17a   : > { %v1685_v49 = vadd.f32 %v1665_v39, %v1661_v43  ;;  %v1686_v51 = vadd.f32 %v1666_v40, %v1662_v44  ;;  %v1700_v55 = vmul.f32 0.5, %v1684_v41  ;;  %v1687_v56 = vadd.f32 %v1667_v42, %v1663_v47 }
 0x17b   : > { %v3629_v21 = vrot.slane %v1487_v16, 9  ;;  %v1488_v23 = vrot.slane %v4540_v58, 6  ;;  %v1489_v45 = vrot.slane %v582_v17, 2  ;;  %v1490_v24 = vrot.slane %v582_v17, 4  ;;  %891 = vst.msk [vmem:[#allocation2 + $0x81] sm:$0xff] %vm825_vm5, %v582_v17 }
 0x17c   : > { %v1701_v59 = vmul.f32 0.5, %v1685_v49  ;;  %v1702_v60 = vmul.f32 0.5, %v1686_v51  ;;  %v1732_v61 = vperm.slane %v1700_v55, 0  ;;  %v1703_v2 = vmul.f32 0.5, %v1687_v56 }
 0x17d   : > { %v1491_v26 = vrot.slane %v582_v17, 6  ;;  %v1636_v57 = vadd.f32 %v3627_v18, %v4540_v58  ;;  %v1637_v27 = vadd.f32 %v3628_v19, %v1486_v13  ;;  %v1638_v28 = vadd.f32 %v3629_v21, %v1487_v16  ;;  %v1765_v21 = vld [vmem:[#allocation3 + $0x10] sm:$0xf] }
 0x17e   : > { %v1733_v62 = vperm.slane %v1701_v59, 0  ;;  %v1734_v4 = vperm.slane %v1702_v60, 0  ;;  %v1735_v50 = vperm.slane %v1703_v2, 0  ;;  %v3630_v36 = vrot.slane %v1488_v23, 9 }
 0x17f   : > { %v3631_v37 = vrot.slane %v582_v17, 9  ;;  %v3632_v39 = vrot.slane %v1489_v45, 9  ;;  %v3633_v40 = vrot.slane %v1490_v24, 9  ;;  %v3634_v41 = vrot.slane %v1491_v26, 9 }
 0x180   : > { %v1749_v33 = vsel %vm1740_vm13, %v1733_v62, %v1732_v61  ;;  %v1639_v43 = vadd.f32 %v3630_v36, %v1488_v23  ;;  %v1668_v44 = vmul.f32 0.5, %v1636_v57  ;;  %v1669_v47 = vmul.f32 0.5, %v1637_v27  ;;  %v1767_v57 = vld [vmem:[#allocation3 + $0x1] sm:$0xf] }
 0x181   : > { %v1750_v0 = vsel %vm1742_vm14, %v1734_v4, %v1749_v33  ;;  %v1670_v48 = vmul.f32 0.5, %v1638_v28  ;;  %v1640_v49 = vadd.f32 %v3631_v37, %v582_v17  ;;  %v1641_v51 = vadd.f32 %v3632_v39, %v1489_v45  ;;  %v1764_v45 = vld [vmem:[#allocation3 + $0x8] sm:$0xf] }
 0x182   : > { %v1751_v32 = vsel %vm1744_vm15, %v1735_v50, %v1750_v0  ;;  %v1642_v55 = vadd.f32 %v3633_v40, %v1490_v24  ;;  %v1643_v56 = vadd.f32 %v3634_v41, %v1491_v26  ;;  %v1671_v59 = vmul.f32 0.5, %v1639_v43  ;;  %v1769_v24 = vld [vmem:[#allocation3 + $0x11] sm:$0xf]  ;;  %v1772_v39 = vld [vmem:[#allocation3 + $0xa] sm:$0xf] }
 0x183   : > { %1761 = vst.msk [vmem:[#allocation3 + $0x19] sm:$0xf] %vm616_vm2, %v1751_v32  ;;  %v1672_v60 = vmul.f32 0.5, %v1640_v49  ;;  %v1673_v61 = vmul.f32 0.5, %v1641_v51  ;;  %v1776_v49 = vld [vmem:[#allocation3 + $0x10] sm:$0xf] }
 0x184   : > { %v1674_v62 = vmul.f32 0.5, %v1642_v55 }
 0x185   : > { %v1689_v2 = vadd.f32 %v1673_v61, %v1669_v47  ;;  %v1775_v47 = vld [vmem:[#allocation3 + $0x8] sm:$0xf]  ;;  %v1780_v61 = vld [vmem:[#allocation3 + $0x11] sm:$0xf] }
 0x187   : > { %v1705_v33 = vmul.f32 0.5, %v1689_v2 }
 0x18a   : > { %v1766_v19 = vld [vmem:[#allocation3 + $0x18] sm:$0xf] }
 0x18b   : > { %v1770_v27 = vld [vmem:[#allocation3 + $0x19] sm:$0xf] }
 0x18c   : > { %v1774_v36 = vld [vmem:[#allocation3 + $0x1a] sm:$0xf] }
 0x18d   : > { %v1777_v43 = vld [vmem:[#allocation3 + $0x18] sm:$0xf] }
 0x18e   : > { %v1781_v55 = vld [vmem:[#allocation3 + $0x19] sm:$0xf] }
 0x1de   : > { %v4547_v30 = vpop.f32.mrf.mxu2 }
 0x1df   : > { %v1294_v52 = vrot.slane %v4547_v30, 1  ;;  %v1295_v63 = vrot.slane %v4547_v30, 2  ;;  %v1296_v1 = vrot.slane %v4547_v30, 3  ;;  %v1308_v3 = vperm.slane %v4547_v30, 0 }
 0x1e0   : > { %v1297_v8 = vrot.slane %v4547_v30, 4  ;;  %v1298_v9 = vrot.slane %v4547_v30, 5  ;;  %v1299_v25 = vrot.slane %v4547_v30, 6  ;;  %v1300_v38 = vrot.slane %v4547_v30, 7 }
 0x1e1   : > { %v1309_v5 = vperm.slane %v1294_v52, 0  ;;  %v1310_v6 = vperm.slane %v1295_v63, 0  ;;  %v1311_v7 = vperm.slane %v1296_v1, 0  ;;  %1333 = vst [vmem:[#allocation1] ss:$4 sm:$0xff] %v1308_v3  ;;  %v1675_v52 = vmul.f32 0.5, %v1643_v56 }
 0x1e2   : > { %1341 = vst [vmem:[#allocation1 + $0x20] ss:$4 sm:$0xff] %v1308_v3  ;;  %v1312_v53 = vperm.slane %v1297_v8, 0  ;;  %v1313_v10 = vperm.slane %v1298_v9, 0  ;;  %v1314_v12 = vperm.slane %v1299_v25, 0  ;;  %v1315_v14 = vperm.slane %v1300_v38, 0 }
 0x1e3   : > { %1335 = vst [vmem:[#allocation1 + $0x1] ss:$4 sm:$0xff] %v1309_v5  ;;  %v1688_v1 = vadd.f32 %v1672_v60, %v1668_v44  ;;  %v1690_v3 = vadd.f32 %v1674_v62, %v1670_v48  ;;  %v1737_v9 = vperm.slane %v1705_v33, 0 }
 0x1e4   : > { %1337 = vst [vmem:[#allocation1 + $0x2] ss:$4 sm:$0xff] %v1310_v6 }
 0x1e5   : > { %1339 = vst [vmem:[#allocation1 + $0x3] ss:$4 sm:$0xff] %v1311_v7  ;;  %v1706_v0 = vmul.f32 0.5, %v1690_v3  ;;  %v1783_v3 = vld [vmem:[#allocation3 + $0xa] sm:$0xf] }
 0x1e6   : > { %1343 = vst [vmem:[#allocation1 + $0x21] ss:$4 sm:$0xff] %v1309_v5  ;;  %v4566_v15 = vpop.f32.mrf.mxu2 }
 0x1e7   : > { %1345 = vst [vmem:[#allocation1 + $0x22] ss:$4 sm:$0xff] %v1310_v6  ;;  %v1301_v22 = vrot.slane %v4566_v15, 1  ;;  %v1302_v46 = vrot.slane %v4566_v15, 2  ;;  %v1303_v29 = vrot.slane %v4566_v15, 3  ;;  %v1316_v31 = vperm.slane %v4566_v15, 0 }
 0x1e8   : > { %1347 = vst [vmem:[#allocation1 + $0x23] ss:$4 sm:$0xff] %v1311_v7  ;;  %v1304_v4 = vrot.slane %v4566_v15, 4  ;;  %v1305_v5 = vrot.slane %v4566_v15, 5  ;;  %v1691_v6 = vadd.f32 %v1675_v52, %v1671_v59  ;;  %v1704_v7 = vmul.f32 0.5, %v1688_v1 }
 0x1e9   : > { %v1317_v34 = vperm.slane %v1301_v22, 0  ;;  %v1318_v35 = vperm.slane %v1302_v46, 0  ;;  %v1319_v58 = vperm.slane %v1303_v29, 0  ;;  %v1306_v50 = vrot.slane %v4566_v15, 6  ;;  %v1763_v46 = vld [vmem:[#allocation3] sm:$0xf] }
 0x1ea   : > { %v1307_v8 = vrot.slane %v4566_v15, 7  ;;  %v1736_v32 = vperm.slane %v1704_v7, 0  ;;  %v1320_v25 = vperm.slane %v1304_v4, 0  ;;  %v1321_v38 = vperm.slane %v1305_v5, 0  ;;  %v1768_v29 = vld [vmem:[#allocation3 + $0x9] sm:$0xf] }
 0x1eb   : > { %v1707_v54 = vmul.f32 0.5, %v1691_v6  ;;  %v1779_v59 = vld [vmem:[#allocation3 + $0x9] sm:$0xf]  ;;  %v1785_v52 = vld [vmem:[#allocation3 + $0x1a] sm:$0xf] }
 0x1ec   : > { %v4563_v11 = vld.sshfl [vmem:[#allocation1] sm:$0xff pattern:$0x73625140]  ;;  %v1323_v13 = vperm.slane %v1307_v8, 0  ;;  %v1784_v5 = vld [vmem:[#allocation3 + $0x12] sm:$0xf] }
 0x1ed   : > { %1350 = vst [vmem:[#allocation1] ss:$4 sm:$0xff] %v1312_v53  ;;  %v1739_v17 = vperm.slane %v1707_v54, 0  ;;  %v1790_v7 = vld [vmem:[#allocation3 + $0x28] sm:$0xf] }
 0x1ee   : > { %1351 = vst [vmem:[#allocation1 + $0x1] ss:$4 sm:$0xff] %v1313_v10 }
 0x1ef   : > { %1352 = vst [vmem:[#allocation1 + $0x2] ss:$4 sm:$0xff] %v1314_v12  ;;  %v4571_v20 = vld.sshfl [vmem:[#allocation1 + $0x20] sm:$0xff pattern:$0x73625140] }
 0x1f0   : > { %1353 = vst [vmem:[#allocation1 + $0x3] ss:$4 sm:$0xff] %v1315_v14 }
 0x1f1   : > { %1354 = vst [vmem:[#allocation1 + $0x20] ss:$4 sm:$0xff] %v1312_v53 }
 0x1f2   : > { %1355 = vst [vmem:[#allocation1 + $0x21] ss:$4 sm:$0xff] %v1313_v10  ;;  %v1322_v10 = vperm.slane %v1306_v50, 0 }
 0x1f3   : > { %1356 = vst [vmem:[#allocation1 + $0x22] ss:$4 sm:$0xff] %v1314_v12  ;;  %v1738_v12 = vperm.slane %v1706_v0, 0  ;;  %v1787_v0 = vld [vmem:[#allocation3 + $0x10] sm:$0xf] }
 0x1f4   : > { %1357 = vst [vmem:[#allocation1 + $0x23] ss:$4 sm:$0xff] %v1315_v14  ;;  %v1752_v14 = vsel %vm1740_vm13, %v1737_v9, %v1736_v32  ;;  %v1788_v32 = vld [vmem:[#allocation3 + $0x18] sm:$0xf] }
 0x1f5   : > { %v1753_v18 = vsel %vm1742_vm14, %v1738_v12, %v1752_v14 }
 0x1f6   : > { %v1754_v22 = vsel %vm1744_vm15, %v1739_v17, %v1753_v18  ;;  %v1798_v17 = vld [vmem:[#allocation3 + $0x2a] sm:$0xf] }
 0x1f7   : > { %v4580_v42 = vld.sshfl [vmem:[#allocation1] sm:$0xff pattern:$0x73625140]  ;;  %1762 = vst.msk [vmem:[#allocation3 + $0x21] sm:$0xf] %vm616_vm2, %v1754_v22  ;;  %vm5336_vm2 = vcmask 1041408  }
 0x1f8   : > { %1360 = vst [vmem:[#allocation1] ss:$4 sm:$0xff] %v1316_v31 }
 0x1f9   : > { %1361 = vst [vmem:[#allocation1 + $0x1] ss:$4 sm:$0xff] %v1317_v34 }
 0x1fa   : > { %1362 = vst [vmem:[#allocation1 + $0x2] ss:$4 sm:$0xff] %v1318_v35 }
 0x1fb   : > { %v4582_v63 = vld.sshfl [vmem:[#allocation1 + $0x20] sm:$0xff pattern:$0x73625140]  ;;  %1363 = vst [vmem:[#allocation1 + $0x3] ss:$4 sm:$0xff] %v1319_v58 }
 0x1fc   : > { %1364 = vst [vmem:[#allocation1 + $0x20] ss:$4 sm:$0xff] %v1316_v31  ;;  %v1773_v31 = vld [vmem:[#allocation3 + $0x12] sm:$0xf] }
 0x1fd   : > { %1365 = vst [vmem:[#allocation1 + $0x21] ss:$4 sm:$0xff] %v1317_v34 }
 0x1fe   : > { %1366 = vst [vmem:[#allocation1 + $0x22] ss:$4 sm:$0xff] %v1318_v35  ;;  %v1771_v35 = vld [vmem:[#allocation3 + $0x2] sm:$0xf] }
 0x1ff   : > { %1367 = vst [vmem:[#allocation1 + $0x23] ss:$4 sm:$0xff] %v1319_v58  ;;  %v1778_v41 = vld [vmem:[#allocation3 + $0x20] sm:$0xf] }
 0x200   : > { %v1782_v58 = vld [vmem:[#allocation3 + $0x21] sm:$0xf] }
 0x201   : > { %v1786_v2 = vld [vmem:[#allocation3 + $0x22] sm:$0xf] }
 0x202   : > { %v4588_v53 = vld.sshfl [vmem:[#allocation1] sm:$0xff pattern:$0x73625140]  ;;  %v1789_v33 = vld [vmem:[#allocation3 + $0x20] sm:$0xf] }
 0x203   : > { %1370 = vst [vmem:[#allocation1] ss:$4 sm:$0xff] %v1320_v25  ;;  %v1797_v18 = vld [vmem:[#allocation3 + $0x22] sm:$0xf] }
 0x204   : > { %1371 = vst [vmem:[#allocation1 + $0x1] ss:$4 sm:$0xff] %v1321_v38 }
 0x205   : > { %1372 = vst [vmem:[#allocation1 + $0x2] ss:$4 sm:$0xff] %v1322_v10 }
 0x206   : > { %v4591_v16 = vld.sshfl [vmem:[#allocation1 + $0x20] sm:$0xff pattern:$0x73625140]  ;;  %1373 = vst [vmem:[#allocation1 + $0x3] ss:$4 sm:$0xff] %v1323_v13 }
 0x207   : > { %1374 = vst [vmem:[#allocation1 + $0x20] ss:$4 sm:$0xff] %v1320_v25  ;;  %v1794_v25 = vld [vmem:[#allocation3 + $0x29] sm:$0xf] }
 0x208   : > { %1375 = vst [vmem:[#allocation1 + $0x21] ss:$4 sm:$0xff] %v1321_v38  ;;  %v1793_v38 = vld [vmem:[#allocation3 + $0x21] sm:$0xf] }
 0x209   : > { %1376 = vst [vmem:[#allocation1 + $0x22] ss:$4 sm:$0xff] %v1322_v10  ;;  %v1791_v10 = vld [vmem:[#allocation3 + $0x11] sm:$0xf] }
 0x20a   : > { %1377 = vst [vmem:[#allocation1 + $0x23] ss:$4 sm:$0xff] %v1323_v13  ;;  %v1792_v13 = vld [vmem:[#allocation3 + $0x19] sm:$0xf] }
 0x20b   : > { %1807 = vst [vmem:[#allocation1 + $0x10] ss:$2 sm:$0xff] %v1765_v21  ;;  %v1795_v21 = vld [vmem:[#allocation3 + $0x12] sm:$0xf] }
 0x20c   : > { %1809 = vst [vmem:[#allocation1 + $0x11] ss:$2 sm:$0xff] %v1766_v19 }
 0x20d   : > { %v4595_v23 = vld.sshfl [vmem:[#allocation1] sm:$0xff pattern:$0x73625140] }
 0x20e   : > { %1803 = vst [vmem:[#allocation1] ss:$2 sm:$0xff] %v1763_v46  ;;  %v1796_v46 = vld [vmem:[#allocation3 + $0x1a] sm:$0xf] }
 0x20f   : > { %1805 = vst [vmem:[#allocation1 + $0x1] ss:$2 sm:$0xff] %v1764_v45 }
 0x213   : > { %v4598_v26 = vld.sshfl [vmem:[#allocation1 + $0x10] sm:$0xff pattern:$0x75316420] }
 0x214   : > { %1822 = vst [vmem:[#allocation1 + $0x10] ss:$2 sm:$0xff] %v1769_v24  ;;  %v908_v24 = vld [vmem:[#allocation2 + $0x2] sm:$0xff] }
 0x215   : > { %1824 = vst [vmem:[#allocation1 + $0x11] ss:$2 sm:$0xff] %v1770_v27  ;;  %v2042_v27 = vld [vmem:[#allocation3] sm:$0xf] }
 0x216   : > { %v4600_v28 = vld.sshfl [vmem:[#allocation1] sm:$0xff pattern:$0x75316420] }
 0x217   : > { %1818 = vst [vmem:[#allocation1] ss:$2 sm:$0xff] %v1767_v57  ;;  %v909_v57 = vld [vmem:[#allocation2 + $0x12] sm:$0xff] }
 0x218   : > { %1820 = vst [vmem:[#allocation1 + $0x1] ss:$2 sm:$0xff] %v1768_v29  ;;  %v3828_v29 = vpack.i.bf16 %v909_v57, %v908_v24 }
 0x21c   : > { %v1826_v34 = vld.sshfl [vmem:[#allocation1 + $0x10] sm:$0xff pattern:$0x75316420] }
 0x21d   : > { %1841 = vst [vmem:[#allocation1 + $0x10] ss:$2 sm:$0xff] %v1773_v31 }
 0x21e   : > { %1843 = vst [vmem:[#allocation1 + $0x11] ss:$2 sm:$0xff] %v1774_v36  ;;  %v933_v36 = vld [vmem:[#allocation2 + $0x22] sm:$0xff] }
 0x21f   : > { %v1825_v37 = vld.sshfl [vmem:[#allocation1] sm:$0xff pattern:$0x75316420] }
 0x220   : > { %1837 = vst [vmem:[#allocation1] ss:$2 sm:$0xff] %v1771_v35  ;;  %v3783_v40 = vpack.i.bf16 %v1826_v34, %v1825_v37  ;;  %v4617_v37 = vld [vmem:[#allocation2 + $0x20] sm:$0xff] }
 0x221   : > { %1839 = vst [vmem:[#allocation1 + $0x1] ss:$2 sm:$0xff] %v1772_v39  ;;  %v900_v39 = vld [vmem:[#allocation2 + $0x1] sm:$0xff] }
 0x222   : > { %3784 = vrot.lane.b32.xlu2 %v3783_v40, %s4243_s15  ;;  %v901_v40 = vld [vmem:[#allocation2 + $0x11] sm:$0xff] }
 0x225   : > { %v1845_v44 = vld.sshfl [vmem:[#allocation1 + $0x10] sm:$0xff pattern:$0x75316420] }
 0x226   : > { %1860 = vst [vmem:[#allocation1 + $0x10] ss:$2 sm:$0xff] %v1777_v43 }
 0x227   : > { %1862 = vst [vmem:[#allocation1 + $0x11] ss:$2 sm:$0xff] %v1778_v41  ;;  %v3843_v41 = vpack.i.bf16 %v933_v36, %v909_v57  ;;  %v1291_v57 = vld [vmem:[%s5320_s2 + $0x8] sm:$0x1] }
 0x228   : > { %v1844_v48 = vld.sshfl [vmem:[#allocation1] sm:$0xff pattern:$0x75316420] }
 0x229   : > { %1856 = vst [vmem:[#allocation1] ss:$2 sm:$0xff] %v1775_v47  ;;  %v3788_v51 = vpack.i.bf16 %v1845_v44, %v1844_v48  ;;  %v3823_v44 = vpack.i.bf16 %v901_v40, %v900_v39  ;;  %v4624_v47 = vld [vmem:[#allocation2 + $0x30] sm:$0xff]  ;;  %v925_v48 = vld [vmem:[#allocation2 + $0x21] sm:$0xff] }
 0x22a   : > { %1858 = vst [vmem:[#allocation1 + $0x1] ss:$2 sm:$0xff] %v1776_v49 }
 0x22b   : > { %3789 = vrot.lane.b32.xlu0 %v3788_v51, %s4244_s16  ;;  %v3848_v51 = vpack.i.bf16 %v4624_v47, %v4617_v37 }
 0x22e   : > { %v1864_v56 = vld.sshfl [vmem:[#allocation1 + $0x10] sm:$0xff pattern:$0x75316420] }
 0x22f   : > { %1879 = vst [vmem:[#allocation1 + $0x10] ss:$2 sm:$0xff] %v1781_v55  ;;  %v3838_v55 = vpack.i.bf16 %v925_v48, %v901_v40 }
 0x230   : > { %1881 = vst [vmem:[#allocation1 + $0x11] ss:$2 sm:$0xff] %v1782_v58  ;;  %v903_v58 = vld [vmem:[#allocation2 + $0x31] sm:$0xff] }
 0x231   : > { %v1863_v60 = vld.sshfl [vmem:[#allocation1] sm:$0xff pattern:$0x75316420] }
 0x232   : > { %1875 = vst [vmem:[#allocation1] ss:$2 sm:$0xff] %v1779_v59  ;;  %v3793_v62 = vpack.i.bf16 %v1864_v56, %v1863_v60  ;;  %v4631_v56 = vld [vmem:[#allocation2 + $0x40] sm:$0xff]  ;;  %v3863_v60 = vpack.i.bf16 %v903_v58, %v925_v48 }
 0x233   : > { %1877 = vst [vmem:[#allocation1 + $0x1] ss:$2 sm:$0xff] %v1780_v61  ;;  %v3873_v59 = vpack.i.bf16 %v4631_v56, %v4624_v47  ;;  %v4638_v61 = vld [vmem:[#allocation2 + $0x50] sm:$0xff] }
 0x234   : > { %3794 = vrot.lane.b32.xlu1 %v3793_v62, %s4245_s17  ;;  %v927_v62 = vld [vmem:[#allocation2 + $0x41] sm:$0xff] }
 0x237   : > { %v1883_v1 = vld.sshfl [vmem:[#allocation1 + $0x10] sm:$0xff pattern:$0x75316420] }
 0x238   : > { %1898 = vst [vmem:[#allocation1 + $0x10] ss:$2 sm:$0xff] %v1785_v52  ;;  %v3888_v52 = vpack.i.bf16 %v4638_v61, %v4631_v56 }
 0x239   : > { %1900 = vst [vmem:[#allocation1 + $0x11] ss:$2 sm:$0xff] %v1786_v2  ;;  %v913_v2 = vld [vmem:[#allocation2 + $0x52] sm:$0xff] }
 0x23a   : > { %v1882_v4 = vld.sshfl [vmem:[#allocation1] sm:$0xff pattern:$0x75316420] }
 0x23b   : > { %1894 = vst [vmem:[#allocation1] ss:$2 sm:$0xff] %v1783_v3  ;;  %v3798_v6 = vpack.i.bf16 %v1883_v1, %v1882_v4  ;;  %v3878_v1 = vpack.i.bf16 %v927_v62, %v903_v58  ;;  %v952_v3 = vld [vmem:[#allocation2 + $0x51] sm:$0xff]  ;;  %v912_v4 = vld [vmem:[#allocation2 + $0x42] sm:$0xff] }
 0x23c   : > { %1896 = vst [vmem:[#allocation1 + $0x1] ss:$2 sm:$0xff] %v1784_v5  ;;  %v3908_v5 = vpack.i.bf16 %v913_v2, %v912_v4 }
 0x23d   : > { %3799 = vrot.lane.b32.xlu2 %v3798_v6, %s4246_s18  ;;  %v3893_v6 = vpack.i.bf16 %v952_v3, %v927_v62 }
 0x240   : > { %v1902_v50 = vld.sshfl [vmem:[#allocation1 + $0x10] sm:$0xff pattern:$0x75316420] }
 0x241   : > { %1917 = vst [vmem:[#allocation1 + $0x10] ss:$2 sm:$0xff] %v1789_v33  ;;  %v4648_v33 = vld [vmem:[#allocation2 + $0x62] sm:$0xff] }
 0x242   : > { %1919 = vst [vmem:[#allocation1 + $0x11] ss:$2 sm:$0xff] %v1790_v7 }
 0x243   : > { %v1901_v8 = vld.sshfl [vmem:[#allocation1] sm:$0xff pattern:$0x75316420] }
 0x244   : > { %1913 = vst [vmem:[#allocation1] ss:$2 sm:$0xff] %v1787_v0  ;;  %v3803_v9 = vpack.i.bf16 %v1902_v50, %v1901_v8  ;;  %v3923_v50 = vpack.i.bf16 %v4648_v33, %v913_v2  ;;  %v4654_v0 = vld [vmem:[#allocation2 + $0x61] sm:$0xff] }
 0x245   : > { %1915 = vst [vmem:[#allocation1 + $0x1] ss:$2 sm:$0xff] %v1788_v32  ;;  %v921_v8 = vld [vmem:[#allocation2 + $0x60] sm:$0xff]  ;;  %v3918_v32 = vpack.i.bf16 %v4654_v0, %v952_v3 }
 0x246   : > { %3804 = vrot.lane.b32.xlu0 %v3803_v9, %s4247_s19  ;;  %v3913_v9 = vpack.i.bf16 %v921_v8, %v4638_v61 }
 0x249   : > { %v1921_v54 = vld.sshfl [vmem:[#allocation1 + $0x10] sm:$0xff pattern:$0x75316420] }
 0x24a   : > { %1936 = vst [vmem:[#allocation1 + $0x10] ss:$2 sm:$0xff] %v1793_v38 }
 0x24b   : > { %1938 = vst [vmem:[#allocation1 + $0x11] ss:$2 sm:$0xff] %v1794_v25  ;;  %v4660_v25 = vld [vmem:[#allocation2 + $0x70] sm:$0xff] }
 0x24c   : > { %v1920_v12 = vld.sshfl [vmem:[#allocation1] sm:$0xff pattern:$0x75316420]  ;;  %v3928_v38 = vpack.i.bf16 %v4660_v25, %v921_v8 }
 0x24d   : > { %v3808_v14 = vpack.i.bf16 %v1921_v54, %v1920_v12  ;;  %1932 = vst [vmem:[#allocation1] ss:$2 sm:$0xff] %v1791_v10  ;;  %v1985_v54 = vld [vmem:[%s5321_s3 + $0x8] sm:$0x1] }
 0x24e   : > { %1934 = vst [vmem:[#allocation1 + $0x1] ss:$2 sm:$0xff] %v1792_v13  ;;  %v1991_v10 = vunpack.c.l.b16 %v1985_v54 }
 0x24f   : > { %3809 = vrot.lane.b32.xlu1 %v3808_v14, %s4248_s20  ;;  %v3710_v14 = vld [vmem:[%s5321_s3] sm:$0xff] }
 0x250   : > { %v1993_v12 = vpack.c.b16 %v1991_v10, %v1991_v10 }
 0x252   : > { %v1940_v19 = vld.sshfl [vmem:[#allocation1 + $0x10] sm:$0xff pattern:$0x75316420]  ;;  %v2005_v13 = vsel %vm865_vm4, %v1993_v12, 0 }
 0x253   : > { %1955 = vst [vmem:[#allocation1 + $0x10] ss:$2 sm:$0xff] %v1797_v18  ;;  %2013 = vmatpush.bf16.msrb.mxu2 %v2005_v13 }
 0x254   : > { %1957 = vst [vmem:[#allocation1 + $0x11] ss:$2 sm:$0xff] %v1798_v17 }
 0x255   : > { %v1939_v22 = vld.sshfl [vmem:[#allocation1] sm:$0xff pattern:$0x75316420] }
 0x256   : > { %v3813_v45 = vpack.i.bf16 %v1940_v19, %v1939_v22  ;;  %1951 = vst [vmem:[#allocation1] ss:$2 sm:$0xff] %v1795_v21 }
 0x257   : > { %1995 = vrot.lane.b32.xlu1 %v4547_v30, %s4251_s14  ;;  %1953 = vst [vmem:[#allocation1 + $0x1] ss:$2 sm:$0xff] %v1796_v46  ;;  %v4615_v30 = vld [vmem:[#allocation2 + $0x10] sm:$0xff]  ;;  %2014 = vmatpush.bf16.msrb.mxu2 %v3710_v14 }
 0x258   : > { %3814 = vrot.lane.b32.xlu2 %v3813_v45, %s5339_s21  ;;  %v3833_v43 = vpack.i.bf16 %v4617_v37, %v4615_v30 }
 0x25b   : > { %v1959_v31 = vld.sshfl [vmem:[#allocation1 + $0x10] sm:$0xff pattern:$0x75316420] }
 0x25e   : > { %v1958_v34 = vld.sshfl [vmem:[#allocation1] sm:$0xff pattern:$0x75316420] }
 0x25f   : > { %3829 = vrot.lane.b32.xlu1 %v3828_v29, %s4244_s16  ;;  %v3818_v35 = vpack.i.bf16 %v1959_v31, %v1958_v34  ;;  %2082 = vst [vmem:[#allocation1] ss:$2 sm:$0xff] %v2042_v27  ;;  %v1329_v31 = vunpack.c.l.b16 %v1291_v57 }
 0x260   : > { %1997 = vrot.lane.b32.xlu2 %v4566_v15, %s4251_s14  ;;  %v958_v15 = vld [vmem:[#allocation2 + $0x32] sm:$0xff] }
 0x261   : > { %3819 = vrot.lane.b32.xlu0 %v3818_v35, %s5340_s22  ;;  %v3858_v49 = vpack.i.bf16 %v958_v15, %v933_v36  ;;  %v3883_v7 = vpack.i.bf16 %v912_v4, %v958_v15  ;;  %v1331_v39 = vpack.c.b16 %v1329_v31, %v1329_v31 }
 0x263   : > { %v1401_v48 = vsel %vm865_vm4, %v1331_v39, 0  ;;  %vm5338_vm4 = vcmask 162816  }
 0x264   : > { %1409 = vmatpush.bf16.msra.mxu1 %v1401_v48 }
 0x267   : > { %3844 = vrot.lane.b32.xlu1 %v3843_v41, %s4247_s19 }
 0x268   : > { %3834 = vrot.lane.b32.xlu2 %v3833_v43, %s4245_s17 }
 0x269   : > { %3824 = vrot.lane.b32.xlu0 %v3823_v44, %s4243_s15 }
 0x26f   : > { %3859 = vrot.lane.b32.xlu1 %v3858_v49, %s5340_s22 }
 0x270   : > { %3849 = vrot.lane.b32.xlu2 %v3848_v51, %s4248_s20 }
 0x271   : > { %3839 = vrot.lane.b32.xlu0 %v3838_v55, %s4246_s18 }
 0x277   : > { %3874 = vrot.lane.b32.xlu1 %v3873_v59, %s4245_s17 }
 0x278   : > { %3864 = vrot.lane.b32.xlu2 %v3863_v60, %s4243_s15 }
 0x279   : > { %3854 = vrot.lane.b32.xlu0 %v3863_v60, %s5339_s21 }
 0x27c   : > { %v3785_v17 = vpop.permute.xlu2 %3784 }
 0x27d   : > { %v3787_v45 = vunpack.i.h.bf16 %v3785_v17  ;;  %v3786_v24 = vunpack.i.l.bf16 %v3785_v17 }
 0x27f   : > { %3889 = vrot.lane.b32.xlu1 %v3888_v52, %s4248_s20  ;;  %v1967_v40 = vsel %vm825_vm5, %v4598_v26, %v3787_v45  ;;  %v1966_v41 = vsel %vm825_vm5, %v4600_v28, %v3786_v24  ;;  %v3709_v52 = vld [vmem:[%s5320_s2] sm:$0xff] }
 0x280   : > { %3879 = vrot.lane.b32.xlu2 %v3878_v1, %s4246_s18  ;;  %1410 = vmatpush.bf16.msra.mxu1 %v3709_v52 }
 0x281   : > { %3869 = vrot.lane.b32.xlu0 %v3858_v49, %s4244_s16 }
 0x287   : > { %3909 = vrot.lane.b32.xlu1 %v3908_v5, %s4244_s16 }
 0x288   : > { %3894 = vrot.lane.b32.xlu2 %v3893_v6, %s5339_s21 }
 0x289   : > { %3884 = vrot.lane.b32.xlu0 %v3883_v7, %s4247_s19 }
 0x28f   : > { %3924 = vrot.lane.b32.xlu1 %v3923_v50, %s4247_s19 }
 0x290   : > { %3904 = vrot.lane.b32.xlu2 %v3893_v6, %s4243_s15 }
 0x291   : > { %3899 = vrot.lane.b32.xlu0 %v3908_v5, %s5340_s22 }
 0x297   : > { %v3800_v19 = vpop.permute.xlu2 %3799 }
 0x298   : > { %3919 = vrot.lane.b32.xlu2 %v3918_v32, %s4246_s18  ;;  %v3802_v59 = vunpack.i.h.bf16 %v3800_v19  ;;  %v3801_v26 = vunpack.i.l.bf16 %v3800_v19 }
 0x299   : > { %3914 = vrot.lane.b32.xlu0 %v3913_v9, %s4245_s17 }
 0x29d   : > { %v3790_v22 = vpop.permute.xlu0 %3789 }
 0x29e   : > { %v3792_v27 = vunpack.i.h.bf16 %v3790_v22  ;;  %v3791_v29 = vunpack.i.l.bf16 %v3790_v22  ;;  %v892_v22 = vld [vmem:[#allocation2] sm:$0xff] }
 0x2a0   : > { %v1969_v44 = vsel %vm475_vm3, %v1967_v40, %v3792_v27  ;;  %v1968_v15 = vsel %vm475_vm3, %v1966_v41, %v3791_v29 }
 0x2a1   : > { %3929 = vrot.lane.b32.xlu0 %v3928_v38, %s4248_s20 }
 0x2a6   : > { %v3795_v18 = vpop.permute.xlu1 %3794 }
 0x2a7   : > { %v3797_v34 = vunpack.i.h.bf16 %v3795_v18  ;;  %v3796_v35 = vunpack.i.l.bf16 %v3795_v18 }
 0x2a9   : > { %v1970_v49 = vsel %vm830_vm6, %v1968_v15, %v3796_v35  ;;  %v1971_v51 = vsel %vm830_vm6, %v1969_v44, %v3797_v34 }
 0x2aa   : > { %v1972_v1 = vsel %vm833_vm7, %v1970_v49, %v3801_v26  ;;  %v1973_v2 = vsel %vm833_vm7, %v1971_v51, %v3802_v59 }
 0x2b2   : > { %v3815_v46 = vpop.permute.xlu2 %3814 }
 0x2b3   : > { %v3817_v7 = vunpack.i.h.bf16 %v3815_v46  ;;  %v3816_v50 = vunpack.i.l.bf16 %v3815_v46 }
 0x2b8   : > { %v3805_v36 = vpop.permute.xlu0 %3804 }
 0x2b9   : > { %v3807_v55 = vunpack.i.h.bf16 %v3805_v36  ;;  %v3806_v58 = vunpack.i.l.bf16 %v3805_v36 }
 0x2ba   : > { %v4685_v60 = vpop.permute.xlu2 %1997 }
 0x2bb   : > { %v1974_v3 = vsel %vm836_vm8, %v1972_v1, %v3806_v58  ;;  %v1975_v4 = vsel %vm836_vm8, %v1973_v2, %v3807_v55 }
 0x2c1   : > { %v3810_v21 = vpop.permute.xlu1 %3809 }
 0x2c2   : > { %v3812_v28 = vunpack.i.h.bf16 %v3810_v21  ;;  %v3811_v62 = vunpack.i.l.bf16 %v3810_v21  ;;  %v3835_v17 = vpop.permute.xlu2 %3834 }
 0x2c3   : > { %v3837_v36 = vunpack.i.h.bf16 %v3835_v17  ;;  %v3836_v39 = vunpack.i.l.bf16 %v3835_v17 }
 0x2c4   : > { %v1976_v5 = vsel %vm839_vm9, %v1974_v3, %v3811_v62  ;;  %v1977_v6 = vsel %vm839_vm9, %v1975_v4, %v3812_v28 }
 0x2c5   : > { %v1978_v54 = vsel %vm842_vm10, %v1976_v5, %v3816_v50  ;;  %v1979_v10 = vsel %vm842_vm10, %v1977_v6, %v3817_v7 }
 0x2c9   : > { %v4678_v43 = vpop.permute.xlu1 %1995 }
 0x2ca   : > { %v3850_v29 = vpop.permute.xlu2 %3849 }
 0x2cb   : > { %v3852_v26 = vunpack.i.h.bf16 %v3850_v29  ;;  %v3851_v28 = vunpack.i.l.bf16 %v3850_v29 }
 0x2d1   : > { %v3830_v38 = vpop.permute.xlu1 %3829 }
 0x2d2   : > { %v3832_v57 = vunpack.i.h.bf16 %v3830_v38  ;;  %v3831_v27 = vunpack.i.l.bf16 %v3830_v38  ;;  %v3865_v52 = vpop.permute.xlu2 %3864 }
 0x2d3   : > { %v3820_v8 = vpop.permute.xlu0 %3819  ;;  %v3867_v38 = vunpack.i.h.bf16 %v3865_v52 }
 0x2d4   : > { %v3822_v32 = vunpack.i.h.bf16 %v3820_v8  ;;  %v3821_v9 = vunpack.i.l.bf16 %v3820_v8 }
 0x2d6   : > { %v1980_v12 = vsel %vm845_vm11, %v1978_v54, %v3821_v9  ;;  %v1981_v13 = vsel %vm845_vm11, %v1979_v10, %v3822_v32  ;;  %v3866_v54 = vunpack.i.l.bf16 %v3865_v52 }
 0x2d7   : > { %v1982_v14 = vpack.c.bf16 %v1981_v13, %v1980_v12 }
 0x2d9   : > { %3639 = vmatmul.msk.bf16.vlgmr.msrb.gmra.mxu2 %vm861_vm12, %v1982_v14  ;;  %v3845_v46 = vpop.permute.xlu1 %3844 }
 0x2da   : > { %v3847_v49 = vunpack.i.h.bf16 %v3845_v46  ;;  %v3846_v51 = vunpack.i.l.bf16 %v3845_v46  ;;  %v3880_v17 = vpop.permute.xlu2 %3879 }
 0x2db   : > { %v3825_v18 = vpop.permute.xlu0 %3824  ;;  %v3882_v29 = vunpack.i.h.bf16 %v3880_v17 }
 0x2dc   : > { %v3827_v19 = vunpack.i.h.bf16 %v3825_v18  ;;  %v3826_v21 = vunpack.i.l.bf16 %v3825_v18  ;;  %v1224_v18 = vsel %vm825_vm5, %v4624_v47, %v3867_v38 }
 0x2de   : > { %v1222_v45 = vsel %vm825_vm5, %v4615_v30, %v3827_v19  ;;  %v1221_v24 = vsel %vm825_vm5, %v892_v22, %v3826_v21  ;;  %v1223_v19 = vsel %vm825_vm5, %v4617_v37, %v3866_v54 }
 0x2df   : > { %v1230_v31 = vsel %vm475_vm3, %v1222_v45, %v3832_v57  ;;  %v1229_v34 = vsel %vm475_vm3, %v1221_v24, %v3831_v27 }
 0x2e0   : > { %v1237_v44 = vsel %vm830_vm6, %v1229_v34, %v3836_v39  ;;  %v1238_v15 = vsel %vm830_vm6, %v1230_v31, %v3837_v36  ;;  %v3881_v31 = vunpack.i.l.bf16 %v3880_v17 }
 0x2e1   : > { %v3860_v55 = vpop.permute.xlu1 %3859 }
 0x2e2   : > { %v3862_v3 = vunpack.i.h.bf16 %v3860_v55  ;;  %v3861_v4 = vunpack.i.l.bf16 %v3860_v55 }
 0x2e3   : > { %v3840_v35 = vpop.permute.xlu0 %3839 }
 0x2e4   : > { %v3842_v40 = vunpack.i.h.bf16 %v3840_v35  ;;  %v3841_v41 = vunpack.i.l.bf16 %v3840_v35 }
 0x2e6   : > { %v1245_v30 = vsel %vm833_vm7, %v1237_v44, %v3841_v41  ;;  %v1246_v48 = vsel %vm833_vm7, %v1238_v15, %v3842_v40  ;;  %v3895_v41 = vpop.permute.xlu2 %3894 }
 0x2e7   : > { %v1253_v58 = vsel %vm836_vm8, %v1245_v30, %v3846_v51  ;;  %v1254_v59 = vsel %vm836_vm8, %v1246_v48, %v3847_v49  ;;  %v3897_v49 = vunpack.i.h.bf16 %v3895_v41  ;;  %v3896_v51 = vunpack.i.l.bf16 %v3895_v41 }
 0x2e8   : > { %v1261_v5 = vsel %vm839_vm9, %v1253_v58, %v3851_v28  ;;  %v1262_v6 = vsel %vm839_vm9, %v1254_v59, %v3852_v26 }
 0x2e9   : > { %v3875_v10 = vpop.permute.xlu1 %3874 }
 0x2ea   : > { %v3877_v46 = vunpack.i.h.bf16 %v3875_v10  ;;  %v3876_v45 = vunpack.i.l.bf16 %v3875_v10 }
 0x2eb   : > { %v3855_v62 = vpop.permute.xlu0 %3854 }
 0x2ec   : > { %v3857_v1 = vunpack.i.h.bf16 %v3855_v62  ;;  %v3856_v2 = vunpack.i.l.bf16 %v3855_v62 }
 0x2ee   : > { %v1269_v7 = vsel %vm842_vm10, %v1261_v5, %v3856_v2  ;;  %v1270_v50 = vsel %vm842_vm10, %v1262_v6, %v3857_v1  ;;  %v4223_v2 = vld [vmem:[%s5324_s6] ss:$0 sm:$0xff]  ;;  %v4224_v5 = vld [vmem:[%s5324_s6 + $0x1] ss:$0 sm:$0xff] }
 0x2ef   : > { %v1277_v8 = vsel %vm845_vm11, %v1269_v7, %v3861_v4  ;;  %v1278_v32 = vsel %vm845_vm11, %v1270_v50, %v3862_v3 }
 0x2f0   : > { %v1285_v9 = vpack.c.bf16 %v1278_v32, %v1277_v8 }
 0x2f1   : > { %v3890_v36 = vpop.permute.xlu1 %3889 }
 0x2f2   : > { %3599 = vmatmul.msk.bf16.vlgmr.msra.gmra.mxu1 %vm861_vm12, %v1285_v9  ;;  %v3892_v44 = vunpack.i.h.bf16 %v3890_v36  ;;  %v3891_v15 = vunpack.i.l.bf16 %v3890_v36 }
 0x2f3   : > { %v3870_v12 = vpop.permute.xlu0 %3869 }
 0x2f4   : > { %v3872_v13 = vunpack.i.h.bf16 %v3870_v12  ;;  %v3871_v14 = vunpack.i.l.bf16 %v3870_v12  ;;  %v4751_v12 = vld [vmem:[%s5323_s5] ss:$0 sm:$0xff] }
 0x2f6   : > { %v1232_v21 = vsel %vm475_vm3, %v1224_v18, %v3872_v13  ;;  %v1231_v22 = vsel %vm475_vm3, %v1223_v19, %v3871_v14  ;;  %v4757_v18 = vld [vmem:[%s5323_s5 + $0x1] ss:$0 sm:$0xff] }
 0x2f7   : > { %v1240_v24 = vsel %vm830_vm6, %v1232_v21, %v3877_v46  ;;  %v1239_v57 = vsel %vm830_vm6, %v1231_v22, %v3876_v45  ;;  %v2046_v22 = vld [vmem:[#allocation3 + $0x1] sm:$0xf] }
 0x2f8   : > { %v1247_v47 = vsel %vm833_vm7, %v1239_v57, %v3881_v31  ;;  %v1248_v37 = vsel %vm833_vm7, %v1240_v24, %v3882_v29 }
 0x2fb   : > { %v3885_v27 = vpop.permute.xlu0 %3884 }
 0x2fc   : > { %v3887_v34 = vunpack.i.h.bf16 %v3885_v27  ;;  %v3886_v35 = vunpack.i.l.bf16 %v3885_v27 }
 0x2fe   : > { %v1255_v39 = vsel %vm836_vm8, %v1247_v47, %v3886_v35  ;;  %v1256_v40 = vsel %vm836_vm8, %v1248_v37, %v3887_v34  ;;  %v2050_v37 = vld [vmem:[#allocation3 + $0x2] sm:$0xf] }
 0x2ff   : > { %v1263_v30 = vsel %vm839_vm9, %v1255_v39, %v3891_v15  ;;  %v1264_v48 = vsel %vm839_vm9, %v1256_v40, %v3892_v44 }
 0x300   : > { %v1271_v26 = vsel %vm842_vm10, %v1263_v30, %v3896_v51  ;;  %v1272_v28 = vsel %vm842_vm10, %v1264_v48, %v3897_v49 }
 0x303   : > { %v3900_v55 = vpop.permute.xlu0 %3899 }
 0x304   : > { %v3902_v58 = vunpack.i.h.bf16 %v3900_v55  ;;  %v3901_v59 = vunpack.i.l.bf16 %v3900_v55 }
 0x306   : > { %v1279_v62 = vsel %vm845_vm11, %v1271_v26, %v3901_v59  ;;  %v1280_v52 = vsel %vm845_vm11, %v1272_v28, %v3902_v58 }
 0x307   : > { %v1286_v1 = vpack.c.bf16 %v1280_v52, %v1279_v62 }
 0x309   : > { %3600 = vmatmul.msk.bf16.gmra.mxu1 %vm861_vm12, %v1286_v1 }
 0x35c   : > { %v2016_v3 = vpop.f32.mrf.mxu2 }
 0x35d   : > { %v2017_v4 = vadd.f32 %v2016_v3, %v4678_v43 }
 0x35f   : > { %v2023_v6 = vmul.f32 %v4223_v2, %v2017_v4 }
 0x361   : > { %v2027_v7 = vadd.f32 %v4224_v5, %v2023_v6 }
 0x363   : > { %v2029_v50 = vmax.f32 %v2027_v7, 0.0 }
 0x364   : > { %v2018_v8 = vpop.f32.mrf.mxu2 }
 0x365   : > { %v2033_v32 = vrot.slane %v2029_v50, 4  ;;  %2038 = vst.msk [vmem:[#allocation3 + $0x9] sm:$0xf] %vm5337_vm0, %v2029_v50  ;;  %v2019_v9 = vadd.f32 %v2018_v8, %v4685_v60 }
 0x367   : > { %2039 = vst.msk [vmem:[#allocation3 + $0x11] sm:$0xf] %vm5337_vm0, %v2033_v32  ;;  %v2024_v38 = vmul.f32 %v4223_v2, %v2019_v9 }
 0x369   : > { %v2028_v54 = vadd.f32 %v4224_v5, %v2024_v38 }
 0x36b   : > { %v2030_v10 = vmax.f32 %v2028_v54, 0.0 }
 0x36c   : > { %v2043_v43 = vld [vmem:[#allocation3 + $0x8] sm:$0xf] }
 0x36d   : > { %2084 = vst [vmem:[#allocation1 + $0x1] ss:$2 sm:$0xff] %v2043_v43  ;;  %v2034_v60 = vrot.slane %v2030_v10, 4  ;;  %v2047_v57 = vld [vmem:[#allocation3 + $0x9] sm:$0xf] }
 0x36e   : > { %v2044_v13 = vld [vmem:[#allocation3 + $0x10] sm:$0xf]  ;;  %2040 = vst.msk [vmem:[#allocation3 + $0x19] sm:$0xf] %vm5337_vm0, %v2030_v10  ;;  %v2051_v44 = vld [vmem:[#allocation3 + $0xa] sm:$0xf] }
 0x36f   : > { %v1412_v14 = vpop.f32.mrf.mxu1  ;;  %2086 = vst [vmem:[#allocation1 + $0x10] ss:$2 sm:$0xff] %v2044_v13  ;;  %v2048_v1 = vld [vmem:[#allocation3 + $0x11] sm:$0xf] }
 0x370   : > { %v1413_v17 = vadd.f32 %v1412_v14, %v4563_v11  ;;  %2041 = vst.msk [vmem:[#allocation3 + $0x21] sm:$0xf] %vm5337_vm0, %v2034_v60 }
 0x372   : > { %v1434_v19 = vmul.f32 %v4751_v12, %v1413_v17 }
 0x374   : > { %v1444_v21 = vadd.f32 %v4757_v18, %v1434_v19  ;;  %v4763_v11 = vld.sshfl [vmem:[#allocation1] sm:$0xff pattern:$0x75316420]  ;;  %v2054_v19 = vld [vmem:[#allocation3 + $0x8] sm:$0xf] }
 0x375   : > { %2097 = vst [vmem:[#allocation1] ss:$2 sm:$0xff] %v2046_v22  ;;  %v2045_v34 = vld [vmem:[#allocation3 + $0x18] sm:$0xf] }
 0x376   : > { %v1452_v46 = vmax.f32 %v1444_v21, 0.0  ;;  %2099 = vst [vmem:[#allocation1 + $0x1] ss:$2 sm:$0xff] %v2047_v57  ;;  %v2049_v3 = vld [vmem:[#allocation3 + $0x19] sm:$0xf] }
 0x377   : > { %v1414_v45 = vpop.f32.mrf.mxu1  ;;  %2088 = vst [vmem:[#allocation1 + $0x11] ss:$2 sm:$0xff] %v2045_v34 }
 0x378   : > { %v1415_v24 = vadd.f32 %v1414_v45, %v4571_v20  ;;  %v2899_v29 = vrot.slane %v1452_v46, 2  ;;  %v2900_v31 = vrot.slane %v1452_v46, 4  ;;  %v2901_v35 = vrot.slane %v1452_v46, 6  ;;  %2308 = vst.msk [vmem:[#allocation2 + $0x11] sm:$0xff] %vm475_vm3, %v1452_v46 }
 0x379   : > { %v3661_v47 = vrot.slane %v1452_v46, 9 }
 0x37a   : > { %v1435_v27 = vmul.f32 %v4751_v12, %v1415_v24  ;;  %v3662_v39 = vrot.slane %v2899_v29, 9  ;;  %v3663_v40 = vrot.slane %v2900_v31, 9  ;;  %v3664_v41 = vrot.slane %v2901_v35, 9  ;;  %v2055_v24 = vld [vmem:[#allocation3 + $0x10] sm:$0xf] }
 0x37b   : > { %v3043_v30 = vadd.f32 %v3661_v47, %v1452_v46 }
 0x37c   : > { %v1445_v36 = vadd.f32 %v4757_v18, %v1435_v27  ;;  %v3044_v55 = vadd.f32 %v3662_v39, %v2899_v29  ;;  %v3045_v58 = vadd.f32 %v3663_v40, %v2900_v31  ;;  %v3046_v26 = vadd.f32 %v3664_v41, %v2901_v35 }
 0x37d   : > { %v4769_v15 = vld.sshfl [vmem:[#allocation1] sm:$0xff pattern:$0x75316420]  ;;  %v3075_v5 = vmul.f32 0.5, %v3043_v30 }
 0x37e   : > { %v1453_v20 = vmax.f32 %v1445_v36, 0.0  ;;  %2116 = vst [vmem:[#allocation1] ss:$2 sm:$0xff] %v2050_v37  ;;  %v4772_v4 = vld.sshfl [vmem:[#allocation1 + $0x10] sm:$0xff pattern:$0x75316420] }
 0x37f   : > { %2118 = vst [vmem:[#allocation1 + $0x1] ss:$2 sm:$0xff] %v2051_v44  ;;  %v3076_v32 = vmul.f32 0.5, %v3044_v55  ;;  %v3077_v9 = vmul.f32 0.5, %v3045_v58  ;;  %v3078_v10 = vmul.f32 0.5, %v3046_v26  ;;  %v4779_v35 = vld [vmem:[#allocation2 + $0x11] sm:$0xff] }
 0x380   : > { %v2902_v48 = vrot.slane %v1453_v20, 2  ;;  %v2903_v49 = vrot.slane %v1453_v20, 4  ;;  %v2904_v51 = vrot.slane %v1453_v20, 6  ;;  %v3665_v59 = vrot.slane %v1453_v20, 9  ;;  %2309 = vst.msk [vmem:[#allocation2 + $0x21] sm:$0xff] %vm475_vm3, %v1453_v20 }
 0x381   : > { %2101 = vst [vmem:[#allocation1 + $0x10] ss:$2 sm:$0xff] %v2048_v1  ;;  %v2058_v58 = vld [vmem:[#allocation3 + $0x9] sm:$0xf]  ;;  %v2059_v26 = vld [vmem:[#allocation3 + $0x11] sm:$0xf] }
 0x382   : > { %v3666_v28 = vrot.slane %v2902_v48, 9  ;;  %v3667_v62 = vrot.slane %v2903_v49, 9  ;;  %v3668_v52 = vrot.slane %v2904_v51, 9  ;;  %v3047_v2 = vadd.f32 %v3665_v59, %v1453_v20  ;;  %2103 = vst [vmem:[#allocation1 + $0x11] ss:$2 sm:$0xff] %v2049_v3 }
 0x383   : > { %v2052_v20 = vld [vmem:[#allocation3 + $0x12] sm:$0xf] }
 0x384   : > { %v3048_v6 = vadd.f32 %v3666_v28, %v2902_v48  ;;  %v3049_v7 = vadd.f32 %v3667_v62, %v2903_v49  ;;  %v3050_v50 = vadd.f32 %v3668_v52, %v2904_v51  ;;  %v3079_v38 = vmul.f32 0.5, %v3047_v2  ;;  %v2053_v48 = vld [vmem:[#allocation3 + $0x1a] sm:$0xf]  ;;  %v2062_v28 = vld [vmem:[#allocation3 + $0xa] sm:$0xf] }
 0x386   : > { %v1417_v8 = vpop.f32.mrf.mxu1  ;;  %v3080_v43 = vmul.f32 0.5, %v3048_v6  ;;  %v3081_v13 = vmul.f32 0.5, %v3049_v7  ;;  %v3082_v14 = vmul.f32 0.5, %v3050_v50  ;;  %v3107_v17 = vadd.f32 %v3079_v38, %v3075_v5  ;;  %v2123_v21 = vld.sshfl [vmem:[#allocation1] sm:$0xff pattern:$0x75316420] }
 0x387   : > { %v1418_v54 = vadd.f32 %v1417_v8, %v4580_v42  ;;  %2135 = vst [vmem:[#allocation1] ss:$2 sm:$0xff] %v2054_v19  ;;  %v4777_v29 = vld [vmem:[#allocation2 + $0x21] sm:$0xff]  ;;  %v2056_v7 = vld [vmem:[#allocation3 + $0x18] sm:$0xf] }
 0x388   : > { %v3108_v22 = vadd.f32 %v3080_v43, %v3076_v32  ;;  %v3109_v46 = vadd.f32 %v3081_v13, %v3077_v9  ;;  %v3110_v45 = vadd.f32 %v3082_v14, %v3078_v10  ;;  %v3123_v57 = vmul.f32 0.5, %v3107_v17  ;;  %2137 = vst [vmem:[#allocation1 + $0x1] ss:$2 sm:$0xff] %v2055_v24  ;;  %v2057_v50 = vld [vmem:[#allocation3 + $0x20] sm:$0xf] }
 0x389   : > { %v1436_v60 = vmul.f32 %v4751_v12, %v1418_v54  ;;  %v4053_v36 = vpack.i.bf16 %v4777_v29, %v4779_v35  ;;  %v2105_v44 = vld.sshfl [vmem:[#allocation1 + $0x10] sm:$0xff pattern:$0x75316420]  ;;  %v2063_v19 = vld [vmem:[#allocation3 + $0x12] sm:$0xf] }
 0x38a   : > { %v3124_v42 = vmul.f32 0.5, %v3108_v22  ;;  %v3125_v31 = vmul.f32 0.5, %v3109_v46  ;;  %v3126_v34 = vmul.f32 0.5, %v3110_v45  ;;  %v3155_v47 = vperm.slane %v3123_v57, 0  ;;  %2120 = vst [vmem:[#allocation1 + $0x10] ss:$2 sm:$0xff] %v2052_v20 }
 0x38b   : > { %v1446_v27 = vadd.f32 %v4757_v18, %v1436_v60  ;;  %v3933_v55 = vpack.i.bf16 %v2105_v44, %v4769_v15  ;;  %2122 = vst [vmem:[#allocation1 + $0x11] ss:$2 sm:$0xff] %v2053_v48 }
 0x38c   : > { %v3156_v37 = vperm.slane %v3124_v42, 0  ;;  %v3157_v39 = vperm.slane %v3125_v31, 0  ;;  %v3158_v49 = vperm.slane %v3126_v34, 0 }
 0x38d   : > { %v1454_v40 = vmax.f32 %v1446_v27, 0.0  ;;  %3934 = vrot.lane.b32.xlu1 %v3933_v55, %s4244_s16  ;;  %v2061_v55 = vld [vmem:[#allocation3 + $0x21] sm:$0xf] }
 0x38e   : > { %v1419_v41 = vpop.f32.mrf.mxu1  ;;  %v3171_v51 = vsel %vm1740_vm13, %v3156_v37, %v3155_v47 }
 0x38f   : > { %v1420_v30 = vadd.f32 %v1419_v41, %v4582_v63  ;;  %v3172_v59 = vsel %vm1742_vm14, %v3157_v39, %v3171_v51  ;;  %2310 = vst.msk [vmem:[#allocation2 + $0x31] sm:$0xff] %vm475_vm3, %v1454_v40  ;;  %v2142_v52 = vld.sshfl [vmem:[#allocation1] sm:$0xff pattern:$0x75316420]  ;;  %v2905_v1 = vrot.slane %v1454_v40, 2  ;;  %v2906_v15 = vrot.slane %v1454_v40, 4 }
 0x390   : > { %v3173_v62 = vsel %vm1744_vm15, %v3158_v49, %v3172_v59  ;;  %2154 = vst [vmem:[#allocation1] ss:$2 sm:$0xff] %v2058_v58  ;;  %v2907_v2 = vrot.slane %v1454_v40, 6  ;;  %v3669_v3 = vrot.slane %v1454_v40, 9 }
 0x391   : > { %v1437_v63 = vmul.f32 %v4751_v12, %v1420_v30  ;;  %3187 = vst.msk [vmem:[#allocation3 + $0x9] sm:$0xf] %vm5337_vm0, %v3173_v62  ;;  %v3670_v8 = vrot.slane %v2905_v1, 9  ;;  %v3671_v9 = vrot.slane %v2906_v15, 9 }
 0x392   : > { %2156 = vst [vmem:[#allocation1 + $0x1] ss:$2 sm:$0xff] %v2059_v26  ;;  %v2124_v32 = vld.sshfl [vmem:[#allocation1 + $0x10] sm:$0xff pattern:$0x75316420]  ;;  %v3672_v38 = vrot.slane %v2907_v2, 9  ;;  %v3051_v54 = vadd.f32 %v3669_v3, %v1454_v40 }
 0x393   : > { %v1447_v5 = vadd.f32 %v4757_v18, %v1437_v63  ;;  %2139 = vst [vmem:[#allocation1 + $0x10] ss:$2 sm:$0xff] %v2056_v7  ;;  %v3938_v17 = vpack.i.bf16 %v2124_v32, %v2123_v21  ;;  %v3052_v46 = vadd.f32 %v3670_v8, %v2905_v1  ;;  %v3053_v45 = vadd.f32 %v3671_v9, %v2906_v15  ;;  %v2060_v40 = vld [vmem:[#allocation3 + $0x19] sm:$0xf]  ;;  %v2066_v63 = vld [vmem:[#allocation3 + $0x10] sm:$0xf] }
 0x394   : > { %2141 = vst [vmem:[#allocation1 + $0x11] ss:$2 sm:$0xff] %v2057_v50  ;;  %v3054_v24 = vadd.f32 %v3672_v38, %v2907_v2  ;;  %v3083_v27 = vmul.f32 0.5, %v3051_v54  ;;  %v2064_v9 = vld [vmem:[#allocation3 + $0x1a] sm:$0xf] }
 0x395   : > { %v1455_v6 = vmax.f32 %v1447_v5, 0.0  ;;  %3939 = vrot.lane.b32.xlu0 %v3938_v17, %s4246_s18  ;;  %v3084_v41 = vmul.f32 0.5, %v3052_v46  ;;  %v3085_v20 = vmul.f32 0.5, %v3053_v45  ;;  %v2067_v5 = vld [vmem:[#allocation3 + $0x18] sm:$0xf] }
 0x396   : > { %v3086_v48 = vmul.f32 0.5, %v3054_v24  ;;  %v2068_v46 = vld [vmem:[#allocation3 + $0x20] sm:$0xf] }
 0x397   : > { %v2908_v10 = vrot.slane %v1455_v6, 2  ;;  %v2909_v43 = vrot.slane %v1455_v6, 4  ;;  %v2910_v13 = vrot.slane %v1455_v6, 6  ;;  %v3673_v14 = vrot.slane %v1455_v6, 9  ;;  %2311 = vst.msk [vmem:[#allocation2 + $0x41] sm:$0xff] %vm475_vm3, %v1455_v6 }
 0x399   : > { %v3055_v60 = vadd.f32 %v3673_v14, %v1455_v6  ;;  %v2161_v22 = vld.sshfl [vmem:[#allocation1] sm:$0xff pattern:$0x75316420]  ;;  %v3674_v57 = vrot.slane %v2908_v10, 9  ;;  %v3675_v42 = vrot.slane %v2909_v43, 9  ;;  %v3676_v31 = vrot.slane %v2910_v13, 9 }
 0x39a   : > { %2173 = vst [vmem:[#allocation1] ss:$2 sm:$0xff] %v2062_v28  ;;  %v2074_v14 = vld [vmem:[#allocation3 + $0x12] sm:$0xf] }
 0x39b   : > { %v3087_v34 = vmul.f32 0.5, %v3055_v60  ;;  %2175 = vst [vmem:[#allocation1 + $0x1] ss:$2 sm:$0xff] %v2063_v19  ;;  %v3056_v47 = vadd.f32 %v3674_v57, %v2908_v10  ;;  %v3057_v37 = vadd.f32 %v3675_v42, %v2909_v43  ;;  %v3058_v39 = vadd.f32 %v3676_v31, %v2910_v13  ;;  %v2143_v30 = vld.sshfl [vmem:[#allocation1 + $0x10] sm:$0xff pattern:$0x75316420] }
 0x39c   : > { %2158 = vst [vmem:[#allocation1 + $0x10] ss:$2 sm:$0xff] %v2060_v40  ;;  %v3943_v26 = vpack.i.bf16 %v2143_v30, %v2142_v52  ;;  %v2065_v10 = vld [vmem:[#allocation3 + $0x22] sm:$0xf]  ;;  %v2070_v13 = vld [vmem:[#allocation3 + $0x11] sm:$0xf] }
 0x39d   : > { %v3111_v21 = vadd.f32 %v3087_v34, %v3083_v27  ;;  %v3088_v44 = vmul.f32 0.5, %v3056_v47  ;;  %v3089_v49 = vmul.f32 0.5, %v3057_v37  ;;  %v3090_v51 = vmul.f32 0.5, %v3058_v39  ;;  %2160 = vst [vmem:[#allocation1 + $0x11] ss:$2 sm:$0xff] %v2061_v55  ;;  %v954_v47 = vld [vmem:[#allocation2 + $0x71] sm:$0xff] }
 0x39e   : > { %3944 = vrot.lane.b32.xlu2 %v3943_v26, %s4248_s20  ;;  %v2071_v60 = vld [vmem:[#allocation3 + $0x19] sm:$0xf]  ;;  %v2069_v19 = vld [vmem:[#allocation3 + $0x28] sm:$0xf]  ;;  %v2072_v42 = vld [vmem:[#allocation3 + $0x21] sm:$0xf] }
 0x39f   : > { %v3112_v58 = vadd.f32 %v3088_v44, %v3084_v41  ;;  %v3127_v59 = vmul.f32 0.5, %v3111_v21  ;;  %v3113_v28 = vadd.f32 %v3089_v49, %v3085_v20  ;;  %v3114_v62 = vadd.f32 %v3090_v51, %v3086_v48  ;;  %v2075_v57 = vld [vmem:[#allocation3 + $0x1a] sm:$0xf]  ;;  %v2073_v27 = vld [vmem:[#allocation3 + $0x29] sm:$0xf]  ;;  %v962_v20 = vld [vmem:[#allocation2 + $0x72] sm:$0xff] }
 0x3a0   : > { %v2077_v37 = vld [vmem:[#allocation3 + $0x2a] sm:$0xf]  ;;  %v2076_v39 = vld [vmem:[#allocation3 + $0x22] sm:$0xf]  ;;  %v3963_v21 = vpack.i.bf16 %v954_v47, %v4654_v0  ;;  %v3978_v44 = vpack.i.bf16 %v962_v20, %v4648_v33  ;;  %v4814_v33 = vld [vmem:[#allocation2 + $0x91] sm:$0xff] }
 0x3a1   : > { %v3128_v1 = vmul.f32 0.5, %v3112_v58  ;;  %v3129_v2 = vmul.f32 0.5, %v3113_v28  ;;  %v3130_v3 = vmul.f32 0.5, %v3114_v62  ;;  %v3159_v6 = vperm.slane %v3127_v59, 0  ;;  %v931_v0 = vld [vmem:[#allocation2 + $0x81] sm:$0xff]  ;;  %v4816_v59 = vld [vmem:[#allocation2 + $0x90] sm:$0xff] }
 0x3a2   : > { %v2180_v15 = vld.sshfl [vmem:[#allocation1] sm:$0xff pattern:$0x75316420]  ;;  %v923_v51 = vld [vmem:[#allocation2 + $0x80] sm:$0xff]  ;;  %v3998_v55 = vpack.i.bf16 %v931_v0, %v954_v47  ;;  %v4013_v28 = vpack.i.bf16 %v4814_v33, %v931_v0 }
 0x3a3   : > { %2192 = vst [vmem:[#allocation1] ss:$2 sm:$0xff] %v2066_v63  ;;  %v3160_v7 = vperm.slane %v3128_v1, 0  ;;  %v3161_v50 = vperm.slane %v3129_v2, 0  ;;  %v3162_v8 = vperm.slane %v3130_v3, 0  ;;  %v3993_v58 = vpack.i.bf16 %v923_v51, %v4660_v25  ;;  %v939_v26 = vld [vmem:[#allocation2 + $0x82] sm:$0xff] }
 0x3a4   : > { %2194 = vst [vmem:[#allocation1 + $0x1] ss:$2 sm:$0xff] %v2067_v5  ;;  %v2162_v38 = vld.sshfl [vmem:[#allocation1 + $0x10] sm:$0xff pattern:$0x75316420]  ;;  %v4008_v62 = vpack.i.bf16 %v4816_v59, %v923_v51  ;;  %v4003_v63 = vpack.i.bf16 %v939_v26, %v962_v20  ;;  %v2327_v25 = vld [vmem:[#allocation2 + $0x31] sm:$0xff] }
 0x3a5   : > { %v3174_v32 = vsel %vm1740_vm13, %v3160_v7, %v3159_v6  ;;  %2177 = vst [vmem:[#allocation1 + $0x10] ss:$2 sm:$0xff] %v2064_v9  ;;  %v3948_v43 = vpack.i.bf16 %v2162_v38, %v2161_v22  ;;  %v2324_v1 = vld [vmem:[#allocation2 + $0x1] sm:$0xff]  ;;  %v4826_v2 = vpack.i.bf16 %v2327_v25, %v4777_v29  ;;  %v2333_v7 = vld [vmem:[#allocation2 + $0x12] sm:$0xff] }
 0x3a6   : > { %v3175_v52 = vsel %vm1742_vm14, %v3161_v50, %v3174_v32  ;;  %2179 = vst [vmem:[#allocation1 + $0x11] ss:$2 sm:$0xff] %v2065_v10  ;;  %v4023_v3 = vpack.i.bf16 %v4779_v35, %v2324_v1  ;;  %v2332_v6 = vld [vmem:[#allocation2 + $0x2] sm:$0xff]  ;;  %v3905_v10 = vpop.permute.xlu2 %3904 }
 0x3a7   : > { %v3176_v54 = vsel %vm1744_vm15, %v3162_v8, %v3175_v52  ;;  %3949 = vrot.lane.b32.xlu1 %v3948_v43, %s5340_s22  ;;  %v4043_v50 = vpack.i.bf16 %v2333_v7, %v2332_v6  ;;  %v2357_v8 = vld [vmem:[#allocation2 + $0x22] sm:$0xff]  ;;  %v4836_v52 = vld [vmem:[#allocation2 + $0x32] sm:$0xff]  ;;  %v3910_v43 = vpop.permute.xlu1 %3909  ;;  %v3906_v47 = vunpack.i.l.bf16 %v3905_v10 }
 0x3a8   : > { %3188 = vst.msk [vmem:[#allocation3 + $0x11] sm:$0xf] %vm5337_vm0, %v3176_v54  ;;  %v4058_v32 = vpack.i.bf16 %v2357_v8, %v2333_v7  ;;  %v4839_v9 = vpack.i.bf16 %v4836_v52, %v2357_v8  ;;  %v4843_v38 = vld [vmem:[#allocation2 + $0x41] sm:$0xff]  ;;  %vm2262_vm0 = vcmask 261120  }
 0x3a9   : > { %v4088_v54 = vpack.i.bf16 %v4843_v38, %v2327_v25  ;;  %v3192_v29 = vld [vmem:[#allocation3 + $0x8] sm:$0xf] }
 0x3ab   : > { %v2199_v17 = vld.sshfl [vmem:[#allocation1] sm:$0xff pattern:$0x75316420] }
 0x3ac   : > { %2211 = vst [vmem:[#allocation1] ss:$2 sm:$0xff] %v2070_v13  ;;  %v2270_v13 = vld [vmem:[%s5327_s9 + $0x10] sm:$0x3] }
 0x3ad   : > { %2213 = vst [vmem:[#allocation1 + $0x1] ss:$2 sm:$0xff] %v2071_v60  ;;  %v2181_v45 = vld.sshfl [vmem:[#allocation1 + $0x10] sm:$0xff pattern:$0x75316420] }
 0x3ae   : > { %2196 = vst [vmem:[#allocation1 + $0x10] ss:$2 sm:$0xff] %v2068_v46  ;;  %v3953_v24 = vpack.i.bf16 %v2181_v45, %v2180_v15  ;;  %v4823_v15 = vld [vmem:[#allocation2 + $0x92] sm:$0xff]  ;;  %v3920_v46 = vpop.permute.xlu2 %3919  ;;  %v3915_v45 = vpop.permute.xlu0 %3914 }
 0x3af   : > { %2198 = vst [vmem:[#allocation1 + $0x11] ss:$2 sm:$0xff] %v2069_v19  ;;  %v4018_v5 = vpack.i.bf16 %v4823_v15, %v939_v26  ;;  %v3712_v19 = vld [vmem:[%s5327_s9 + $0x8] sm:$0xff]  ;;  %v3916_v20 = vunpack.i.l.bf16 %v3915_v45  ;;  %v3922_v26 = vunpack.i.h.bf16 %v3920_v46 }
 0x3b0   : > { %3954 = vrot.lane.b32.xlu0 %v3953_v24, %s4252_s29  ;;  %v3925_v24 = vpop.permute.xlu1 %3924 }
 0x3b1   : > { %v3927_v1 = vunpack.i.h.bf16 %v3925_v24 }
 0x3b4   : > { %v2218_v22 = vld.sshfl [vmem:[#allocation1] sm:$0xff pattern:$0x75316420] }
 0x3b5   : > { %2230 = vst [vmem:[#allocation1] ss:$2 sm:$0xff] %v2074_v14  ;;  %v2280_v14 = vunpack.c.l.b16 %v2270_v13 }
 0x3b6   : > { %2232 = vst [vmem:[#allocation1 + $0x1] ss:$2 sm:$0xff] %v2075_v57  ;;  %v2200_v31 = vld.sshfl [vmem:[#allocation1 + $0x10] sm:$0xff pattern:$0x75316420] }
 0x3b7   : > { %2215 = vst [vmem:[#allocation1 + $0x10] ss:$2 sm:$0xff] %v2072_v42  ;;  %v3958_v34 = vpack.i.bf16 %v2200_v31, %v2199_v17  ;;  %v2283_v17 = vpack.c.b16 %v2280_v14, %v2280_v14 }
 0x3b8   : > { %2217 = vst [vmem:[#allocation1 + $0x11] ss:$2 sm:$0xff] %v2073_v27  ;;  %v3930_v27 = vpop.permute.xlu0 %3929 }
 0x3b9   : > { %3959 = vrot.lane.b32.xlu2 %v3958_v34, %s4253_s30  ;;  %v2292_v60 = vsel %vm5336_vm2, %v2283_v17, 0  ;;  %v3907_v34 = vunpack.i.h.bf16 %v3905_v10  ;;  %v3932_v7 = vunpack.i.h.bf16 %v3930_v27  ;;  %vm2259_vm2 = vcmask 228352  }
 0x3ba   : > { %2299 = vmatpush.bf16.msra.mxu3 %v2292_v60 }
 0x3bd   : > { %v2237_v30 = vld.sshfl [vmem:[#allocation1] sm:$0xff pattern:$0x75316420] }
 0x3be   : > { %2300 = vmatpush.bf16.msra.mxu3 %v3712_v19 }
 0x3bf   : > { %v2219_v40 = vld.sshfl [vmem:[#allocation1 + $0x10] sm:$0xff pattern:$0x75316420] }
 0x3c0   : > { %v3968_v41 = vpack.i.bf16 %v2219_v40, %v2218_v22  ;;  %2234 = vst [vmem:[#allocation1 + $0x10] ss:$2 sm:$0xff] %v2076_v39  ;;  %v3711_v22 = vld [vmem:[%s5327_s9] sm:$0xff]  ;;  %v3911_v39 = vunpack.i.l.bf16 %v3910_v43 }
 0x3c1   : > { %3964 = vrot.lane.b32.xlu2 %v3963_v21, %s5339_s21  ;;  %2236 = vst [vmem:[#allocation1 + $0x11] ss:$2 sm:$0xff] %v2077_v37  ;;  %v3912_v37 = vunpack.i.h.bf16 %v3910_v43 }
 0x3c2   : > { %3969 = vrot.lane.b32.xlu1 %v3968_v41, %s4254_s23  ;;  %2301 = vmatpush.bf16.msra.mxu3 %v3711_v22  ;;  %v3917_v41 = vunpack.i.h.bf16 %v3915_v45 }
 0x3c8   : > { %v2238_v48 = vld.sshfl [vmem:[#allocation1 + $0x10] sm:$0xff pattern:$0x75316420] }
 0x3c9   : > { %3984 = vrot.lane.b32.xlu2 %v3963_v21, %s4243_s15  ;;  %v3973_v49 = vpack.i.bf16 %v2238_v48, %v2237_v30  ;;  %v1225_v30 = vsel %vm825_vm5, %v4631_v56, %v3906_v47 }
 0x3ca   : > { %3979 = vrot.lane.b32.xlu1 %v3978_v44, %s5340_s22  ;;  %v1233_v48 = vsel %vm475_vm3, %v1225_v30, %v3911_v39 }
 0x3cb   : > { %3974 = vrot.lane.b32.xlu0 %v3973_v49, %s4255_s24  ;;  %v1241_v51 = vsel %vm830_vm6, %v1233_v48, %v3916_v20 }
 0x3d1   : > { %3999 = vrot.lane.b32.xlu2 %v3998_v55, %s4246_s18 }
 0x3d2   : > { %3994 = vrot.lane.b32.xlu1 %v3993_v58, %s4245_s17  ;;  %s473_s17 = scalar_lea.vmem %s5331_s13, %s3707_s27 }
 0x3d3   : > { %3989 = vrot.lane.b32.xlu0 %v3978_v44, %s4244_s16  ;;  %v1226_v44 = vsel %vm825_vm5, %v4638_v61, %v3907_v34  ;;  %v3926_v61 = vunpack.i.l.bf16 %v3925_v24 }
 0x3d4   : > { %v1234_v49 = vsel %vm475_vm3, %v1226_v44, %v3912_v37 }
 0x3d5   : > { %v1242_v0 = vsel %vm830_vm6, %v1234_v49, %v3917_v41 }
 0x3d9   : > { %4014 = vrot.lane.b32.xlu2 %v4013_v28, %s5339_s21  ;;  %v3921_v28 = vunpack.i.l.bf16 %v3920_v46 }
 0x3da   : > { %4009 = vrot.lane.b32.xlu1 %v4008_v62, %s4248_s20 }
 0x3db   : > { %4004 = vrot.lane.b32.xlu0 %v4003_v63, %s4247_s19  ;;  %v1249_v56 = vsel %vm833_vm7, %v1241_v51, %v3921_v28 }
 0x3dc   : > { %v1257_v46 = vsel %vm836_vm8, %v1249_v56, %v3926_v61 }
 0x3e1   : > { %4029 = vrot.lane.b32.xlu2 %v4826_v2, %s4244_s16 }
 0x3e2   : > { %4024 = vrot.lane.b32.xlu1 %v4023_v3, %s4244_s16  ;;  %v1250_v3 = vsel %vm833_vm7, %v1242_v0, %v3922_v26 }
 0x3e3   : > { %4019 = vrot.lane.b32.xlu0 %v4018_v5, %s5340_s22  ;;  %v1258_v45 = vsel %vm836_vm8, %v1250_v3, %v3927_v1 }
 0x3e9   : > { %4044 = vrot.lane.b32.xlu2 %v4043_v50, %s4246_s18  ;;  %v3931_v50 = vunpack.i.l.bf16 %v3930_v27 }
 0x3f1   : > { %4059 = vrot.lane.b32.xlu2 %v4058_v32, %s4252_s29 }
 0x3f8   : > { %v3945_v57 = vpop.permute.xlu2 %3944 }
 0x3f9   : > { %4074 = vrot.lane.b32.xlu2 %v4839_v9, %s4255_s24  ;;  %v3947_v14 = vunpack.i.h.bf16 %v3945_v57  ;;  %v3946_v17 = vunpack.i.l.bf16 %v3945_v57 }
 0x3ff   : > { %v3935_v42 = vpop.permute.xlu1 %3934 }
 0x400   : > { %v3937_v55 = vunpack.i.h.bf16 %v3935_v42  ;;  %v3936_v58 = vunpack.i.l.bf16 %v3935_v42  ;;  %v1266_v42 = vsel %vm839_vm9, %v1258_v45, %v3932_v7 }
 0x401   : > { %4089 = vrot.lane.b32.xlu2 %v4088_v54, %s5340_s22 }
 0x402   : > { %v2246_v8 = vsel %vm475_vm3, %v4772_v4, %v3937_v55  ;;  %v2245_v32 = vsel %vm475_vm3, %v4763_v11, %v3936_v58  ;;  %v1265_v4 = vsel %vm839_vm9, %v1257_v46, %v3931_v50 }
 0x407   : > { %v3940_v21 = vpop.permute.xlu0 %3939 }
 0x408   : > { %v3942_v62 = vunpack.i.h.bf16 %v3940_v21  ;;  %v3941_v63 = vunpack.i.l.bf16 %v3940_v21 }
 0x40a   : > { %v2248_v54 = vsel %vm833_vm7, %v2246_v8, %v3942_v62  ;;  %v2247_v10 = vsel %vm833_vm7, %v2245_v32, %v3941_v63 }
 0x40b   : > { %v2249_v11 = vsel %vm839_vm9, %v2247_v10, %v3946_v17  ;;  %v2250_v22 = vsel %vm839_vm9, %v2248_v54, %v3947_v14  ;;  %v898_v54 = vld [vmem:[#allocation2 + $0x60] sm:$0xff]  ;;  %v899_v10 = vld [vmem:[#allocation2 + $0x70] sm:$0xff] }
 0x413   : > { %v4857_v31 = vpop.permute.xlu2 %3959 }
 0x414   : > { %v3961_v41 = vunpack.i.l.bf16 %v4857_v31 }
 0x419   : > { %v3950_v40 = vpop.permute.xlu1 %3949 }
 0x41a   : > { %v3952_v43 = vunpack.i.h.bf16 %v3950_v40  ;;  %v3951_v13 = vunpack.i.l.bf16 %v3950_v40  ;;  %v3962_v40 = vunpack.i.h.bf16 %v4857_v31 }
 0x41b   : > { %v3965_v25 = vpop.permute.xlu2 %3964 }
 0x41c   : > { %v3967_v24 = vunpack.i.h.bf16 %v3965_v25  ;;  %v3966_v27 = vunpack.i.l.bf16 %v3965_v25  ;;  %v2252_v34 = vsel %vm845_vm11, %v2250_v22, %v3952_v43  ;;  %v2251_v57 = vsel %vm845_vm11, %v2249_v11, %v3951_v13 }
 0x41e   : > { %v1274_v20 = vsel %vm842_vm10, %v1266_v42, %v3967_v24  ;;  %v1273_v30 = vsel %vm842_vm10, %v1265_v4, %v3966_v27 }
 0x422   : > { %v3955_v5 = vpop.permute.xlu0 %3954 }
 0x423   : > { %v3957_v60 = vunpack.i.h.bf16 %v3955_v5  ;;  %v3956_v19 = vunpack.i.l.bf16 %v3955_v5  ;;  %v3985_v51 = vpop.permute.xlu2 %3984 }
 0x424   : > { %v3986_v7 = vunpack.i.l.bf16 %v3985_v51 }
 0x425   : > { %v2255_v47 = vsel %vm5338_vm4, %v2252_v34, %v3957_v60  ;;  %v2254_v37 = vsel %vm5338_vm4, %v2251_v57, %v3956_v19  ;;  %vm2286_vm4 = vcmask 293888  }
 0x426   : > { %v2257_v55 = vsel %vm2256_vm1, %v2254_v37, %v3961_v41  ;;  %v2258_v58 = vsel %vm2256_vm1, %v2255_v47, %v3962_v40  ;;  %v1227_v14 = vsel %vm825_vm5, %v898_v54, %v3986_v7 }
 0x42b   : > { %v4000_v43 = vpop.permute.xlu2 %3999 }
 0x42c   : > { %v4002_v22 = vunpack.i.h.bf16 %v4000_v43  ;;  %v4001_v27 = vunpack.i.l.bf16 %v4000_v43 }
 0x433   : > { %v4015_v41 = vpop.permute.xlu2 %4014 }
 0x434   : > { %v3970_v6 = vpop.permute.xlu1 %3969 }
 0x435   : > { %v3972_v39 = vunpack.i.h.bf16 %v3970_v6  ;;  %v3971_v21 = vunpack.i.l.bf16 %v3970_v6  ;;  %v3987_v6 = vunpack.i.h.bf16 %v3985_v51 }
 0x437   : > { %v2261_v62 = vsel %vm2259_vm2, %v2258_v58, %v3972_v39  ;;  %v2260_v31 = vsel %vm2259_vm2, %v2257_v55, %v3971_v21  ;;  %v1228_v13 = vsel %vm825_vm5, %v899_v10, %v3987_v6  ;;  %vm5341_vm5 = vcmask 27648  }
 0x43c   : > { %v3980_v44 = vpop.permute.xlu1 %3979 }
 0x43d   : > { %v3982_v48 = vunpack.i.h.bf16 %v3980_v44  ;;  %v3981_v49 = vunpack.i.l.bf16 %v3980_v44  ;;  %v3975_v0 = vpop.permute.xlu0 %3974 }
 0x43e   : > { %v3977_v26 = vunpack.i.h.bf16 %v3975_v0  ;;  %v3976_v28 = vunpack.i.l.bf16 %v3975_v0 }
 0x43f   : > { %v1281_v63 = vsel %vm845_vm11, %v1273_v30, %v3981_v49  ;;  %v1282_v25 = vsel %vm845_vm11, %v1274_v20, %v3982_v48  ;;  %v4017_v30 = vunpack.i.h.bf16 %v4015_v41  ;;  %v4016_v48 = vunpack.i.l.bf16 %v4015_v41 }
 0x440   : > { %v1287_v1 = vpack.c.bf16 %v1282_v25, %v1281_v63  ;;  %v2263_v61 = vsel %vm2262_vm0, %v2260_v31, %v3976_v28  ;;  %v2264_v3 = vsel %vm2262_vm0, %v2261_v62, %v3977_v26 }
 0x441   : > { %v2265_v56 = vpack.c.bf16 %v2264_v3, %v2263_v61 }
 0x442   : > { %3601 = vmatmul.msk.bf16.gmra.mxu1 %vm861_vm12, %v1287_v1 }
 0x443   : > { %3648 = vmatmul.msk.bf16.vlgmr.msra.gmra.mxu3 %vm2286_vm4, %v2265_v56 }
 0x444   : > { %v3995_v5 = vpop.permute.xlu1 %3994 }
 0x445   : > { %v3990_v50 = vpop.permute.xlu0 %3989  ;;  %v3997_v17 = vunpack.i.h.bf16 %v3995_v5  ;;  %v3996_v60 = vunpack.i.l.bf16 %v3995_v5 }
 0x446   : > { %v3992_v8 = vunpack.i.h.bf16 %v3990_v50  ;;  %v3991_v32 = vunpack.i.l.bf16 %v3990_v50  ;;  %v4926_v50 = vld.sshfl [vmem:[#allocation1 + $0x20] sm:$0xff pattern:$0x73625140] }
 0x448   : > { %v1236_v19 = vsel %vm475_vm3, %v1228_v13, %v3992_v8  ;;  %v1235_v46 = vsel %vm475_vm3, %v1227_v14, %v3991_v32 }
 0x449   : > { %v1244_v45 = vsel %vm830_vm6, %v1236_v19, %v3997_v17  ;;  %v1243_v24 = vsel %vm830_vm6, %v1235_v46, %v3996_v60  ;;  %vm5342_vm6 = vmmov %vm5341_vm5 }
 0x44a   : > { %v1251_v37 = vsel %vm833_vm7, %v1243_v24, %v4001_v27  ;;  %v1252_v39 = vsel %vm833_vm7, %v1244_v45, %v4002_v22 }
 0x44c   : > { %v4010_v4 = vpop.permute.xlu1 %4009 }
 0x44d   : > { %v4005_v11 = vpop.permute.xlu0 %4004  ;;  %v4012_v57 = vunpack.i.h.bf16 %v4010_v4  ;;  %v4011_v47 = vunpack.i.l.bf16 %v4010_v4 }
 0x44e   : > { %v4007_v42 = vunpack.i.h.bf16 %v4005_v11  ;;  %v4006_v34 = vunpack.i.l.bf16 %v4005_v11 }
 0x450   : > { %v1259_v21 = vsel %vm836_vm8, %v1251_v37, %v4006_v34  ;;  %v1260_v40 = vsel %vm836_vm8, %v1252_v39, %v4007_v42  ;;  %v4939_v39 = vld [vmem:[#allocation2 + $0x20] sm:$0xff]  ;;  %vm5343_vm8 = vcmask 1041408  }
 0x451   : > { %v1267_v20 = vsel %vm839_vm9, %v1259_v21, %v4011_v47  ;;  %v1268_v44 = vsel %vm839_vm9, %v1260_v40, %v4012_v57 }
 0x452   : > { %v1275_v55 = vsel %vm842_vm10, %v1267_v20, %v4016_v48  ;;  %v1276_v58 = vsel %vm842_vm10, %v1268_v44, %v4017_v30  ;;  %vm5344_vm10 = vcmask 162816  }
 0x455   : > { %v4020_v49 = vpop.permute.xlu0 %4019 }
 0x456   : > { %v4022_v0 = vunpack.i.h.bf16 %v4020_v49  ;;  %v4021_v51 = vunpack.i.l.bf16 %v4020_v49 }
 0x458   : > { %v1283_v26 = vsel %vm845_vm11, %v1275_v55, %v4021_v51  ;;  %v1284_v28 = vsel %vm845_vm11, %v1276_v58, %v4022_v0  ;;  %v4946_v0 = vld [vmem:[#allocation2 + $0x10] sm:$0xff] }
 0x459   : > { %v1288_v62 = vpack.c.bf16 %v1284_v28, %v1283_v26 }
 0x45b   : > { %3602 = vmatmul.msk.bf16.gmra.mxu1 %vm861_vm12, %v1288_v62  ;;  %vm5345_vm12 = vmmov %vm5344_vm10 }
 0x4bf   : > { %v1422_v31 = vpop.f32.mrf.mxu1 }
 0x4c0   : > { %v1423_v63 = vadd.f32 %v1422_v31, %v4588_v53 }
 0x4c2   : > { %v1438_v25 = vmul.f32 %v4751_v12, %v1423_v63  ;;  %v4048_v63 = vpack.i.bf16 %v4939_v39, %v4946_v0 }
 0x4c4   : > { %v1448_v1 = vadd.f32 %v4757_v18, %v1438_v25 }
 0x4c6   : > { %v1456_v61 = vmax.f32 %v1448_v1, 0.0  ;;  %v4919_v3 = vpop.f32.mrf.mxu3 }
 0x4c7   : > { %v2719_v56 = vrot.slane %v4919_v3, 1  ;;  %v2720_v5 = vrot.slane %v4919_v3, 2  ;;  %v2721_v6 = vrot.slane %v4919_v3, 3  ;;  %v2733_v7 = vperm.slane %v4919_v3, 0  ;;  %v1424_v53 = vpop.f32.mrf.mxu1 }
 0x4c8   : > { %2312 = vst.msk [vmem:[#allocation2 + $0x51] sm:$0xff] %vm475_vm3, %v1456_v61  ;;  %v2911_v10 = vrot.slane %v1456_v61, 2  ;;  %v1425_v43 = vadd.f32 %v1424_v53, %v4591_v16  ;;  %v2912_v13 = vrot.slane %v1456_v61, 4  ;;  %v2913_v14 = vrot.slane %v1456_v61, 6 }
 0x4c9   : > { %v2734_v8 = vperm.slane %v2719_v56, 0  ;;  %v2735_v32 = vperm.slane %v2720_v5, 0  ;;  %v2736_v54 = vperm.slane %v2721_v6, 0  ;;  %2772 = vst [vmem:[#allocation1 + $0x20] ss:$4 sm:$0xff] %v2733_v7  ;;  %v3677_v60 = vrot.slane %v1456_v61, 9 }
 0x4ca   : > { %2764 = vst [vmem:[#allocation1] ss:$4 sm:$0xff] %v2733_v7  ;;  %v1439_v17 = vmul.f32 %v4751_v12, %v1425_v43  ;;  %v3678_v19 = vrot.slane %v2911_v10, 9  ;;  %v2722_v46 = vrot.slane %v4919_v3, 4  ;;  %v3679_v4 = vrot.slane %v2912_v13, 9 }
 0x4cb   : > { %2774 = vst [vmem:[#allocation1 + $0x21] ss:$4 sm:$0xff] %v2734_v8  ;;  %v3680_v11 = vrot.slane %v2913_v14, 9  ;;  %v2723_v16 = vrot.slane %v4919_v3, 5  ;;  %v2724_v22 = vrot.slane %v4919_v3, 6  ;;  %v3059_v34 = vadd.f32 %v3677_v60, %v1456_v61 }
 0x4cc   : > { %2776 = vst [vmem:[#allocation1 + $0x22] ss:$4 sm:$0xff] %v2735_v32  ;;  %v1449_v24 = vadd.f32 %v4757_v18, %v1439_v17  ;;  %v3060_v57 = vadd.f32 %v3678_v19, %v2911_v10  ;;  %v2725_v47 = vrot.slane %v4919_v3, 7  ;;  %v2737_v37 = vperm.slane %v2722_v46, 0 }
 0x4cd   : > { %2778 = vst [vmem:[#allocation1 + $0x23] ss:$4 sm:$0xff] %v2736_v54  ;;  %v3061_v44 = vadd.f32 %v3679_v4, %v2912_v13  ;;  %v3062_v30 = vadd.f32 %v3680_v11, %v2913_v14  ;;  %v2739_v48 = vperm.slane %v2724_v22, 0  ;;  %v3091_v28 = vmul.f32 0.5, %v3059_v34  ;;  %v4954_v14 = vld [vmem:[#allocation2 + $0x30] sm:$0xff] }
 0x4ce   : > { %2766 = vst [vmem:[#allocation1 + $0x1] ss:$4 sm:$0xff] %v2734_v8  ;;  %v1457_v27 = vmax.f32 %v1449_v24, 0.0  ;;  %v2740_v62 = vperm.slane %v2725_v47, 0  ;;  %v3092_v6 = vmul.f32 0.5, %v3060_v57  ;;  %v4956_v24 = vpop.f32.mrf.mxu3  ;;  %v4063_v34 = vpack.i.bf16 %v4954_v14, %v4939_v39 }
 0x4cf   : > { %v4931_v45 = vld [vmem:[#allocation2 + $0x51] sm:$0xff]  ;;  %2768 = vst [vmem:[#allocation1 + $0x2] ss:$4 sm:$0xff] %v2735_v32  ;;  %v3093_v7 = vmul.f32 0.5, %v3061_v44  ;;  %v3094_v53 = vmul.f32 0.5, %v3062_v30  ;;  %v2727_v22 = vrot.slane %v4956_v24, 2 }
 0x4d0   : > { %2770 = vst [vmem:[#allocation1 + $0x3] ss:$4 sm:$0xff] %v2736_v54  ;;  %v4103_v42 = vpack.i.bf16 %v4931_v45, %v4843_v38  ;;  %v2914_v21 = vrot.slane %v1457_v27, 2  ;;  %v2915_v40 = vrot.slane %v1457_v27, 4  ;;  %v2916_v41 = vrot.slane %v1457_v27, 6 }
 0x4d1   : > { %v3681_v20 = vrot.slane %v1457_v27, 9  ;;  %2313 = vst.msk [vmem:[#allocation2 + $0x61] sm:$0xff] %vm475_vm3, %v1457_v27  ;;  %v2738_v38 = vperm.slane %v2723_v16, 0 }
 0x4d2   : > { %4104 = vrot.lane.b32.xlu2 %v4103_v42, %s4254_s23  ;;  %4034 = vrot.lane.b32.xlu0 %v4103_v42, %s4244_s16  ;;  %v3682_v51 = vrot.slane %v2914_v21, 9  ;;  %v3683_v55 = vrot.slane %v2915_v40, 9  ;;  %v3684_v58 = vrot.slane %v2916_v41, 9 }
 0x4d3   : > { %v3063_v26 = vadd.f32 %v3681_v20, %v1457_v27 }
 0x4d4   : > { %v4944_v49 = vld.sshfl [vmem:[#allocation1 + $0x20] sm:$0xff pattern:$0x73625140]  ;;  %v3064_v25 = vadd.f32 %v3682_v51, %v2914_v21  ;;  %v3065_v1 = vadd.f32 %v3683_v55, %v2915_v40  ;;  %v3066_v61 = vadd.f32 %v3684_v58, %v2916_v41  ;;  %v2741_v40 = vperm.slane %v4956_v24, 0 }
 0x4d5   : > { %2785 = vst [vmem:[#allocation1 + $0x20] ss:$4 sm:$0xff] %v2737_v37  ;;  %v3095_v56 = vmul.f32 0.5, %v3063_v26  ;;  %v2729_v26 = vrot.slane %v4956_v24, 4 }
 0x4d6   : > { %2786 = vst [vmem:[#allocation1 + $0x21] ss:$4 sm:$0xff] %v2738_v38  ;;  %v3096_v32 = vmul.f32 0.5, %v3064_v25  ;;  %v3097_v54 = vmul.f32 0.5, %v3065_v1  ;;  %v3098_v10 = vmul.f32 0.5, %v3066_v61 }
 0x4d7   : > { %v4950_v5 = vld.sshfl [vmem:[#allocation1] sm:$0xff pattern:$0x73625140]  ;;  %2787 = vst [vmem:[#allocation1 + $0x22] ss:$4 sm:$0xff] %v2739_v48  ;;  %v3115_v43 = vadd.f32 %v3095_v56, %v3091_v28  ;;  %v2730_v56 = vrot.slane %v4956_v24, 5 }
 0x4d8   : > { %v1427_v31 = vpop.f32.mrf.mxu1  ;;  %2781 = vst [vmem:[#allocation1] ss:$4 sm:$0xff] %v2737_v37  ;;  %v3116_v17 = vadd.f32 %v3096_v32, %v3092_v6  ;;  %v3117_v60 = vadd.f32 %v3097_v54, %v3093_v7  ;;  %v3118_v19 = vadd.f32 %v3098_v10, %v3094_v53 }
 0x4d9   : > { %v1428_v8 = vadd.f32 %v1427_v31, %v4595_v23  ;;  %2782 = vst [vmem:[#allocation1 + $0x1] ss:$4 sm:$0xff] %v2738_v38  ;;  %v3131_v46 = vmul.f32 0.5, %v3115_v43 }
 0x4da   : > { %2783 = vst [vmem:[#allocation1 + $0x2] ss:$4 sm:$0xff] %v2739_v48  ;;  %4049 = vrot.lane.b32.xlu0 %v4048_v63, %s4248_s20  ;;  %v3132_v4 = vmul.f32 0.5, %v3116_v17  ;;  %v3133_v11 = vmul.f32 0.5, %v3117_v60  ;;  %v3134_v16 = vmul.f32 0.5, %v3118_v19  ;;  %v2743_v63 = vperm.slane %v2727_v22, 0 }
 0x4db   : > { %v1440_v13 = vmul.f32 %v4751_v12, %v1428_v8  ;;  %2784 = vst [vmem:[#allocation1 + $0x3] ss:$4 sm:$0xff] %v2740_v62  ;;  %v2726_v12 = vrot.slane %v4956_v24, 1  ;;  %v3163_v57 = vperm.slane %v3131_v46, 0  ;;  %v4231_v48 = vld [vmem:[%s5323_s5] ss:$0 sm:$0xff] }
 0x4dc   : > { %2788 = vst [vmem:[#allocation1 + $0x23] ss:$4 sm:$0xff] %v2740_v62  ;;  %v3164_v47 = vperm.slane %v3132_v4, 0  ;;  %v3165_v37 = vperm.slane %v3133_v11, 0  ;;  %v3166_v44 = vperm.slane %v3134_v16, 0  ;;  %v4985_v8 = vld [vmem:[#allocation2 + $0x62] sm:$0xff] }
 0x4dd   : > { %v1450_v23 = vadd.f32 %v4757_v18, %v1440_v13  ;;  %v2728_v18 = vrot.slane %v4956_v24, 3  ;;  %v2742_v28 = vperm.slane %v2726_v12, 0  ;;  %v4232_v62 = vld [vmem:[%s5323_s5 + $0x1] ss:$0 sm:$0xff] }
 0x4de   : > { %v3177_v30 = vsel %vm1740_vm13, %v3164_v47, %v3163_v57  ;;  %v2731_v57 = vrot.slane %v4956_v24, 6 }
 0x4df   : > { %v1458_v27 = vmax.f32 %v1450_v23, 0.0  ;;  %v3178_v55 = vsel %vm1742_vm14, %v3165_v37, %v3177_v30  ;;  %v4983_v6 = vperm.slane %v2728_v18, 0  ;;  %v2732_v18 = vrot.slane %v4956_v24, 7 }
 0x4e0   : > { %v1429_v42 = vpop.f32.mrf.mxu1  ;;  %v3179_v58 = vsel %vm1744_vm15, %v3166_v44, %v3178_v55 }
 0x4e1   : > { %v1430_v21 = vadd.f32 %v1429_v42, %v4926_v50  ;;  %v2917_v41 = vrot.slane %v1458_v27, 2  ;;  %v2918_v20 = vrot.slane %v1458_v27, 4  ;;  %2314 = vst.msk [vmem:[#allocation2 + $0x71] sm:$0xff] %vm475_vm3, %v1458_v27  ;;  %v2919_v38 = vrot.slane %v1458_v27, 6  ;;  %v4996_v42 = vld [vmem:[#allocation2 + $0x61] sm:$0xff] }
 0x4e2   : > { %v4973_v50 = vld.sshfl [vmem:[#allocation1] sm:$0xff pattern:$0x73625140]  ;;  %4064 = vrot.lane.b32.xlu0 %v4063_v34, %s4253_s30  ;;  %3189 = vst.msk [vmem:[#allocation3 + $0x19] sm:$0xf] %vm5341_vm5, %v3179_v58  ;;  %v3685_v25 = vrot.slane %v1458_v27, 9  ;;  %vm5349_vm5 = vmmov %vm5344_vm10 }
 0x4e3   : > { %v1441_v51 = vmul.f32 %v4231_v48, %v1430_v21  ;;  %2791 = vst [vmem:[#allocation1] ss:$4 sm:$0xff] %v2741_v40  ;;  %v3686_v1 = vrot.slane %v2917_v41, 9  ;;  %v3687_v61 = vrot.slane %v2918_v20, 9  ;;  %v3688_v7 = vrot.slane %v2919_v38, 9 }
 0x4e4   : > { %2792 = vst [vmem:[#allocation1 + $0x1] ss:$4 sm:$0xff] %v2742_v28  ;;  %v4987_v32 = vld.sshfl [vmem:[#allocation1 + $0x20] sm:$0xff pattern:$0x73625140]  ;;  %v3067_v60 = vadd.f32 %v3685_v25, %v1458_v27 }
 0x4e5   : > { %v1451_v31 = vadd.f32 %v4232_v62, %v1441_v51  ;;  %2793 = vst [vmem:[#allocation1 + $0x2] ss:$4 sm:$0xff] %v2743_v63  ;;  %v3068_v19 = vadd.f32 %v3686_v1, %v2917_v41  ;;  %v3069_v46 = vadd.f32 %v3687_v61, %v2918_v20  ;;  %v3070_v11 = vadd.f32 %v3688_v7, %v2919_v38 }
 0x4e6   : > { %2794 = vst [vmem:[#allocation1 + $0x3] ss:$4 sm:$0xff] %v4983_v6  ;;  %v5010_v41 = vperm.slane %v2730_v56, 0  ;;  %v3099_v20 = vmul.f32 0.5, %v3067_v60 }
 0x4e7   : > { %v1459_v53 = vmax.f32 %v1451_v31, 0.0  ;;  %2795 = vst [vmem:[#allocation1 + $0x20] ss:$4 sm:$0xff] %v2741_v40  ;;  %v5008_v40 = vperm.slane %v2729_v26, 0  ;;  %v3100_v44 = vmul.f32 0.5, %v3068_v19  ;;  %v3101_v30 = vmul.f32 0.5, %v3069_v46 }
 0x4e8   : > { %v2339_v17 = vld [vmem:[#allocation2 + $0x72] sm:$0xff]  ;;  %2796 = vst [vmem:[#allocation1 + $0x21] ss:$4 sm:$0xff] %v2742_v28  ;;  %v3102_v38 = vmul.f32 0.5, %v3070_v11  ;;  %v2359_v28 = vld [vmem:[#allocation2 + $0x42] sm:$0xff] }
 0x4e9   : > { %v2920_v54 = vrot.slane %v1459_v53, 2  ;;  %v2921_v10 = vrot.slane %v1459_v53, 4  ;;  %v2922_v43 = vrot.slane %v1459_v53, 6  ;;  %v3689_v13 = vrot.slane %v1459_v53, 9  ;;  %2315 = vst.msk [vmem:[#allocation2 + $0x81] sm:$0xff] %vm475_vm3, %v1459_v53  ;;  %v4993_v4 = vld [vmem:[#allocation2 + $0x71] sm:$0xff] }
 0x4ea   : > { %v4991_v23 = vpack.i.bf16 %v2339_v17, %v4985_v8  ;;  %v5002_v27 = vpack.i.bf16 %v4993_v4, %v4996_v42  ;;  %4079 = vrot.lane.b32.xlu0 %v4839_v9, %s4246_s18  ;;  %v2747_v9 = vperm.slane %v2731_v57, 0  ;;  %2797 = vst [vmem:[#allocation1 + $0x22] ss:$4 sm:$0xff] %v2743_v63  ;;  %v3194_v7 = vld [vmem:[#allocation3 + $0x18] sm:$0xf] }
 0x4eb   : > { %v3690_v16 = vrot.slane %v2920_v54, 9  ;;  %v3691_v12 = vrot.slane %v2921_v10, 9  ;;  %v3692_v22 = vrot.slane %v2922_v43, 9  ;;  %v3071_v34 = vadd.f32 %v3689_v13, %v1459_v53  ;;  %v3193_v63 = vld [vmem:[#allocation3 + $0x10] sm:$0xf] }
 0x4ec   : > { %4114 = vrot.lane.b32.xlu2 %v4991_v23, %s4246_s18  ;;  %4039 = vrot.lane.b32.xlu1 %v5002_v27, %s4244_s16  ;;  %v2748_v53 = vperm.slane %v2732_v18, 0  ;;  %2798 = vst [vmem:[#allocation1 + $0x23] ss:$4 sm:$0xff] %v4983_v6 }
 0x4ed   : > { %v3072_v47 = vadd.f32 %v3690_v16, %v2920_v54  ;;  %v3073_v37 = vadd.f32 %v3691_v12, %v2921_v10  ;;  %v3074_v21 = vadd.f32 %v3692_v22, %v2922_v43  ;;  %v3103_v48 = vmul.f32 0.5, %v3071_v34  ;;  %v5017_v31 = vld.sshfl [vmem:[#allocation1] sm:$0xff pattern:$0x73625140]  ;;  %v3191_v22 = vld [vmem:[#allocation3] sm:$0xf] }
 0x4ee   : > { %2801 = vst [vmem:[#allocation1] ss:$4 sm:$0xff] %v5008_v40  ;;  %v4093_v54 = vpack.i.bf16 %v2359_v28, %v4836_v52  ;;  %v5028_v52 = vld [vmem:[#allocation2 + $0x52] sm:$0xff] }
 0x4ef   : > { %v3104_v51 = vmul.f32 0.5, %v3072_v47  ;;  %v3105_v55 = vmul.f32 0.5, %v3073_v37  ;;  %v3106_v58 = vmul.f32 0.5, %v3074_v21  ;;  %v3119_v25 = vadd.f32 %v3103_v48, %v3099_v20  ;;  %2802 = vst [vmem:[#allocation1 + $0x1] ss:$4 sm:$0xff] %v5010_v41  ;;  %v5044_v37 = vld [vmem:[#allocation2 + $0x60] sm:$0xff] }
 0x4f0   : > { %v5014_v62 = vld [vmem:[#allocation2 + $0x82] sm:$0xff]  ;;  %2803 = vst [vmem:[#allocation1 + $0x2] ss:$4 sm:$0xff] %v2747_v9  ;;  %v4108_v57 = vpack.i.bf16 %v5028_v52, %v2359_v28  ;;  %v3198_v47 = vld [vmem:[#allocation3 + $0x19] sm:$0xf]  ;;  %v5048_v20 = vld [vmem:[#allocation2 + $0x50] sm:$0xff] }
 0x4f1   : > { %v4128_v26 = vpack.i.bf16 %v5014_v62, %v2339_v17  ;;  %v3120_v1 = vadd.f32 %v3104_v51, %v3100_v44  ;;  %v3121_v61 = vadd.f32 %v3105_v55, %v3101_v30  ;;  %v3122_v56 = vadd.f32 %v3106_v58, %v3102_v38  ;;  %2804 = vst [vmem:[#allocation1 + $0x3] ss:$4 sm:$0xff] %v2748_v53  ;;  %v2355_v18 = vld [vmem:[#allocation2 + $0x81] sm:$0xff]  ;;  %v3196_v55 = vld [vmem:[#allocation3 + $0x9] sm:$0xf] }
 0x4f2   : > { %v3135_v10 = vmul.f32 0.5, %v3119_v25  ;;  %4094 = vrot.lane.b32.xlu0 %v4093_v54, %s4252_s29  ;;  %3235 = vst [vmem:[#allocation1 + $0x10] ss:$2 sm:$0xff] %v3193_v63  ;;  %v5050_v44 = vld [vmem:[#allocation2 + $0x40] sm:$0xff]  ;;  %v4153_v30 = vpack.i.bf16 %v5044_v37, %v5048_v20  ;;  %v4123_v38 = vpack.i.bf16 %v2355_v18, %v4993_v4  ;;  %v3202_v4 = vld [vmem:[#allocation3 + $0x1a] sm:$0xf]  ;;  %v4138_v28 = vpack.i.bf16 %v4814_v33, %v2355_v18 }
 0x4f3   : > { %v3136_v43 = vmul.f32 0.5, %v3120_v1  ;;  %v3137_v13 = vmul.f32 0.5, %v3121_v61  ;;  %v3138_v60 = vmul.f32 0.5, %v3122_v56  ;;  %3237 = vst [vmem:[#allocation1 + $0x11] ss:$2 sm:$0xff] %v3194_v7  ;;  %v4083_v48 = vpack.i.bf16 %v5050_v44, %v4954_v14  ;;  %v2347_v7 = vld [vmem:[#allocation2 + $0x80] sm:$0xff] }
 0x4f4   : > { %4129 = vrot.lane.b32.xlu2 %v4128_v26, %s4252_s29  ;;  %v3167_v17 = vperm.slane %v3135_v10, 0  ;;  %4054 = vrot.lane.b32.xlu1 %v4053_v36, %s5340_s22  ;;  %v3197_v36 = vld [vmem:[#allocation3 + $0x11] sm:$0xf]  ;;  %v5046_v21 = vld.sshfl [vmem:[#allocation1 + $0x20] sm:$0xff pattern:$0x73625140]  ;;  %v4098_v26 = vpack.i.bf16 %v5048_v20, %v5050_v44  ;;  %v4148_v33 = vpack.i.bf16 %v4823_v15, %v5014_v62  ;;  %v4158_v15 = vpack.i.bf16 %v4996_v42, %v4931_v45 }
 0x4f5   : > { %v3168_v19 = vperm.slane %v3136_v43, 0  ;;  %v3169_v46 = vperm.slane %v3137_v13, 0  ;;  %v3170_v11 = vperm.slane %v3138_v60, 0  ;;  %2805 = vst [vmem:[#allocation1 + $0x20] ss:$4 sm:$0xff] %v5008_v40  ;;  %v4133_v62 = vpack.i.bf16 %v4816_v59, %v2347_v7 }
 0x4f6   : > { %2806 = vst [vmem:[#allocation1 + $0x21] ss:$4 sm:$0xff] %v5010_v41  ;;  %v3201_v40 = vld [vmem:[#allocation3 + $0x12] sm:$0xf]  ;;  %v3199_v41 = vld [vmem:[#allocation3 + $0x2] sm:$0xf]  ;;  %v4163_v59 = vpack.i.bf16 %v4985_v8, %v5028_v52 }
 0x4f7   : > { %v3180_v16 = vsel %vm1740_vm13, %v3168_v19, %v3167_v17  ;;  %2807 = vst [vmem:[#allocation1 + $0x22] ss:$4 sm:$0xff] %v2747_v9  ;;  %v3200_v9 = vld [vmem:[#allocation3 + $0xa] sm:$0xf]  ;;  %v3205_v1 = vld [vmem:[#allocation3 + $0x18] sm:$0xf]  ;;  %vm5346_vm13 = vmmov %vm5344_vm10 }
 0x4f8   : > { %v3181_v12 = vsel %vm1742_vm14, %v3169_v46, %v3180_v16  ;;  %v5037_v35 = vld.sshfl [vmem:[#allocation1] sm:$0xff pattern:$0x73625140]  ;;  %2808 = vst [vmem:[#allocation1 + $0x23] ss:$4 sm:$0xff] %v2748_v53  ;;  %v5073_v53 = vld [vmem:[#allocation2 + $0x70] sm:$0xff]  ;;  %vm5347_vm14 = vmmov %vm5344_vm10 }
 0x4f9   : > { %v3182_v34 = vsel %vm1744_vm15, %v3170_v11, %v3181_v12  ;;  %3231 = vst [vmem:[#allocation1] ss:$2 sm:$0xff] %v3191_v22  ;;  %v4118_v54 = vpack.i.bf16 %v2347_v7, %v5073_v53  ;;  %v3203_v10 = vld [vmem:[#allocation3 + $0x8] sm:$0xf]  ;;  %v3204_v13 = vld [vmem:[#allocation3 + $0x10] sm:$0xf]  ;;  %vm5348_vm15 = vmmov %vm5344_vm10 }
 0x4fa   : > { %3190 = vst.msk [vmem:[#allocation3 + $0x21] sm:$0xf] %vm5342_vm6, %v3182_v34  ;;  %4109 = vrot.lane.b32.xlu0 %v4108_v57, %s4255_s24  ;;  %v5042_v6 = vld.sshfl [vmem:[#allocation1 + $0x10] sm:$0xff pattern:$0x75316420]  ;;  %vm5350_vm6 = vmmov %vm5343_vm8 }
 0x4fb   : > { %3233 = vst [vmem:[#allocation1 + $0x1] ss:$2 sm:$0xff] %v3192_v29  ;;  %v3209_v60 = vld [vmem:[#allocation3 + $0x19] sm:$0xf]  ;;  %v3207_v19 = vld [vmem:[#allocation3 + $0x9] sm:$0xf] }
 0x4fc   : > { %4144 = vrot.lane.b32.xlu2 %v4108_v57, %s4246_s18  ;;  %4069 = vrot.lane.b32.xlu1 %v4826_v2, %s4254_s23  ;;  %3250 = vst [vmem:[#allocation1 + $0x10] ss:$2 sm:$0xff] %v3197_v36  ;;  %v3195_v2 = vld [vmem:[#allocation3 + $0x1] sm:$0xf]  ;;  %v3208_v11 = vld [vmem:[#allocation3 + $0x11] sm:$0xf] }
 0x4fd   : > { %3252 = vst [vmem:[#allocation1 + $0x11] ss:$2 sm:$0xff] %v3198_v47  ;;  %v3213_v16 = vld [vmem:[#allocation3 + $0x1a] sm:$0xf]  ;;  %v3218_v45 = vld [vmem:[#allocation3 + $0x28] sm:$0xf] }
 0x4fe   : > { %v3211_v42 = vld [vmem:[#allocation3 + $0xa] sm:$0xf]  ;;  %v3212_v36 = vld [vmem:[#allocation3 + $0x12] sm:$0xf] }
 0x4ff   : > { %v3215_v8 = vld [vmem:[#allocation3 + $0x10] sm:$0xf] }
 0x501   : > { %v3206_v61 = vld [vmem:[#allocation3 + $0x20] sm:$0xf] }
 0x502   : > { %4124 = vrot.lane.b32.xlu0 %v4123_v38, %s5340_s22  ;;  %v5061_v51 = vld.sshfl [vmem:[#allocation1] sm:$0xff pattern:$0x75316420]  ;;  %v3210_v17 = vld [vmem:[#allocation3 + $0x21] sm:$0xf] }
 0x503   : > { %3246 = vst [vmem:[#allocation1] ss:$2 sm:$0xff] %v3195_v2  ;;  %v3214_v34 = vld [vmem:[#allocation3 + $0x22] sm:$0xf]  ;;  %v3222_v2 = vld [vmem:[#allocation3 + $0x29] sm:$0xf] }
 0x504   : > { %4154 = vrot.lane.b32.xlu2 %v4153_v30, %s4248_s20  ;;  %4084 = vrot.lane.b32.xlu1 %v4083_v48, %s4248_s20  ;;  %3248 = vst [vmem:[#allocation1 + $0x1] ss:$2 sm:$0xff] %v3196_v55  ;;  %v5064_v58 = vld.sshfl [vmem:[#allocation1 + $0x10] sm:$0xff pattern:$0x75316420] }
 0x505   : > { %3269 = vst [vmem:[#allocation1 + $0x10] ss:$2 sm:$0xff] %v3201_v40  ;;  %v3217_v47 = vld [vmem:[#allocation3 + $0x20] sm:$0xf]  ;;  %v3216_v38 = vld [vmem:[#allocation3 + $0x18] sm:$0xf] }
 0x506   : > { %3271 = vst [vmem:[#allocation1 + $0x11] ss:$2 sm:$0xff] %v3202_v4  ;;  %v3221_v48 = vld [vmem:[#allocation3 + $0x21] sm:$0xf] }
 0x50a   : > { %4139 = vrot.lane.b32.xlu0 %v4138_v28, %s4254_s23  ;;  %v3219_v28 = vld [vmem:[#allocation3 + $0x11] sm:$0xf] }
 0x50b   : > { %v3253_v25 = vld.sshfl [vmem:[#allocation1] sm:$0xff pattern:$0x75316420] }
 0x50c   : > { %4099 = vrot.lane.b32.xlu1 %v4098_v26, %s4253_s30  ;;  %3265 = vst [vmem:[#allocation1] ss:$2 sm:$0xff] %v3199_v41  ;;  %v4168_v30 = vpack.i.bf16 %v5064_v58, %v3253_v25  ;;  %v3226_v58 = vld [vmem:[#allocation3 + $0x2a] sm:$0xf]  ;;  %v3220_v26 = vld [vmem:[#allocation3 + $0x19] sm:$0xf] }
 0x50d   : > { %3267 = vst [vmem:[#allocation1 + $0x1] ss:$2 sm:$0xff] %v3200_v9  ;;  %v3273_v56 = vld.sshfl [vmem:[#allocation1 + $0x10] sm:$0xff pattern:$0x75316420] }
 0x50e   : > { %3288 = vst [vmem:[#allocation1 + $0x10] ss:$2 sm:$0xff] %v3205_v1  ;;  %v3225_v9 = vld [vmem:[#allocation3 + $0x22] sm:$0xf] }
 0x50f   : > { %3290 = vst [vmem:[#allocation1 + $0x11] ss:$2 sm:$0xff] %v3206_v61  ;;  %v3223_v61 = vld [vmem:[#allocation3 + $0x12] sm:$0xf] }
 0x512   : > { %4149 = vrot.lane.b32.xlu0 %v4148_v33, %s4255_s24  ;;  %v3224_v33 = vld [vmem:[#allocation3 + $0x1a] sm:$0xf] }
 0x514   : > { %4119 = vrot.lane.b32.xlu1 %v4118_v54, %s4248_s20  ;;  %v3272_v43 = vld.sshfl [vmem:[#allocation1] sm:$0xff pattern:$0x75316420] }
 0x515   : > { %3284 = vst [vmem:[#allocation1] ss:$2 sm:$0xff] %v3203_v10  ;;  %v4173_v57 = vpack.i.bf16 %v3273_v56, %v3272_v43  ;;  %v4198_v56 = vpack.i.bf16 %v5073_v53, %v5044_v37  ;;  %v5103_v10 = vpop.permute.xlu2 %4029 }
 0x516   : > { %3286 = vst [vmem:[#allocation1 + $0x1] ss:$2 sm:$0xff] %v3204_v13  ;;  %v3292_v63 = vld.sshfl [vmem:[#allocation1 + $0x10] sm:$0xff pattern:$0x75316420] }
 0x517   : > { %3307 = vst [vmem:[#allocation1 + $0x10] ss:$2 sm:$0xff] %v3209_v60 }
 0x518   : > { %3309 = vst [vmem:[#allocation1 + $0x11] ss:$2 sm:$0xff] %v3210_v17 }
 0x51a   : > { %4159 = vrot.lane.b32.xlu0 %v4158_v15, %s5340_s22  ;;  %v4025_v15 = vpop.permute.xlu1 %4024 }
 0x51c   : > { %4134 = vrot.lane.b32.xlu1 %v4133_v62, %s4253_s30  ;;  %v2716_v62 = vld [vmem:[%s5325_s7 + $0x10] sm:$0x3] }
 0x51d   : > { %v3291_v46 = vld.sshfl [vmem:[#allocation1] sm:$0xff pattern:$0x75316420] }
 0x51e   : > { %v4178_v12 = vpack.i.bf16 %v3292_v63, %v3291_v46  ;;  %3303 = vst [vmem:[#allocation1] ss:$2 sm:$0xff] %v3207_v19 }
 0x51f   : > { %v3311_v22 = vld.sshfl [vmem:[#allocation1 + $0x10] sm:$0xff pattern:$0x75316420]  ;;  %3305 = vst [vmem:[#allocation1 + $0x1] ss:$2 sm:$0xff] %v3208_v11  ;;  %v2758_v11 = vunpack.c.l.b16 %v2716_v62 }
 0x520   : > { %3326 = vst [vmem:[#allocation1 + $0x10] ss:$2 sm:$0xff] %v3213_v16  ;;  %4179 = vrot.lane.b32.xlu2 %v4178_v12, %s4248_s20  ;;  %v4027_v12 = vunpack.i.h.bf16 %v4025_v15 }
 0x521   : > { %3328 = vst [vmem:[#allocation1 + $0x11] ss:$2 sm:$0xff] %v3214_v34  ;;  %v2316_v34 = vld [vmem:[#allocation2] sm:$0xff] }
 0x522   : > { %4174 = vrot.lane.b32.xlu0 %v4173_v57, %s4246_s18  ;;  %s3706_s18 = sshll.u32 %s5356_s26, 6 }
 0x524   : > { %4164 = vrot.lane.b32.xlu1 %v4163_v59, %s4252_s29  ;;  %v2645_v59 = vsel %vm475_vm3, %v4946_v0, %v4027_v12 }
 0x526   : > { %v3310_v29 = vld.sshfl [vmem:[#allocation1] sm:$0xff pattern:$0x75316420] }
 0x527   : > { %3322 = vst [vmem:[#allocation1] ss:$2 sm:$0xff] %v3211_v42  ;;  %v4183_v4 = vpack.i.bf16 %v3311_v22, %v3310_v29  ;;  %v4026_v22 = vunpack.i.l.bf16 %v4025_v15 }
 0x528   : > { %3324 = vst [vmem:[#allocation1 + $0x1] ss:$2 sm:$0xff] %v3212_v36  ;;  %v3330_v18 = vld.sshfl [vmem:[#allocation1 + $0x10] sm:$0xff pattern:$0x75316420] }
 0x529   : > { %3345 = vst [vmem:[#allocation1 + $0x10] ss:$2 sm:$0xff] %v3217_v47 }
 0x52a   : > { %3347 = vst [vmem:[#allocation1 + $0x11] ss:$2 sm:$0xff] %v3218_v45  ;;  %v2644_v45 = vsel %vm475_vm3, %v2316_v34, %v4026_v22 }
 0x52c   : > { %4169 = vrot.lane.b32.xlu1 %v4168_v30, %s4244_s16 }
 0x52f   : > { %v3329_v52 = vld.sshfl [vmem:[#allocation1] sm:$0xff pattern:$0x75316420] }
 0x530   : > { %3341 = vst [vmem:[#allocation1] ss:$2 sm:$0xff] %v3215_v8  ;;  %v4188_v55 = vpack.i.bf16 %v3330_v18, %v3329_v52 }
 0x531   : > { %3343 = vst [vmem:[#allocation1 + $0x1] ss:$2 sm:$0xff] %v3216_v38  ;;  %v3349_v40 = vld.sshfl [vmem:[#allocation1 + $0x10] sm:$0xff pattern:$0x75316420]  ;;  %v3713_v38 = vld [vmem:[%s5325_s7] sm:$0xff] }
 0x532   : > { %3364 = vst [vmem:[#allocation1 + $0x10] ss:$2 sm:$0xff] %v3221_v48  ;;  %4189 = vrot.lane.b32.xlu0 %v4188_v55, %s4252_s29 }
 0x533   : > { %3366 = vst [vmem:[#allocation1 + $0x11] ss:$2 sm:$0xff] %v3222_v2 }
 0x534   : > { %4184 = vrot.lane.b32.xlu1 %v4183_v4, %s5340_s22  ;;  %s5265_s22 = scalar_lea.vmem %s5330_s12, %s3706_s18 }
 0x538   : > { %v3348_v41 = vld.sshfl [vmem:[#allocation1] sm:$0xff pattern:$0x75316420] }
 0x539   : > { %v4193_v25 = vpack.i.bf16 %v3349_v40, %v3348_v41  ;;  %3360 = vst [vmem:[#allocation1] ss:$2 sm:$0xff] %v3219_v28 }
 0x53a   : > { %3362 = vst [vmem:[#allocation1 + $0x1] ss:$2 sm:$0xff] %v3220_v26  ;;  %4204 = vrot.lane.b32.xlu0 %v5002_v27, %s4254_s23  ;;  %v3368_v1 = vld.sshfl [vmem:[#allocation1 + $0x10] sm:$0xff pattern:$0x75316420] }
 0x53b   : > { %4194 = vrot.lane.b32.xlu2 %v4193_v25, %s4253_s30  ;;  %3383 = vst [vmem:[#allocation1 + $0x10] ss:$2 sm:$0xff] %v3225_v9 }
 0x53c   : > { %3385 = vst [vmem:[#allocation1 + $0x11] ss:$2 sm:$0xff] %v3226_v58 }
 0x541   : > { %v3367_v7 = vld.sshfl [vmem:[#allocation1] sm:$0xff pattern:$0x75316420] }
 0x542   : > { %3433 = vrot.lane.b32.xlu0 %v4956_v24, %s4251_s14  ;;  %v4208_v54 = vpack.i.bf16 %v3368_v1, %v3367_v7  ;;  %3379 = vst [vmem:[#allocation1] ss:$2 sm:$0xff] %v3223_v61  ;;  %v4045_v24 = vpop.permute.xlu2 %4044 }
 0x543   : > { %4199 = vrot.lane.b32.xlu2 %v4198_v56, %s4253_s30  ;;  %3381 = vst [vmem:[#allocation1 + $0x1] ss:$2 sm:$0xff] %v3224_v33  ;;  %v3387_v43 = vld.sshfl [vmem:[#allocation1 + $0x10] sm:$0xff pattern:$0x75316420]  ;;  %v4047_v47 = vunpack.i.h.bf16 %v4045_v24  ;;  %v4046_v18 = vunpack.i.l.bf16 %v4045_v24 }
 0x544   : > { %4209 = vrot.lane.b32.xlu1 %v4208_v54, %s4254_s23  ;;  %v5101_v27 = vpop.permute.xlu0 %4034 }
 0x545   : > { %v2652_v0 = vsel %vm833_vm7, %v2644_v45, %v4046_v18  ;;  %v2653_v48 = vsel %vm833_vm7, %v2645_v59, %v4047_v47 }
 0x54a   : > { %v3386_v13 = vld.sshfl [vmem:[#allocation1] sm:$0xff pattern:$0x75316420]  ;;  %v4060_v19 = vpop.permute.xlu2 %4059 }
 0x54b   : > { %3431 = vrot.lane.b32.xlu2 %v4919_v3, %s4251_s14  ;;  %v4213_v60 = vpack.i.bf16 %v3387_v43, %v3386_v13  ;;  %v2761_v3 = vpack.c.b16 %v2758_v11, %v2758_v11  ;;  %v4062_v28 = vunpack.i.h.bf16 %v4060_v19  ;;  %v4061_v41 = vunpack.i.l.bf16 %v4060_v19 }
 0x54c   : > { %v4050_v63 = vpop.permute.xlu0 %4049  ;;  %v4032_v11 = vunpack.i.h.bf16 %v5103_v10 }
 0x54d   : > { %4214 = vrot.lane.b32.xlu1 %v4213_v60, %s4255_s24  ;;  %v2832_v57 = vsel %vm5343_vm8, %v2761_v3, 0  ;;  %v4052_v42 = vunpack.i.h.bf16 %v4050_v63  ;;  %v4051_v29 = vunpack.i.l.bf16 %v4050_v63  ;;  %v4031_v3 = vunpack.i.l.bf16 %v5103_v10  ;;  %vm5351_vm8 = vmmov %vm5349_vm5 }
 0x54e   : > { %2839 = vmatpush.bf16.msra.mxu0 %v2832_v57  ;;  %3717 = vmatpush.bf16.msrb.mxu3 %v2832_v57  ;;  %v2647_v59 = vsel %vm475_vm3, %v4954_v14, %v4032_v11 }
 0x54f   : > { %v2661_v55 = vsel %vm839_vm9, %v2653_v48, %v4052_v42  ;;  %v2660_v40 = vsel %vm839_vm9, %v2652_v0, %v4051_v29  ;;  %v2646_v45 = vsel %vm475_vm3, %v4939_v39, %v4031_v3 }
 0x552   : > { %v4075_v2 = vpop.permute.xlu2 %4074 }
 0x553   : > { %v4077_v54 = vunpack.i.h.bf16 %v4075_v2  ;;  %v4076_v43 = vunpack.i.l.bf16 %v4075_v2 }
 0x554   : > { %v4065_v17 = vpop.permute.xlu0 %4064 }
 0x555   : > { %4219 = vrot.lane.b32.xlu1 %v4991_v23, %s4255_s24  ;;  %v3714_v23 = vld [vmem:[%s5325_s7 + $0x8] sm:$0xff]  ;;  %v4067_v25 = vunpack.i.h.bf16 %v4065_v17  ;;  %v4066_v1 = vunpack.i.l.bf16 %v4065_v17 }
 0x556   : > { %2840 = vmatpush.bf16.msra.mxu0 %v3714_v23  ;;  %3718 = vmatpush.bf16.msrb.mxu3 %v3714_v23 }
 0x55a   : > { %2841 = vmatpush.bf16.msra.mxu0 %v3713_v38  ;;  %3719 = vmatpush.bf16.msrb.mxu3 %v3713_v38  ;;  %v4090_v63 = vpop.permute.xlu2 %4089 }
 0x55b   : > { %v4091_v2 = vunpack.i.l.bf16 %v4090_v63 }
 0x55c   : > { %v5113_v46 = vpop.permute.xlu0 %4079 }
 0x55d   : > { %v4082_v12 = vunpack.i.h.bf16 %v5113_v46  ;;  %v4081_v22 = vunpack.i.l.bf16 %v5113_v46 }
 0x55e   : > { %v5115_v16 = vpop.permute.xlu1 %4039 }
 0x55f   : > { %v2655_v29 = vsel %vm833_vm7, %v2647_v59, %v4082_v12  ;;  %v2654_v10 = vsel %vm833_vm7, %v2646_v45, %v4081_v22 }
 0x562   : > { %v4105_v42 = vpop.permute.xlu2 %4104 }
 0x564   : > { %v5124_v36 = vpop.permute.xlu0 %4094 }
 0x565   : > { %v4097_v14 = vunpack.i.h.bf16 %v5124_v36  ;;  %v4096_v39 = vunpack.i.l.bf16 %v5124_v36  ;;  %v4041_v36 = vunpack.i.l.bf16 %v5115_v16 }
 0x566   : > { %v4055_v30 = vpop.permute.xlu1 %4054 }
 0x567   : > { %v4057_v8 = vunpack.i.h.bf16 %v4055_v30  ;;  %v4056_v52 = vunpack.i.l.bf16 %v4055_v30  ;;  %v4092_v30 = vunpack.i.h.bf16 %v4090_v63 }
 0x569   : > { %v2669_v4 = vsel %vm845_vm11, %v2661_v55, %v4057_v8  ;;  %v2668_v58 = vsel %vm845_vm11, %v2660_v40, %v4056_v52  ;;  %v4107_v55 = vunpack.i.h.bf16 %v4105_v42  ;;  %v4106_v40 = vunpack.i.l.bf16 %v4105_v42 }
 0x56a   : > { %v2677_v26 = vsel %vm5344_vm10, %v2669_v4, %v4062_v28  ;;  %v2676_v9 = vsel %vm5345_vm12, %v2668_v58, %v4061_v41  ;;  %v4115_v28 = vpop.permute.xlu2 %4114  ;;  %vm5352_vm10 = vmmov %vm5349_vm5 }
 0x56b   : > { %v2684_v13 = vsel %vm2256_vm1, %v2676_v9, %v4066_v1  ;;  %v2685_v60 = vsel %vm2256_vm1, %v2677_v26, %v4067_v25  ;;  %v4042_v1 = vunpack.i.h.bf16 %v5115_v16  ;;  %v4117_v16 = vunpack.i.h.bf16 %v4115_v28  ;;  %vm5353_vm12 = vmmov %vm5349_vm5 }
 0x56c   : > { %v4110_v56 = vpop.permute.xlu0 %4109 }
 0x56d   : > { %v4112_v41 = vunpack.i.h.bf16 %v4110_v56  ;;  %v4111_v26 = vunpack.i.l.bf16 %v4110_v56  ;;  %v2650_v56 = vsel %vm475_vm3, %v5044_v37, %v4041_v36 }
 0x56e   : > { %v4070_v61 = vpop.permute.xlu1 %4069 }
 0x56f   : > { %v4072_v7 = vunpack.i.h.bf16 %v4070_v61  ;;  %v4071_v33 = vunpack.i.l.bf16 %v4070_v61 }
 0x571   : > { %v2692_v24 = vsel %vm2259_vm2, %v2684_v13, %v4071_v33  ;;  %v2693_v15 = vsel %vm2259_vm2, %v2685_v60, %v4072_v7  ;;  %v2651_v60 = vsel %vm475_vm3, %v5073_v53, %v4042_v1 }
 0x572   : > { %v2700_v62 = vsel %vm2262_vm0, %v2692_v24, %v4076_v43  ;;  %v2701_v19 = vsel %vm2262_vm0, %v2693_v15, %v4077_v54  ;;  %v4116_v24 = vunpack.i.l.bf16 %v4115_v28  ;;  %v4130_v12 = vpop.permute.xlu2 %4129 }
 0x573   : > { %v2708_v17 = vpack.c.bf16 %v2701_v19, %v2700_v62  ;;  %v4131_v59 = vunpack.i.l.bf16 %v4130_v12 }
 0x574   : > { %v4125_v47 = vpop.permute.xlu0 %4124  ;;  %v2658_v19 = vsel %vm833_vm7, %v2650_v56, %v4116_v24 }
 0x575   : > { %3657 = vmatmul.msk.bf16.vlgmr.msra.gmra.mxu0 %vm2286_vm4, %v2708_v17  ;;  %v2659_v17 = vsel %vm833_vm7, %v2651_v60, %v4117_v16  ;;  %v4127_v37 = vunpack.i.h.bf16 %v4125_v47  ;;  %v4126_v22 = vunpack.i.l.bf16 %v4125_v47  ;;  %v3415_v47 = vld [vmem:[%s5326_s8 + $0x10] sm:$0x3] }
 0x576   : > { %v4085_v34 = vpop.permute.xlu1 %4084 }
 0x577   : > { %v4087_v57 = vunpack.i.h.bf16 %v4085_v34  ;;  %v4086_v23 = vunpack.i.l.bf16 %v4085_v34 }
 0x579   : > { %v2663_v18 = vsel %vm839_vm9, %v2655_v29, %v4087_v57  ;;  %v2662_v46 = vsel %vm839_vm9, %v2654_v10, %v4086_v23  ;;  %v4132_v23 = vunpack.i.h.bf16 %v4130_v12  ;;  %v4036_v12 = vunpack.i.l.bf16 %v5101_v27 }
 0x57a   : > { %v2671_v8 = vsel %vm845_vm11, %v2663_v18, %v4092_v30  ;;  %v2670_v52 = vsel %vm845_vm11, %v2662_v46, %v4091_v2 }
 0x57b   : > { %v2678_v4 = vsel %vm5346_vm13, %v2670_v52, %v4096_v39  ;;  %v2679_v58 = vsel %vm5347_vm14, %v2671_v8, %v4097_v14  ;;  %v3425_v39 = vunpack.c.l.b16 %v3415_v47  ;;  %vm5354_vm13 = vmmov %vm5349_vm5 }
 0x57c   : > { %v4140_v33 = vpop.permute.xlu0 %4139 }
 0x57d   : > { %v4142_v42 = vunpack.i.h.bf16 %v4140_v33  ;;  %v4141_v18 = vunpack.i.l.bf16 %v4140_v33 }
 0x57e   : > { %v4100_v38 = vpop.permute.xlu1 %4099 }
 0x57f   : > { %v4102_v0 = vunpack.i.h.bf16 %v4100_v38  ;;  %v4101_v48 = vunpack.i.l.bf16 %v4100_v38 }
 0x581   : > { %v2686_v9 = vsel %vm2256_vm1, %v2678_v4, %v4101_v48  ;;  %v2687_v25 = vsel %vm2256_vm1, %v2679_v58, %v4102_v0 }
 0x582   : > { %v2694_v61 = vsel %vm2259_vm2, %v2686_v9, %v4106_v40  ;;  %v2695_v7 = vsel %vm2259_vm2, %v2687_v25, %v4107_v55  ;;  %v3428_v40 = vpack.c.b16 %v3425_v39, %v3425_v39  ;;  %v3715_v25 = vld [vmem:[%s5326_s8] sm:$0xff] }
 0x583   : > { %v2702_v54 = vsel %vm2262_vm0, %v2694_v61, %v4111_v26  ;;  %v2703_v43 = vsel %vm2262_vm0, %v2695_v7, %v4112_v41  ;;  %v3716_v41 = vld [vmem:[%s5326_s8 + $0x8] sm:$0xff]  ;;  %v4145_v26 = vpop.permute.xlu2 %4144 }
 0x584   : > { %v2709_v13 = vpack.c.bf16 %v2703_v43, %v2702_v54  ;;  %v4150_v34 = vpop.permute.xlu0 %4149  ;;  %v3441_v58 = vsel %vm5350_vm6, %v3428_v40, 0 }
 0x585   : > { %v4152_v46 = vunpack.i.h.bf16 %v4150_v34  ;;  %v4151_v8 = vunpack.i.l.bf16 %v4150_v34  ;;  %3448 = vmatpush.bf16.msra.mxu2 %v3441_v58 }
 0x586   : > { %v4120_v63 = vpop.permute.xlu1 %4119  ;;  %3658 = vmatmul.msk.bf16.gmra.mxu0 %vm2286_vm4, %v2709_v13 }
 0x587   : > { %v4122_v15 = vunpack.i.h.bf16 %v4120_v63  ;;  %v4121_v62 = vunpack.i.l.bf16 %v4120_v63 }
 0x589   : > { %v2666_v11 = vsel %vm839_vm9, %v2658_v19, %v4121_v62  ;;  %v2667_v3 = vsel %vm839_vm9, %v2659_v17, %v4122_v15  ;;  %3449 = vmatpush.bf16.msra.mxu2 %v3716_v41 }
 0x58a   : > { %v2674_v53 = vsel %vm845_vm11, %v2666_v11, %v4126_v22  ;;  %v2675_v57 = vsel %vm845_vm11, %v2667_v3, %v4127_v37  ;;  %v4037_v3 = vunpack.i.h.bf16 %v5101_v27 }
 0x58b   : > { %v2682_v30 = vsel %vm5348_vm15, %v2674_v53, %v4131_v59  ;;  %v2683_v2 = vsel %vm5349_vm5, %v2675_v57, %v4132_v23  ;;  %v4155_v36 = vpop.permute.xlu2 %4154 }
 0x58c   : > { %v5202_v1 = vpop.permute.xlu0 %4159  ;;  %v2649_v59 = vsel %vm475_vm3, %v5048_v20, %v4037_v3  ;;  %v4157_v47 = vunpack.i.h.bf16 %v4155_v36 }
 0x58d   : > { %3450 = vmatpush.bf16.msra.mxu2 %v3715_v25 }
 0x58e   : > { %v4135_v45 = vpop.permute.xlu1 %4134 }
 0x58f   : > { %v4137_v29 = vunpack.i.h.bf16 %v4135_v45  ;;  %v4136_v10 = vunpack.i.l.bf16 %v4135_v45  ;;  %v2648_v45 = vsel %vm475_vm3, %v5050_v44, %v4036_v12 }
 0x591   : > { %v2690_v52 = vsel %vm2256_vm1, %v2682_v30, %v4136_v10  ;;  %v2691_v14 = vsel %vm2256_vm1, %v2683_v2, %v4137_v29 }
 0x592   : > { %v2698_v38 = vsel %vm2259_vm2, %v2690_v52, %v4141_v18  ;;  %v2699_v0 = vsel %vm2259_vm2, %v2691_v14, %v4142_v42  ;;  %v4147_v18 = vunpack.i.h.bf16 %v4145_v26  ;;  %v4162_v52 = vunpack.i.h.bf16 %v5202_v1 }
 0x593   : > { %v2706_v48 = vsel %vm2262_vm0, %v2698_v38, %v4151_v8  ;;  %v2707_v55 = vsel %vm2262_vm0, %v2699_v0, %v4152_v46  ;;  %v4180_v43 = vpop.permute.xlu2 %4179  ;;  %v4146_v46 = vunpack.i.l.bf16 %v4145_v26  ;;  %v4156_v8 = vunpack.i.l.bf16 %v4155_v36 }
 0x594   : > { %v2711_v4 = vpack.c.bf16 %v2707_v55, %v2706_v48  ;;  %v4175_v7 = vpop.permute.xlu0 %4174  ;;  %v4182_v17 = vunpack.i.h.bf16 %v4180_v43  ;;  %v4181_v11 = vunpack.i.l.bf16 %v4180_v43  ;;  %v4161_v14 = vunpack.i.l.bf16 %v5202_v1 }
 0x595   : > { %v4177_v60 = vunpack.i.h.bf16 %v4175_v7  ;;  %v4176_v63 = vunpack.i.l.bf16 %v4175_v7  ;;  %v2657_v58 = vsel %vm833_vm7, %v2649_v59, %v4147_v18  ;;  %v2656_v41 = vsel %vm833_vm7, %v2648_v45, %v4146_v46 }
 0x596   : > { %3660 = vmatmul.msk.bf16.vlgmr.msrb.gmra.mxu3 %vm2286_vm4, %v2711_v4  ;;  %v5194_v28 = vpop.permute.xlu1 %4164  ;;  %v2664_v1 = vsel %vm839_vm9, %v2656_v41, %v4156_v8  ;;  %v2665_v36 = vsel %vm839_vm9, %v2657_v58, %v4157_v47 }
 0x597   : > { %v4167_v48 = vunpack.i.h.bf16 %v5194_v28  ;;  %v4166_v55 = vunpack.i.l.bf16 %v5194_v28  ;;  %v2672_v28 = vsel %vm845_vm11, %v2664_v1, %v4161_v14 }
 0x599   : > { %v2680_v43 = vsel %vm5354_vm13, %v2672_v28, %v4166_v55 }
 0x59e   : > { %v4170_v9 = vpop.permute.xlu1 %4169 }
 0x59f   : > { %v4172_v33 = vunpack.i.h.bf16 %v4170_v9  ;;  %v4171_v54 = vunpack.i.l.bf16 %v4170_v9 }
 0x5a1   : > { %v3395_v13 = vsel %vm475_vm3, %v5042_v6, %v4172_v33  ;;  %v3394_v56 = vsel %vm475_vm3, %v5061_v51, %v4171_v54  ;;  %v4195_v6 = vpop.permute.xlu2 %4194  ;;  %v2673_v33 = vsel %vm845_vm11, %v2665_v36, %v4162_v52 }
 0x5a2   : > { %v3396_v16 = vsel %vm833_vm7, %v3394_v56, %v4176_v63  ;;  %v3397_v24 = vsel %vm833_vm7, %v3395_v13, %v4177_v60  ;;  %v4197_v30 = vunpack.i.h.bf16 %v4195_v6  ;;  %v4196_v2 = vunpack.i.l.bf16 %v4195_v6  ;;  %v5251_v6 = vld [vmem:[%s5328_s10] ss:$0 sm:$0xff] }
 0x5a3   : > { %v3398_v22 = vsel %vm839_vm9, %v3396_v16, %v4181_v11  ;;  %v3399_v51 = vsel %vm839_vm9, %v3397_v24, %v4182_v17  ;;  %v2681_v54 = vsel %vm5353_vm12, %v2673_v33, %v4167_v48 }
 0x5a4   : > { %v4190_v37 = vpop.permute.xlu0 %4189 }
 0x5a5   : > { %v4192_v57 = vunpack.i.h.bf16 %v4190_v37  ;;  %v4191_v23 = vunpack.i.l.bf16 %v4190_v37 }
 0x5a6   : > { %v4185_v61 = vpop.permute.xlu1 %4184 }
 0x5a7   : > { %v4187_v15 = vunpack.i.h.bf16 %v4185_v61  ;;  %v4186_v62 = vunpack.i.l.bf16 %v4185_v61 }
 0x5a9   : > { %v3401_v34 = vsel %vm845_vm11, %v3399_v51, %v4187_v15  ;;  %v3400_v53 = vsel %vm845_vm11, %v3398_v22, %v4186_v62  ;;  %v4200_v61 = vpop.permute.xlu2 %4199 }
 0x5aa   : > { %v3402_v27 = vsel %vm5351_vm8, %v3400_v53, %v4191_v23  ;;  %v3403_v42 = vsel %vm5352_vm10, %v3401_v34, %v4192_v57  ;;  %v4202_v60 = vunpack.i.h.bf16 %v4200_v61  ;;  %v4201_v63 = vunpack.i.l.bf16 %v4200_v61  ;;  %v5257_v34 = vld [vmem:[%s5328_s10 + $0x1] ss:$0 sm:$0xff] }
 0x5ab   : > { %v3404_v39 = vsel %vm2256_vm1, %v3402_v27, %v4196_v2  ;;  %v3405_v44 = vsel %vm2256_vm1, %v3403_v42, %v4197_v30 }
 0x5ac   : > { %v4205_v26 = vpop.permute.xlu0 %4204  ;;  %v2688_v24 = vsel %vm2256_vm1, %v2680_v43, %v4201_v63  ;;  %v2689_v15 = vsel %vm2256_vm1, %v2681_v54, %v4202_v60 }
 0x5ad   : > { %v4207_v13 = vunpack.i.h.bf16 %v4205_v26  ;;  %v4206_v56 = vunpack.i.l.bf16 %v4205_v26  ;;  %v4230_v26 = vld [vmem:[%s5329_s11 + $0x1] ss:$0 sm:$0xff] }
 0x5af   : > { %v2696_v17 = vsel %vm2259_vm2, %v2688_v24, %v4206_v56  ;;  %v2697_v11 = vsel %vm2259_vm2, %v2689_v15, %v4207_v13 }
 0x5b4   : > { %v3434_v33 = vpop.permute.xlu0 %3433 }
 0x5b6   : > { %v4210_v19 = vpop.permute.xlu1 %4209 }
 0x5b7   : > { %v4212_v29 = vunpack.i.h.bf16 %v4210_v19  ;;  %v4211_v10 = vunpack.i.l.bf16 %v4210_v19 }
 0x5b9   : > { %v3407_v40 = vsel %vm2259_vm2, %v3405_v44, %v4212_v29  ;;  %v3406_v4 = vsel %vm2259_vm2, %v3404_v39, %v4211_v10 }
 0x5bf   : > { %v4215_v20 = vpop.permute.xlu1 %4214 }
 0x5c0   : > { %v4217_v38 = vunpack.i.h.bf16 %v4215_v20  ;;  %v4216_v0 = vunpack.i.l.bf16 %v4215_v20 }
 0x5c2   : > { %v3409_v9 = vsel %vm2262_vm0, %v3407_v40, %v4217_v38  ;;  %v3408_v25 = vsel %vm2262_vm0, %v3406_v4, %v4216_v0  ;;  %v2810_v38 = vld.sshfl [vmem:[#allocation1 + $0x20] sm:$0xff pattern:$0x73625140]  ;;  %v3432_v4 = vpop.permute.xlu2 %3431 }
 0x5c3   : > { %v3410_v7 = vpack.c.bf16 %v3409_v9, %v3408_v25 }
 0x5c5   : > { %3701 = vmatmul.msk.bf16.vlgmr.msra.gmra.mxu2 %vm2286_vm4, %v3410_v7 }
 0x5c7   : > { %v4220_v16 = vpop.permute.xlu1 %4219 }
 0x5c8   : > { %v4222_v62 = vunpack.i.h.bf16 %v4220_v16  ;;  %v4221_v19 = vunpack.i.l.bf16 %v4220_v16 }
 0x5ca   : > { %v2704_v3 = vsel %vm2262_vm0, %v2696_v17, %v4221_v19  ;;  %v2705_v12 = vsel %vm2262_vm0, %v2697_v11, %v4222_v62 }
 0x5cb   : > { %v2710_v37 = vpack.c.bf16 %v2705_v12, %v2704_v3 }
 0x5cd   : > { %3659 = vmatmul.msk.bf16.gmra.mxu0 %vm2286_vm4, %v2710_v37 }
 0x5f2   : > { %v2843_v22 = vpop.f32.mrf.mxu0 }
 0x5f3   : > { %v2844_v51 = vadd.f32 %v2843_v22, %v4950_v5 }
 0x5f5   : > { %v2865_v53 = vmul.f32 %v5251_v6, %v2844_v51 }
 0x5f7   : > { %v2875_v57 = vadd.f32 %v5257_v34, %v2865_v53 }
 0x5f9   : > { %v2883_v23 = vmax.f32 %v2875_v57, 0.0 }
 0x5fa   : > { %v2845_v5 = vpop.f32.mrf.mxu0 }
 0x5fb   : > { %3467 = vst.msk [vmem:[%s5265_s22] sm:$0xff] %vm475_vm3, %v2883_v23  ;;  %v2846_v59 = vadd.f32 %v2845_v5, %v4944_v49 }
 0x5fd   : > { %v2866_v45 = vmul.f32 %v5251_v6, %v2846_v59 }
 0x5ff   : > { %v2876_v27 = vadd.f32 %v5257_v34, %v2866_v45 }
 0x601   : > { %v2884_v42 = vmax.f32 %v2876_v27, 0.0 }
 0x603   : > { %3468 = vst.msk [vmem:[%s5265_s22 + $0x8] sm:$0xff] %vm475_vm3, %v2884_v42  ;;  %v2848_v29 = vpop.f32.mrf.mxu0 }
 0x604   : > { %v2849_v10 = vadd.f32 %v2848_v29, %v4973_v50 }
 0x606   : > { %v2867_v18 = vmul.f32 %v5251_v6, %v2849_v10 }
 0x608   : > { %v2877_v46 = vadd.f32 %v5257_v34, %v2867_v18 }
 0x60a   : > { %v2885_v30 = vmax.f32 %v2877_v46, 0.0 }
 0x60b   : > { %v2850_v2 = vpop.f32.mrf.mxu0 }
 0x60c   : > { %3469 = vst.msk [vmem:[%s5265_s22 + $0x10] sm:$0xff] %vm475_vm3, %v2885_v30  ;;  %v2851_v49 = vadd.f32 %v2850_v2, %v4987_v32 }
 0x60e   : > { %v2868_v47 = vmul.f32 %v5251_v6, %v2851_v49 }
 0x610   : > { %v2878_v8 = vadd.f32 %v5257_v34, %v2868_v47 }
 0x612   : > { %v2886_v52 = vmax.f32 %v2878_v8, 0.0 }
 0x614   : > { %3470 = vst.msk [vmem:[%s5265_s22 + $0x18] sm:$0xff] %vm475_vm3, %v2886_v52 }
 0x619   : > { %v2858_v50 = vpop.f32.mrf.mxu3 }
 0x61a   : > { %v2859_v14 = vadd.f32 %v2858_v50, %v5037_v35  ;;  %v4229_v35 = vld [vmem:[%s5329_s11] ss:$0 sm:$0xff] }
 0x61c   : > { %v2871_v20 = vmul.f32 %v5251_v6, %v2859_v14 }
 0x61e   : > { %v2881_v39 = vadd.f32 %v5257_v34, %v2871_v20 }
 0x620   : > { %v2889_v44 = vmax.f32 %v2881_v39, 0.0 }
 0x621   : > { %v2860_v0 = vpop.f32.mrf.mxu3 }
 0x622   : > { %3473 = vst.msk [vmem:[%s5265_s22 + $0x30] sm:$0xff] %vm475_vm3, %v2889_v44  ;;  %v2861_v32 = vadd.f32 %v2860_v0, %v2810_v38 }
 0x624   : > { %v2872_v48 = vmul.f32 %v5251_v6, %v2861_v32 }
 0x626   : > { %v2882_v55 = vadd.f32 %v5257_v34, %v2872_v48 }
 0x628   : > { %v2890_v40 = vmax.f32 %v2882_v55, 0.0 }
 0x62a   : > { %3474 = vst.msk [vmem:[%s5265_s22 + $0x38] sm:$0xff] %vm475_vm3, %v2890_v40 }
 0x648   : > { %v3452_v58 = vpop.f32.mrf.mxu2 }
 0x649   : > { %v3453_v41 = vadd.f32 %v3452_v58, %v3432_v4 }
 0x64a   : > { %v2853_v9 = vpop.f32.mrf.mxu0 }
 0x64b   : > { %v3459_v25 = vmul.f32 %v4229_v35, %v3453_v41  ;;  %v2854_v1 = vadd.f32 %v2853_v9, %v5017_v31 }
 0x64d   : > { %v3463_v36 = vadd.f32 %v4230_v26, %v3459_v25  ;;  %v2869_v61 = vmul.f32 %v5251_v6, %v2854_v1 }
 0x64f   : > { %v3465_v7 = vmax.f32 %v3463_v36, 0.0  ;;  %v2879_v28 = vadd.f32 %v5257_v34, %v2869_v61 }
 0x650   : > { %v3454_v54 = vpop.f32.mrf.mxu2 }
 0x651   : > { %3475 = vst.msk [vmem:[%s473_s17] sm:$0xff] %vm475_vm3, %v3465_v7  ;;  %v2887_v43 = vmax.f32 %v2879_v28, 0.0  ;;  %v3455_v13 = vadd.f32 %v3454_v54, %v3434_v33 }
 0x652   : > { %v2855_v56 = vpop.f32.mrf.mxu0 }
 0x653   : > { %3471 = vst.msk [vmem:[%s5265_s22 + $0x20] sm:$0xff] %vm475_vm3, %v2887_v43  ;;  %v3460_v31 = vmul.f32 %v4229_v35, %v3455_v13  ;;  %v2856_v60 = vadd.f32 %v2855_v56, %v5046_v21 }
 0x655   : > { %v3464_v63 = vadd.f32 %v4230_v26, %v3460_v31  ;;  %v2870_v16 = vmul.f32 %v5251_v6, %v2856_v60 }
 0x657   : > { %v3466_v24 = vmax.f32 %v3464_v63, 0.0  ;;  %v2880_v15 = vadd.f32 %v5257_v34, %v2870_v16 }
 0x659   : > { %3476 = vst.msk [vmem:[%s473_s17 + $0x8] sm:$0xff] %vm475_vm3, %v3466_v24  ;;  %v2888_v62 = vmax.f32 %v2880_v15, 0.0 }
 0x65b   : > { %3472 = vst.msk [vmem:[%s5265_s22 + $0x28] sm:$0xff] %vm475_vm3, %v2888_v62 }
 0x65c PF: > { %s24_s25 = sadd.s32 1, %s4239_s25  }
 0x65d   : > { %p21_p4 = scmp.ge.s32.totalorder %s24_s25, 4  }
 0x65f   :  { %23 = sbr.rel (!%p21_p4) target bundleno = 1 (0x1), region = 241 }

</bundles_post_ra>
